<compile_context>
chip_gen: v7x
topology: tpu7x:2x2x1
jax: 0.10.0
libtpu: 0.0.40
codegen_flags: <defaults>
</compile_context>

<pallas_src>
import functools
import math

import jax
import jax.numpy as jnp
import numpy as np
from jax.experimental import pallas as pl
from jax.experimental.pallas import tpu as pltpu


def _round_up(x, m):
    return ((x + m - 1) // m) * m


# ----------------------------------------------------------------------------
# Fused kernel: 3x3 conv (unrolled tap accumulation on the MXU) + bias + PReLU.
# One image per grid step (grid axis 0 = batch, "parallel").
#
#   x_ref     : (1, Cin, H, W)    un-padded f32 image block
#   w_ref     : (k*k, Cout, Cin)  bf16 weights, tap index t = di*k + dj
#   b_ref     : (Cout, 1)         f32 bias
#   alpha_ref : (1,)              f32 PReLU shared alpha (SMEM)
#   o_ref     : (1, Cout, N)      f32 conv+bias+PReLU on the flat (H, WPAD) grid
#   xpad_ref  : (Cin, LFLAT)      bf16 VMEM scratch: zero-padded, row-flattened
#                                 image with each row lane-padded to WPAD
# ----------------------------------------------------------------------------
def _conv3x3_bias_prelu_kernel(x_ref, w_ref, b_ref, alpha_ref, o_ref, xpad_ref,
                               *, k, pad, img_h, img_w, wpad, n_out):
    # --- 1) In-kernel zero padding (no host-side pad pass) ------------------
    xpad_ref[...] = jnp.zeros_like(xpad_ref)
    for hh in range(img_h):  # static unroll; see TODO(synk) above for large H
        row = x_ref[0, :, hh, :].astype(xpad_ref.dtype)            # (Cin, W) bf16
        xpad_ref[:, pl.ds((hh + pad) * wpad + pad, img_w)] = row

    # --- 2) Unrolled per-tap accumulation (bf16 x bf16 -> f32 on the MXU) ---
    # Flat output position q = h*WPAD + w reads padded position q + di*WPAD + dj;
    # di*WPAD is a multiple of 128 (lane-aligned), only dj shifts lanes.
    acc = None
    for di in range(k):
        for dj in range(k):
            off = di * wpad + dj
            tap = xpad_ref[:, pl.ds(off, n_out)]                   # (Cin, N) bf16
            part = jnp.dot(w_ref[di * k + dj], tap,
                           preferred_element_type=jnp.float32)     # (Cout, N) f32
            acc = part if acc is None else acc + part

    # --- 3) f32 epilogue: bias + PReLU (single shared alpha) ----------------
    acc = acc + b_ref[...]                                         # (Cout,1) bcast
    alpha = alpha_ref[0]                                           # SMEM scalar
    o_ref[0] = jnp.where(acc >= 0.0, acc, alpha * acc).astype(o_ref.dtype)


# ----------------------------------------------------------------------------
# Module forward: fused conv3x3(+bias,+PReLU) kernel -> pixel_shuffle (XLA)
# ----------------------------------------------------------------------------
def pixel_shuffle_pack_forward(x, params, scale):
    """x: (B, C, H, W) f32 NCHW.  Returns (B, C//scale^2, H*scale, W*scale)."""
    w = params["conv_w"]            # (C, C, 3, 3) OIHW
    b = params["conv_b"]            # (C,)
    alpha = params["prelu_alpha"]   # (1,)

    B, C, H, W = x.shape
    O, I, kh, kw = w.shape
    assert O == C and I == C and kh == kw  # PixelShufflePack uses square conv
    assert C % (scale * scale) == 0
    k = kh
    pad = k // 2
    Hp, Wp = H + 2 * pad, W + 2 * pad
    WPAD = _round_up(Wp, 128)                 # lane-padded row width
    N = H * WPAD                              # flat output extent (valid rows only)
    LFLAT = _round_up(Hp * WPAD + (k - 1), 128)   # scratch incl. tap tail slack

    # Weights as (k*k, Cout, Cin) bf16; bias stays f32 for the epilogue.
    wtap = jnp.transpose(w, (2, 3, 0, 1)).reshape(k * k, C, C).astype(jnp.bfloat16)
    bias = b.reshape(C, 1).astype(jnp.float32)

    kernel = functools.partial(_conv3x3_bias_prelu_kernel,
                               k=k, pad=pad, img_h=H, img_w=W, wpad=WPAD, n_out=N)

    conv_flat = pl.pallas_call(
        kernel,
        out_shape=jax.ShapeDtypeStruct((B, C, N), jnp.float32),
        grid=(B,),
        in_specs=[
            pl.BlockSpec((1, C, H, W), lambda bi: (bi, 0, 0, 0)),   # raw image
            pl.BlockSpec((k * k, C, C), lambda bi: (0, 0, 0)),      # weights (resident)
            pl.BlockSpec((C, 1), lambda bi: (0, 0)),                # bias (resident)
            pl.BlockSpec(memory_space=pltpu.MemorySpace.SMEM),      # alpha scalar
        ],
        out_specs=pl.BlockSpec((1, C, N), lambda bi: (bi, 0, 0)),
        scratch_shapes=[pltpu.VMEM((C, LFLAT), jnp.bfloat16)],
        compiler_params=pltpu.CompilerParams(
            dimension_semantics=("parallel",),       # B>=2 keeps both v7x TCs busy
            vmem_limit_bytes=48 * 1024 * 1024),      # <= v7x 64 MiB physical
    )(x.astype(jnp.float32), wtap, bias, alpha.astype(jnp.float32))

    # Exit: free reshape, W-crop fuses into the pixel_shuffle transpose.
    conv = conv_flat.reshape(B, C, H, WPAD)[:, :, :, :W]            # (B, C, H, W)
    # TODO(synk): pixel_shuffle is a pure channel->space permutation; left as a
    # single fused XLA slice+transpose rather than in-kernel strided stores.
    r = scale
    Cps = C // (r * r)
    y = conv.reshape(B, Cps, r, r, H, W).transpose(0, 1, 4, 2, 5, 3)
    return y.reshape(B, Cps, H * r, W * r)
    # Note: PReLU-before-shuffle is valid only because alpha is a single shared
    # scalar (nn.PReLU() default).  Per-channel alpha would need indexing by
    # cps = c // r^2 or application after the shuffle.


# ----------------------------------------------------------------------------
# Deterministic parameter init (PyTorch Conv2d-style uniform bounds; PReLU=0.25)
# ----------------------------------------------------------------------------
def init_params(key, channels, k=3):
    kw_, kb_ = jax.random.split(key)
    bound = 1.0 / math.sqrt(channels * k * k)
    w = jax.random.uniform(kw_, (channels, channels, k, k), jnp.float32,
                           -bound, bound)
    b = jax.random.uniform(kb_, (channels,), jnp.float32, -bound, bound)
    return {"conv_w": w, "conv_b": b,
            "prelu_alpha": jnp.array([0.25], jnp.float32)}


# ----------------------------------------------------------------------------
# Pure-JAX reference (lax.conv + pixel_shuffle + PReLU)
# ----------------------------------------------------------------------------
def _ref_forward(x, params, scale):
    w, b, alpha = params["conv_w"], params["conv_b"], params["prelu_alpha"]
    y = jax.lax.conv_general_dilated(
        x, w, (1, 1), [(1, 1), (1, 1)],
        dimension_numbers=("NCHW", "OIHW", "NCHW"),
        precision=jax.lax.Precision.HIGHEST)
    y = y + b[None, :, None, None]
    B, C, H, W = y.shape
    r = scale
    y = y.reshape(B, C // (r * r), r, r, H, W)
    y = y.transpose(0, 1, 4, 2, 5, 3).reshape(B, C // (r * r), H * r, W * r)
    return jnp.where(y >= 0, y, alpha[0] * y)


# ----------------------------------------------------------------------------
if __name__ == "__main__":
    # PixelShufflePack(in_channels=4, scale=2) on a (2, 4, 16, 16) input.
    B, C, H, W, scale = 2, 4, 16, 16, 2

    root = jax.random.PRNGKey(0)
    kx, kp = jax.random.split(root)
    x = jax.random.normal(kx, (B, C, H, W), jnp.float32)
    params = init_params(kp, C)

    fwd = jax.jit(lambda xx: pixel_shuffle_pack_forward(xx, params, scale))
    out = fwd(x)
    jax.block_until_ready(out)

    ref = jax.jit(lambda xx: _ref_forward(xx, params, scale))(x)
    jax.block_until_ready(ref)

    assert out.shape == (B, C // (scale * scale), H * scale, W * scale), out.shape
    # bf16 matmul operands with f32 accumulation vs. HIGHEST-precision f32 ref.
    np.testing.assert_allclose(np.asarray(out), np.asarray(ref),
                               rtol=2e-2, atol=2e-2)

    print("KERNEL_OK")
</pallas_src>

<mosaic_0001>
module attributes {stable_mosaic.version = 11 : i64} {
  func.func @_conv3x3_bias_prelu_kernel(%arg0: i32, %arg1: memref<1x4x16x16xf32, #tpu.memory_space<vmem>>, %arg2: memref<9x4x4xbf16, #tpu.memory_space<vmem>>, %arg3: memref<4x1xf32, #tpu.memory_space<vmem>>, %arg4: memref<1xf32, #tpu.memory_space<smem>>, %arg5: memref<1x4x2048xf32, #tpu.memory_space<vmem>>, %arg6: memref<4x2432xbf16, #tpu.memory_space<vmem>>) attributes {dimension_semantics = [#tpu.dimension_semantics<parallel>], iteration_bounds = array<i64: 2>, scalar_prefetch = 0 : i64, scratch_operands = 1 : i64, tpu.core_type = #tpu.core_type<tc>, window_params = [{transform_indices = @transform_0, window_bounds = array<i64: 1, 4, 16, 16>}, {pipeline_mode = #tpu.pipeline_mode<synchronous>, transform_indices = @transform_1, window_bounds = array<i64: 9, 4, 4>}, {pipeline_mode = #tpu.pipeline_mode<synchronous>, transform_indices = @transform_2, window_bounds = array<i64: 4, 1>}, {transform_indices = @transform_3, window_bounds = array<i64: 1>}, {transform_indices = @transform_4, window_bounds = array<i64: 1, 4, 2048>}]} {
    %cst = arith.constant 0.000000e+00 : bf16
    %0 = vector.broadcast %cst : bf16 to vector<4x2432xbf16>
    %c0 = arith.constant 0 : index
    %c0_0 = arith.constant 0 : index
    %1 = vector.load %arg6[%c0, %c0_0] : memref<4x2432xbf16, #tpu.memory_space<vmem>>, vector<4x2432xbf16>
    tpu.vector_store %arg6[%c0, %c0_0], %0 {strides = array<i32>} : memref<4x2432xbf16, #tpu.memory_space<vmem>>, vector<4x2432xbf16>,
    %c0_1 = arith.constant 0 : index
    %c0_2 = arith.constant 0 : index
    %c0_3 = arith.constant 0 : index
    %c0_4 = arith.constant 0 : index
    %2 = vector.load %arg1[%c0_1, %c0_2, %c0_3, %c0_4] : memref<1x4x16x16xf32, #tpu.memory_space<vmem>>, vector<1x4x1x16xf32>
    %3 = vector.shape_cast %2 : vector<1x4x1x16xf32> to vector<4x16xf32>
    %4 = arith.truncf %3 : vector<4x16xf32> to vector<4x16xbf16>
    %c0_5 = arith.constant 0 : index
    %c129 = arith.constant 129 : index
    %5 = vector.load %arg6[%c0_5, %c129] : memref<4x2432xbf16, #tpu.memory_space<vmem>>, vector<4x16xbf16>
    tpu.vector_store %arg6[%c0_5, %c129], %4 {strides = array<i32>} : memref<4x2432xbf16, #tpu.memory_space<vmem>>, vector<4x16xbf16>,
    %c0_6 = arith.constant 0 : index
    %c0_7 = arith.constant 0 : index
    %c1 = arith.constant 1 : index
    %c0_8 = arith.constant 0 : index
    %6 = vector.load %arg1[%c0_6, %c0_7, %c1, %c0_8] : memref<1x4x16x16xf32, #tpu.memory_space<vmem>>, vector<1x4x1x16xf32>
    %7 = vector.shape_cast %6 : vector<1x4x1x16xf32> to vector<4x16xf32>
    %8 = arith.truncf %7 : vector<4x16xf32> to vector<4x16xbf16>
    %c0_9 = arith.constant 0 : index
    %c257 = arith.constant 257 : index
    %9 = vector.load %arg6[%c0_9, %c257] : memref<4x2432xbf16, #tpu.memory_space<vmem>>, vector<4x16xbf16>
    tpu.vector_store %arg6[%c0_9, %c257], %8 {strides = array<i32>} : memref<4x2432xbf16, #tpu.memory_space<vmem>>, vector<4x16xbf16>,
    %c0_10 = arith.constant 0 : index
    %c0_11 = arith.constant 0 : index
    %c2 = arith.constant 2 : index
    %c0_12 = arith.constant 0 : index
    %10 = vector.load %arg1[%c0_10, %c0_11, %c2, %c0_12] : memref<1x4x16x16xf32, #tpu.memory_space<vmem>>, vector<1x4x1x16xf32>
    %11 = vector.shape_cast %10 : vector<1x4x1x16xf32> to vector<4x16xf32>
    %12 = arith.truncf %11 : vector<4x16xf32> to vector<4x16xbf16>
    %c0_13 = arith.constant 0 : index
    %c385 = arith.constant 385 : index
    %13 = vector.load %arg6[%c0_13, %c385] : memref<4x2432xbf16, #tpu.memory_space<vmem>>, vector<4x16xbf16>
    tpu.vector_store %arg6[%c0_13, %c385], %12 {strides = array<i32>} : memref<4x2432xbf16, #tpu.memory_space<vmem>>, vector<4x16xbf16>,
    %c0_14 = arith.constant 0 : index
    %c0_15 = arith.constant 0 : index
    %c3 = arith.constant 3 : index
    %c0_16 = arith.constant 0 : index
    %14 = vector.load %arg1[%c0_14, %c0_15, %c3, %c0_16] : memref<1x4x16x16xf32, #tpu.memory_space<vmem>>, vector<1x4x1x16xf32>
    %15 = vector.shape_cast %14 : vector<1x4x1x16xf32> to vector<4x16xf32>
    %16 = arith.truncf %15 : vector<4x16xf32> to vector<4x16xbf16>
    %c0_17 = arith.constant 0 : index
    %c513 = arith.constant 513 : index
    %17 = vector.load %arg6[%c0_17, %c513] : memref<4x2432xbf16, #tpu.memory_space<vmem>>, vector<4x16xbf16>
    tpu.vector_store %arg6[%c0_17, %c513], %16 {strides = array<i32>} : memref<4x2432xbf16, #tpu.memory_space<vmem>>, vector<4x16xbf16>,
    %c0_18 = arith.constant 0 : index
    %c0_19 = arith.constant 0 : index
    %c4 = arith.constant 4 : index
    %c0_20 = arith.constant 0 : index
    %18 = vector.load %arg1[%c0_18, %c0_19, %c4, %c0_20] : memref<1x4x16x16xf32, #tpu.memory_space<vmem>>, vector<1x4x1x16xf32>
    %19 = vector.shape_cast %18 : vector<1x4x1x16xf32> to vector<4x16xf32>
    %20 = arith.truncf %19 : vector<4x16xf32> to vector<4x16xbf16>
    %c0_21 = arith.constant 0 : index
    %c641 = arith.constant 641 : index
    %21 = vector.load %arg6[%c0_21, %c641] : memref<4x2432xbf16, #tpu.memory_space<vmem>>, vector<4x16xbf16>
    tpu.vector_store %arg6[%c0_21, %c641], %20 {strides = array<i32>} : memref<4x2432xbf16, #tpu.memory_space<vmem>>, vector<4x16xbf16>,
    %c0_22 = arith.constant 0 : index
    %c0_23 = arith.constant 0 : index
    %c5 = arith.constant 5 : index
    %c0_24 = arith.constant 0 : index
    %22 = vector.load %arg1[%c0_22, %c0_23, %c5, %c0_24] : memref<1x4x16x16xf32, #tpu.memory_space<vmem>>, vector<1x4x1x16xf32>
    %23 = vector.shape_cast %22 : vector<1x4x1x16xf32> to vector<4x16xf32>
    %24 = arith.truncf %23 : vector<4x16xf32> to vector<4x16xbf16>
    %c0_25 = arith.constant 0 : index
    %c769 = arith.constant 769 : index
    %25 = vector.load %arg6[%c0_25, %c769] : memref<4x2432xbf16, #tpu.memory_space<vmem>>, vector<4x16xbf16>
    tpu.vector_store %arg6[%c0_25, %c769], %24 {strides = array<i32>} : memref<4x2432xbf16, #tpu.memory_space<vmem>>, vector<4x16xbf16>,
    %c0_26 = arith.constant 0 : index
    %c0_27 = arith.constant 0 : index
    %c6 = arith.constant 6 : index
    %c0_28 = arith.constant 0 : index
    %26 = vector.load %arg1[%c0_26, %c0_27, %c6, %c0_28] : memref<1x4x16x16xf32, #tpu.memory_space<vmem>>, vector<1x4x1x16xf32>
    %27 = vector.shape_cast %26 : vector<1x4x1x16xf32> to vector<4x16xf32>
    %28 = arith.truncf %27 : vector<4x16xf32> to vector<4x16xbf16>
    %c0_29 = arith.constant 0 : index
    %c897 = arith.constant 897 : index
    %29 = vector.load %arg6[%c0_29, %c897] : memref<4x2432xbf16, #tpu.memory_space<vmem>>, vector<4x16xbf16>
    tpu.vector_store %arg6[%c0_29, %c897], %28 {strides = array<i32>} : memref<4x2432xbf16, #tpu.memory_space<vmem>>, vector<4x16xbf16>,
    %c0_30 = arith.constant 0 : index
    %c0_31 = arith.constant 0 : index
    %c7 = arith.constant 7 : index
    %c0_32 = arith.constant 0 : index
    %30 = vector.load %arg1[%c0_30, %c0_31, %c7, %c0_32] : memref<1x4x16x16xf32, #tpu.memory_space<vmem>>, vector<1x4x1x16xf32>
    %31 = vector.shape_cast %30 : vector<1x4x1x16xf32> to vector<4x16xf32>
    %32 = arith.truncf %31 : vector<4x16xf32> to vector<4x16xbf16>
    %c0_33 = arith.constant 0 : index
    %c1025 = arith.constant 1025 : index
    %33 = vector.load %arg6[%c0_33, %c1025] : memref<4x2432xbf16, #tpu.memory_space<vmem>>, vector<4x16xbf16>
    tpu.vector_store %arg6[%c0_33, %c1025], %32 {strides = array<i32>} : memref<4x2432xbf16, #tpu.memory_space<vmem>>, vector<4x16xbf16>,
    %c0_34 = arith.constant 0 : index
    %c0_35 = arith.constant 0 : index
    %c8 = arith.constant 8 : index
    %c0_36 = arith.constant 0 : index
    %34 = vector.load %arg1[%c0_34, %c0_35, %c8, %c0_36] : memref<1x4x16x16xf32, #tpu.memory_space<vmem>>, vector<1x4x1x16xf32>
    %35 = vector.shape_cast %34 : vector<1x4x1x16xf32> to vector<4x16xf32>
    %36 = arith.truncf %35 : vector<4x16xf32> to vector<4x16xbf16>
    %c0_37 = arith.constant 0 : index
    %c1153 = arith.constant 1153 : index
    %37 = vector.load %arg6[%c0_37, %c1153] : memref<4x2432xbf16, #tpu.memory_space<vmem>>, vector<4x16xbf16>
    tpu.vector_store %arg6[%c0_37, %c1153], %36 {strides = array<i32>} : memref<4x2432xbf16, #tpu.memory_space<vmem>>, vector<4x16xbf16>,
    %c0_38 = arith.constant 0 : index
    %c0_39 = arith.constant 0 : index
    %c9 = arith.constant 9 : index
    %c0_40 = arith.constant 0 : index
    %38 = vector.load %arg1[%c0_38, %c0_39, %c9, %c0_40] : memref<1x4x16x16xf32, #tpu.memory_space<vmem>>, vector<1x4x1x16xf32>
    %39 = vector.shape_cast %38 : vector<1x4x1x16xf32> to vector<4x16xf32>
    %40 = arith.truncf %39 : vector<4x16xf32> to vector<4x16xbf16>
    %c0_41 = arith.constant 0 : index
    %c1281 = arith.constant 1281 : index
    %41 = vector.load %arg6[%c0_41, %c1281] : memref<4x2432xbf16, #tpu.memory_space<vmem>>, vector<4x16xbf16>
    tpu.vector_store %arg6[%c0_41, %c1281], %40 {strides = array<i32>} : memref<4x2432xbf16, #tpu.memory_space<vmem>>, vector<4x16xbf16>,
    %c0_42 = arith.constant 0 : index
    %c0_43 = arith.constant 0 : index
    %c10 = arith.constant 10 : index
    %c0_44 = arith.constant 0 : index
    %42 = vector.load %arg1[%c0_42, %c0_43, %c10, %c0_44] : memref<1x4x16x16xf32, #tpu.memory_space<vmem>>, vector<1x4x1x16xf32>
    %43 = vector.shape_cast %42 : vector<1x4x1x16xf32> to vector<4x16xf32>
    %44 = arith.truncf %43 : vector<4x16xf32> to vector<4x16xbf16>
    %c0_45 = arith.constant 0 : index
    %c1409 = arith.constant 1409 : index
    %45 = vector.load %arg6[%c0_45, %c1409] : memref<4x2432xbf16, #tpu.memory_space<vmem>>, vector<4x16xbf16>
    tpu.vector_store %arg6[%c0_45, %c1409], %44 {strides = array<i32>} : memref<4x2432xbf16, #tpu.memory_space<vmem>>, vector<4x16xbf16>,
    %c0_46 = arith.constant 0 : index
    %c0_47 = arith.constant 0 : index
    %c11 = arith.constant 11 : index
    %c0_48 = arith.constant 0 : index
    %46 = vector.load %arg1[%c0_46, %c0_47, %c11, %c0_48] : memref<1x4x16x16xf32, #tpu.memory_space<vmem>>, vector<1x4x1x16xf32>
    %47 = vector.shape_cast %46 : vector<1x4x1x16xf32> to vector<4x16xf32>
    %48 = arith.truncf %47 : vector<4x16xf32> to vector<4x16xbf16>
    %c0_49 = arith.constant 0 : index
    %c1537 = arith.constant 1537 : index
    %49 = vector.load %arg6[%c0_49, %c1537] : memref<4x2432xbf16, #tpu.memory_space<vmem>>, vector<4x16xbf16>
    tpu.vector_store %arg6[%c0_49, %c1537], %48 {strides = array<i32>} : memref<4x2432xbf16, #tpu.memory_space<vmem>>, vector<4x16xbf16>,
    %c0_50 = arith.constant 0 : index
    %c0_51 = arith.constant 0 : index
    %c12 = arith.constant 12 : index
    %c0_52 = arith.constant 0 : index
    %50 = vector.load %arg1[%c0_50, %c0_51, %c12, %c0_52] : memref<1x4x16x16xf32, #tpu.memory_space<vmem>>, vector<1x4x1x16xf32>
    %51 = vector.shape_cast %50 : vector<1x4x1x16xf32> to vector<4x16xf32>
    %52 = arith.truncf %51 : vector<4x16xf32> to vector<4x16xbf16>
    %c0_53 = arith.constant 0 : index
    %c1665 = arith.constant 1665 : index
    %53 = vector.load %arg6[%c0_53, %c1665] : memref<4x2432xbf16, #tpu.memory_space<vmem>>, vector<4x16xbf16>
    tpu.vector_store %arg6[%c0_53, %c1665], %52 {strides = array<i32>} : memref<4x2432xbf16, #tpu.memory_space<vmem>>, vector<4x16xbf16>,
    %c0_54 = arith.constant 0 : index
    %c0_55 = arith.constant 0 : index
    %c13 = arith.constant 13 : index
    %c0_56 = arith.constant 0 : index
    %54 = vector.load %arg1[%c0_54, %c0_55, %c13, %c0_56] : memref<1x4x16x16xf32, #tpu.memory_space<vmem>>, vector<1x4x1x16xf32>
    %55 = vector.shape_cast %54 : vector<1x4x1x16xf32> to vector<4x16xf32>
    %56 = arith.truncf %55 : vector<4x16xf32> to vector<4x16xbf16>
    %c0_57 = arith.constant 0 : index
    %c1793 = arith.constant 1793 : index
    %57 = vector.load %arg6[%c0_57, %c1793] : memref<4x2432xbf16, #tpu.memory_space<vmem>>, vector<4x16xbf16>
    tpu.vector_store %arg6[%c0_57, %c1793], %56 {strides = array<i32>} : memref<4x2432xbf16, #tpu.memory_space<vmem>>, vector<4x16xbf16>,
    %c0_58 = arith.constant 0 : index
    %c0_59 = arith.constant 0 : index
    %c14 = arith.constant 14 : index
    %c0_60 = arith.constant 0 : index
    %58 = vector.load %arg1[%c0_58, %c0_59, %c14, %c0_60] : memref<1x4x16x16xf32, #tpu.memory_space<vmem>>, vector<1x4x1x16xf32>
    %59 = vector.shape_cast %58 : vector<1x4x1x16xf32> to vector<4x16xf32>
    %60 = arith.truncf %59 : vector<4x16xf32> to vector<4x16xbf16>
    %c0_61 = arith.constant 0 : index
    %c1921 = arith.constant 1921 : index
    %61 = vector.load %arg6[%c0_61, %c1921] : memref<4x2432xbf16, #tpu.memory_space<vmem>>, vector<4x16xbf16>
    tpu.vector_store %arg6[%c0_61, %c1921], %60 {strides = array<i32>} : memref<4x2432xbf16, #tpu.memory_space<vmem>>, vector<4x16xbf16>,
    %c0_62 = arith.constant 0 : index
    %c0_63 = arith.constant 0 : index
    %c15 = arith.constant 15 : index
    %c0_64 = arith.constant 0 : index
    %62 = vector.load %arg1[%c0_62, %c0_63, %c15, %c0_64] : memref<1x4x16x16xf32, #tpu.memory_space<vmem>>, vector<1x4x1x16xf32>
    %63 = vector.shape_cast %62 : vector<1x4x1x16xf32> to vector<4x16xf32>
    %64 = arith.truncf %63 : vector<4x16xf32> to vector<4x16xbf16>
    %c0_65 = arith.constant 0 : index
    %c2049 = arith.constant 2049 : index
    %65 = vector.load %arg6[%c0_65, %c2049] : memref<4x2432xbf16, #tpu.memory_space<vmem>>, vector<4x16xbf16>
    tpu.vector_store %arg6[%c0_65, %c2049], %64 {strides = array<i32>} : memref<4x2432xbf16, #tpu.memory_space<vmem>>, vector<4x16xbf16>,
    %c0_66 = arith.constant 0 : index
    %c0_67 = arith.constant 0 : index
    %66 = vector.load %arg6[%c0_66, %c0_67] : memref<4x2432xbf16, #tpu.memory_space<vmem>>, vector<4x2048xbf16>
    %c0_68 = arith.constant 0 : index
    %c0_69 = arith.constant 0 : index
    %c0_70 = arith.constant 0 : index
    %67 = vector.load %arg2[%c0_68, %c0_69, %c0_70] : memref<9x4x4xbf16, #tpu.memory_space<vmem>>, vector<1x4x4xbf16>
    %68 = vector.shape_cast %67 : vector<1x4x4xbf16> to vector<4x4xbf16>
    %cst_71 = arith.constant dense<0.000000e+00> : vector<4x2048xf32>
    %69 = tpu.matmul %68, %66, %cst_71 {dimension_numbers = #tpu.dot_dimension_numbers<[1], [0], [0], [1], [0, 0, 1, 1], [], []>} : vector<4x4xbf16>, vector<4x2048xbf16>, vector<4x2048xf32> -> vector<4x2048xf32>
    %c0_72 = arith.constant 0 : index
    %c1_73 = arith.constant 1 : index
    %70 = vector.load %arg6[%c0_72, %c1_73] : memref<4x2432xbf16, #tpu.memory_space<vmem>>, vector<4x2048xbf16>
    %c1_74 = arith.constant 1 : index
    %c0_75 = arith.constant 0 : index
    %c0_76 = arith.constant 0 : index
    %71 = vector.load %arg2[%c1_74, %c0_75, %c0_76] : memref<9x4x4xbf16, #tpu.memory_space<vmem>>, vector<1x4x4xbf16>
    %72 = vector.shape_cast %71 : vector<1x4x4xbf16> to vector<4x4xbf16>
    %cst_77 = arith.constant dense<0.000000e+00> : vector<4x2048xf32>
    %73 = tpu.matmul %72, %70, %cst_77 {dimension_numbers = #tpu.dot_dimension_numbers<[1], [0], [0], [1], [0, 0, 1, 1], [], []>} : vector<4x4xbf16>, vector<4x2048xbf16>, vector<4x2048xf32> -> vector<4x2048xf32>
    %74 = arith.addf %69, %73 : vector<4x2048xf32>
    %c0_78 = arith.constant 0 : index
    %c2_79 = arith.constant 2 : index
    %75 = vector.load %arg6[%c0_78, %c2_79] : memref<4x2432xbf16, #tpu.memory_space<vmem>>, vector<4x2048xbf16>
    %c2_80 = arith.constant 2 : index
    %c0_81 = arith.constant 0 : index
    %c0_82 = arith.constant 0 : index
    %76 = vector.load %arg2[%c2_80, %c0_81, %c0_82] : memref<9x4x4xbf16, #tpu.memory_space<vmem>>, vector<1x4x4xbf16>
    %77 = vector.shape_cast %76 : vector<1x4x4xbf16> to vector<4x4xbf16>
    %cst_83 = arith.constant dense<0.000000e+00> : vector<4x2048xf32>
    %78 = tpu.matmul %77, %75, %cst_83 {dimension_numbers = #tpu.dot_dimension_numbers<[1], [0], [0], [1], [0, 0, 1, 1], [], []>} : vector<4x4xbf16>, vector<4x2048xbf16>, vector<4x2048xf32> -> vector<4x2048xf32>
    %79 = arith.addf %74, %78 : vector<4x2048xf32>
    %c0_84 = arith.constant 0 : index
    %c128 = arith.constant 128 : index
    %80 = vector.load %arg6[%c0_84, %c128] : memref<4x2432xbf16, #tpu.memory_space<vmem>>, vector<4x2048xbf16>
    %c3_85 = arith.constant 3 : index
    %c0_86 = arith.constant 0 : index
    %c0_87 = arith.constant 0 : index
    %81 = vector.load %arg2[%c3_85, %c0_86, %c0_87] : memref<9x4x4xbf16, #tpu.memory_space<vmem>>, vector<1x4x4xbf16>
    %82 = vector.shape_cast %81 : vector<1x4x4xbf16> to vector<4x4xbf16>
    %cst_88 = arith.constant dense<0.000000e+00> : vector<4x2048xf32>
    %83 = tpu.matmul %82, %80, %cst_88 {dimension_numbers = #tpu.dot_dimension_numbers<[1], [0], [0], [1], [0, 0, 1, 1], [], []>} : vector<4x4xbf16>, vector<4x2048xbf16>, vector<4x2048xf32> -> vector<4x2048xf32>
    %84 = arith.addf %79, %83 : vector<4x2048xf32>
    %c0_89 = arith.constant 0 : index
    %c129_90 = arith.constant 129 : index
    %85 = vector.load %arg6[%c0_89, %c129_90] : memref<4x2432xbf16, #tpu.memory_space<vmem>>, vector<4x2048xbf16>
    %c4_91 = arith.constant 4 : index
    %c0_92 = arith.constant 0 : index
    %c0_93 = arith.constant 0 : index
    %86 = vector.load %arg2[%c4_91, %c0_92, %c0_93] : memref<9x4x4xbf16, #tpu.memory_space<vmem>>, vector<1x4x4xbf16>
    %87 = vector.shape_cast %86 : vector<1x4x4xbf16> to vector<4x4xbf16>
    %cst_94 = arith.constant dense<0.000000e+00> : vector<4x2048xf32>
    %88 = tpu.matmul %87, %85, %cst_94 {dimension_numbers = #tpu.dot_dimension_numbers<[1], [0], [0], [1], [0, 0, 1, 1], [], []>} : vector<4x4xbf16>, vector<4x2048xbf16>, vector<4x2048xf32> -> vector<4x2048xf32>
    %89 = arith.addf %84, %88 : vector<4x2048xf32>
    %c0_95 = arith.constant 0 : index
    %c130 = arith.constant 130 : index
    %90 = vector.load %arg6[%c0_95, %c130] : memref<4x2432xbf16, #tpu.memory_space<vmem>>, vector<4x2048xbf16>
    %c5_96 = arith.constant 5 : index
    %c0_97 = arith.constant 0 : index
    %c0_98 = arith.constant 0 : index
    %91 = vector.load %arg2[%c5_96, %c0_97, %c0_98] : memref<9x4x4xbf16, #tpu.memory_space<vmem>>, vector<1x4x4xbf16>
    %92 = vector.shape_cast %91 : vector<1x4x4xbf16> to vector<4x4xbf16>
    %cst_99 = arith.constant dense<0.000000e+00> : vector<4x2048xf32>
    %93 = tpu.matmul %92, %90, %cst_99 {dimension_numbers = #tpu.dot_dimension_numbers<[1], [0], [0], [1], [0, 0, 1, 1], [], []>} : vector<4x4xbf16>, vector<4x2048xbf16>, vector<4x2048xf32> -> vector<4x2048xf32>
    %94 = arith.addf %89, %93 : vector<4x2048xf32>
    %c0_100 = arith.constant 0 : index
    %c256 = arith.constant 256 : index
    %95 = vector.load %arg6[%c0_100, %c256] : memref<4x2432xbf16, #tpu.memory_space<vmem>>, vector<4x2048xbf16>
    %c6_101 = arith.constant 6 : index
    %c0_102 = arith.constant 0 : index
    %c0_103 = arith.constant 0 : index
    %96 = vector.load %arg2[%c6_101, %c0_102, %c0_103] : memref<9x4x4xbf16, #tpu.memory_space<vmem>>, vector<1x4x4xbf16>
    %97 = vector.shape_cast %96 : vector<1x4x4xbf16> to vector<4x4xbf16>
    %cst_104 = arith.constant dense<0.000000e+00> : vector<4x2048xf32>
    %98 = tpu.matmul %97, %95, %cst_104 {dimension_numbers = #tpu.dot_dimension_numbers<[1], [0], [0], [1], [0, 0, 1, 1], [], []>} : vector<4x4xbf16>, vector<4x2048xbf16>, vector<4x2048xf32> -> vector<4x2048xf32>
    %99 = arith.addf %94, %98 : vector<4x2048xf32>
    %c0_105 = arith.constant 0 : index
    %c257_106 = arith.constant 257 : index
    %100 = vector.load %arg6[%c0_105, %c257_106] : memref<4x2432xbf16, #tpu.memory_space<vmem>>, vector<4x2048xbf16>
    %c7_107 = arith.constant 7 : index
    %c0_108 = arith.constant 0 : index
    %c0_109 = arith.constant 0 : index
    %101 = vector.load %arg2[%c7_107, %c0_108, %c0_109] : memref<9x4x4xbf16, #tpu.memory_space<vmem>>, vector<1x4x4xbf16>
    %102 = vector.shape_cast %101 : vector<1x4x4xbf16> to vector<4x4xbf16>
    %cst_110 = arith.constant dense<0.000000e+00> : vector<4x2048xf32>
    %103 = tpu.matmul %102, %100, %cst_110 {dimension_numbers = #tpu.dot_dimension_numbers<[1], [0], [0], [1], [0, 0, 1, 1], [], []>} : vector<4x4xbf16>, vector<4x2048xbf16>, vector<4x2048xf32> -> vector<4x2048xf32>
    %104 = arith.addf %99, %103 : vector<4x2048xf32>
    %c0_111 = arith.constant 0 : index
    %c258 = arith.constant 258 : index
    %105 = vector.load %arg6[%c0_111, %c258] : memref<4x2432xbf16, #tpu.memory_space<vmem>>, vector<4x2048xbf16>
    %c8_112 = arith.constant 8 : index
    %c0_113 = arith.constant 0 : index
    %c0_114 = arith.constant 0 : index
    %106 = vector.load %arg2[%c8_112, %c0_113, %c0_114] : memref<9x4x4xbf16, #tpu.memory_space<vmem>>, vector<1x4x4xbf16>
    %107 = vector.shape_cast %106 : vector<1x4x4xbf16> to vector<4x4xbf16>
    %cst_115 = arith.constant dense<0.000000e+00> : vector<4x2048xf32>
    %108 = tpu.matmul %107, %105, %cst_115 {dimension_numbers = #tpu.dot_dimension_numbers<[1], [0], [0], [1], [0, 0, 1, 1], [], []>} : vector<4x4xbf16>, vector<4x2048xbf16>, vector<4x2048xf32> -> vector<4x2048xf32>
    %109 = arith.addf %104, %108 : vector<4x2048xf32>
    %c0_116 = arith.constant 0 : index
    %c0_117 = arith.constant 0 : index
    %110 = vector.load %arg3[%c0_116, %c0_117] : memref<4x1xf32, #tpu.memory_space<vmem>>, vector<4x1xf32>
    %111 = vector.broadcast %110 : vector<4x1xf32> to vector<4x2048xf32>
    %112 = arith.addf %109, %111 : vector<4x2048xf32>
    %c0_118 = arith.constant 0 : index
    %113 = memref.load %arg4[%c0_118] : memref<1xf32, #tpu.memory_space<smem>>
    %cst_119 = arith.constant 0.000000e+00 : f32
    %114 = vector.broadcast %cst_119 : f32 to vector<4x2048xf32>
    %115 = arith.cmpf oge, %112, %114 : vector<4x2048xf32>
    %116 = vector.broadcast %113 : f32 to vector<4x2048xf32>
    %117 = arith.mulf %116, %112 : vector<4x2048xf32>
    %118 = arith.select %115, %112, %117 : vector<4x2048xi1>, vector<4x2048xf32>
    %c0_120 = arith.constant 0 : index
    %c0_121 = arith.constant 0 : index
    %c0_122 = arith.constant 0 : index
    %119 = vector.load %arg5[%c0_120, %c0_121, %c0_122] : memref<1x4x2048xf32, #tpu.memory_space<vmem>>, vector<1x4x2048xf32>
    %120 = vector.shape_cast %119 : vector<1x4x2048xf32> to vector<4x2048xf32>
    %121 = vector.shape_cast %118 : vector<4x2048xf32> to vector<1x4x2048xf32>
    tpu.vector_store %arg5[%c0_120, %c0_121, %c0_122], %121 {strides = array<i32>} : memref<1x4x2048xf32, #tpu.memory_space<vmem>>, vector<1x4x2048xf32>,
    return
  }
  func.func @transform_0(%arg0: i32) -> (i32, i32, i32, i32) {
    %c0_i32 = arith.constant 0 : i32
    %c0_i32_0 = arith.constant 0 : i32
    %c0_i32_1 = arith.constant 0 : i32
    %c0_i32_2 = arith.constant 0 : i32
    return %arg0, %c0_i32, %c0_i32_0, %c0_i32_1 : i32, i32, i32, i32
  }
  func.func @transform_1(%arg0: i32) -> (i32, i32, i32) {
    %c0_i32 = arith.constant 0 : i32
    %c0_i32_0 = arith.constant 0 : i32
    %c0_i32_1 = arith.constant 0 : i32
    %c0_i32_2 = arith.constant 0 : i32
    return %c0_i32, %c0_i32_0, %c0_i32_1 : i32, i32, i32
  }
  func.func @transform_2(%arg0: i32) -> (i32, i32) {
    %c0_i32 = arith.constant 0 : i32
    %c0_i32_0 = arith.constant 0 : i32
    %c0_i32_1 = arith.constant 0 : i32
    return %c0_i32, %c0_i32_0 : i32, i32
  }
  func.func @transform_3(%arg0: i32) -> i32 {
    %c0_i32 = arith.constant 0 : i32
    %c0_i32_0 = arith.constant 0 : i32
    return %c0_i32 : i32
  }
  func.func @transform_4(%arg0: i32) -> (i32, i32, i32) {
    %c0_i32 = arith.constant 0 : i32
    %c0_i32_0 = arith.constant 0 : i32
    %c0_i32_1 = arith.constant 0 : i32
    return %arg0, %c0_i32, %c0_i32_0 : i32, i32, i32
  }
}

</mosaic_0001>

<bundles_post_ra>
// kernel: _lambda_.1
= control target key start
LH: loop header
LB: loop body
LE: loop exit
PB: predicated region body
PF: predicated region fallthrough
CT: control target
= control target key end

     0   :  { %s8440_s0 = inlined_call_operand.hbm [shape: f32[2,4,16,16], index: 0, kind: input, shape index: {}]   ;;  %s8441_s1 = inlined_call_operand.hbm [shape: bf16[9,4,4], index: 1, kind: input, shape index: {}]   ;;  %s8442_s2 = inlined_call_operand.vmem [shape: f32[4,1], index: 2, kind: input, shape index: {}]   ;;  %s8443_s3 = inlined_call_operand.<no memory space> [shape: f32[1], index: 3, kind: input, shape index: {}]   ;;  %s8444_s4 = inlined_call_operand.vmem [shape: f32[2,4,2048], index: 4, kind: output, shape index: {}]  }
   0x1   :  { %9 = sst [smem:[#allocation3]] %s8443_s3 }
   0x2   :  { %10 = vsyncpa [#allocation5], 0 }
   0x3   :  { %12 = vsyncpa [#allocation5 + $0x1], 0 }
   0x4   :  { %13 = vsyncpa [#allocation7], 0  ;;  %s6754_s17 = smov 0   ;;  %s6756_s18 = smov 0  }
   0x5   :  { %s6758_s19 = smov 0   ;;  %s6760_s20 = smov 0  }
   0x6 LB: > { %s6773_s3 = sadd.s32 4294967295, %s6713_s20   ;;  %p39_p0 = scmp.ne.s32.totalorder %s6705_s18, %s6701_s17  ;;  %s6713_s20 = sphi %s6760_s20, %s8459_s20   ;;  %s6709_s19 = sphi %s6758_s19, %s8458_s19   ;;  %s6705_s18 = sphi %s6756_s18, %s8457_s18   ;;  %s6701_s17 = sphi %s6754_s17, %s8456_s17  }
   0x7   : > { %p8445_p1 = scmp.eq.s32.totalorder %s6773_s3, 0  ;;  %p6380_p2 = scmp.ge.s32.totalorder %s6713_s20, 1 }
   0x8   : > { %p139_p3 = scmp.lt.s32.totalorder %s6713_s20, 3  ;;  %s6715_s23 = smov [#allocation6]  }
   0x9   : > { %p6781_p4 = por %p8445_p1, %p39_p0  ;;  %s151_s24 = sshll.u32 %s6715_s23, 4  ;;  %s152_s24 = int_to_ptr.vmem [resolvable:$true] %s151_s24 }
   0xa   : > { %p6785_p5 = pnand %p6380_p2, %p139_p3  ;;  %s6798_s26 = sadd.s32 1, %s6713_s20  }
   0xb   : > { %s8448_s21 = scalar_select %p6781_p4, 1, 0 }
   0xc   : > { %s8449_s22 = scalar_select %p6785_p5, 1, 0 }
   0xd   : > { %p6551_p6 = pneg %p6785_p5  ;;  %s26_s27 = sadd.s32 1, %s6709_s19 }
   0xe   : > { %s23_s28 = ssub.s32 %s6713_s20, %s6798_s26  ;;  %s6617_s5 = scalar_lea.hbm %s8441_s1, 288 }
   0xf   : > { %p6793_p7 = pnand %p6551_p6, %p8445_p1  ;;  %p6618_p8 = scmp.ne.s32.totalorder %s8441_s1, %s6617_s5 }
  0x10   : > { %p6624_p12 = scmp.lt.u32.totalorder %s6617_s5, %s8441_s1 }
  0x11   : > { %p6619_p9 = pneg %p6793_p7 }
  0x13   : > { %p6620_p10 = pnand %p6619_p9, %p6618_p8 }
  0x15   : > { %p6621_p11 = pneg %p6620_p10 }
  0x17   : > { %p6626_p13 = pnand %p6624_p12, %p6621_p11 }
  0x19   : > { %6629 = shalt.err (!%p6626_p13)
}
  0x1a   : > { %s6630_s10 = scalar_lea.vmem %s152_s24, 288  ;;  %p6638_p6 = scmp.lt.s32.totalorder %s152_s24, %s152_s24 }
  0x1b   : > { %p6631_p0 = scmp.ne.s32.totalorder %s152_s24, %s6630_s10  ;;  %p6639_p1 = scmp.lt.s32.totalorder %s6630_s10, %s6630_s10 }
  0x1d   : > { %p6633_p2 = pnand %p6631_p0, %p6619_p9  ;;  %p6640_p4 = por %p6639_p1, %p6638_p6 }
  0x1f   : > { %p6634_p3 = pneg %p6633_p2 }
  0x21   : > { %p6641_p5 = pnand %p6640_p4, %p6634_p3 }
  0x23   : > { %6644 = shalt.err (!%p6641_p5)
}
  0x24   : > { %s6716_s11 = smov 32   ;;  %s6717_s12 = smov 2  }
  0x25   : > { %6554 = dma.hbm_to_vmem [thread:$0]  (!%p6793_p7), %s8441_s1, 288, %s152_s24, [#allocation7], %s6716_s11, %s6716_s11, %s6717_s12  }
  0x26   : > { %p24_p8 = scmp.eq.s32.totalorder %s23_s28, 0  ;;  %p33_p9 = scmp.ne.s32.totalorder %s6709_s19, %s6705_s18 }
  0x27   : > { %p34_p1 = scmp.eq.s32.totalorder %s6713_s20, 0  ;;  %p6560_p4 = scmp.lt.s32.totalorder %s6713_s20, 2 }
  0x28   : > { %s6824_s15 = scalar_select %p24_p8, %s6709_s19, %s26_s27  }
  0x29   : > { %p35_p5 = por %p34_p1, %p33_p9  ;;  %s171_s16 = sand.u32 1, %s6709_s19  }
  0x2a   : > { %s6383_s17 = sshll.u32 %s171_s16, 6  ;;  %s6543_s23 = sshll.u32 %s6713_s20, 10 }
  0x2b   : > { %s6831_s5 = scalar_lea.hbm %s8440_s0, %s6543_s23  ;;  %s175_s24 = scalar_lea.vmem [#allocation4], %s6383_s17 }
  0x2c   : > { %s182_s25 = sshll.u32 %s175_s24, 4  ;;  %p6835_p7 = pnand %p6560_p4, %p35_p5  ;;  %s6833_s25 = int_to_ptr.vmem [resolvable:$true] %s182_s25 }
  0x2d   : > { %s6839_s20 = scalar_lea.sflag [#allocation5], %s171_s16  ;;  %s6645_s28 = scalar_lea.hbm %s6831_s5, 1024 }
  0x2e   : > { %p6646_p10 = scmp.ne.s32.totalorder %s6831_s5, %s6645_s28  ;;  %p6647_p11 = pneg %p6835_p7 }
  0x2f   : > { %s6650_s8 = scalar_lea.hbm %s8440_s0, 2048  ;;  %p6651_p0 = scmp.lt.u32.totalorder %s6831_s5, %s8440_s0 }
  0x30   : > { %p6648_p12 = pnand %p6647_p11, %p6646_p10  ;;  %p6652_p2 = scmp.lt.u32.totalorder %s6650_s8, %s6645_s28 }
  0x31   : > { %p6654_p6 = scmp.lt.u32.totalorder %s6645_s28, %s6831_s5 }
  0x32   : > { %p6649_p13 = pneg %p6648_p12  ;;  %p6653_p3 = por %p6652_p2, %p6651_p0 }
  0x34   : > { %p6655_p8 = por %p6654_p6, %p6653_p3 }
  0x36   : > { %p6656_p9 = pnand %p6655_p8, %p6649_p13 }
  0x38   : > { %6659 = shalt.err (!%p6656_p9)
}
  0x39   : > { %s6660_s11 = scalar_lea.vmem %s6833_s25, 1024  ;;  %s6718_s12 = smov [#allocation4]  }
  0x3a   : > { %p6661_p1 = scmp.ne.s32.totalorder %s6833_s25, %s6660_s11  ;;  %s6665_s13 = sshll.u32 %s6718_s12, 4  ;;  %s6666_s13 = int_to_ptr.vmem [resolvable:$false] %s6665_s13 }
  0x3b   : > { %s6667_s14 = scalar_lea.vmem %s6666_s13, 2048  ;;  %p6668_p10 = scmp.lt.s32.totalorder %s6833_s25, %s6666_s13 }
  0x3c   : > { %p6663_p4 = pnand %p6661_p1, %p6647_p11  ;;  %p6669_p12 = scmp.lt.s32.totalorder %s6667_s14, %s6660_s11 }
  0x3e   : > { %p6664_p5 = pneg %p6663_p4  ;;  %p6670_p0 = por %p6669_p12, %p6668_p10 }
  0x40   : > { %p6671_p2 = pnand %p6670_p0, %p6664_p5 }
  0x42   : > { %6674 = shalt.err (!%p6671_p2)
}
  0x43   : > { %s6719_s16 = smov 128   ;;  %s6720_s17 = smov 8  }
  0x44   : > { %6558 = dma.hbm_to_vmem [thread:$0]  (!%p6835_p7), %s6831_s5, 1024, %s6833_s25, %s6839_s20, %s6719_s16, %s6719_s16, %s6720_s17  }
  0x45   : > { %p8452_p11 = scmp.ne.s32.totalorder %s8449_s22, 0 }
  0x46   : > { %s196_s23 = sand.u32 (!%p8452_p11), 1, %s6705_s18   ;;  %p8453_p13 = scmp.ne.s32.totalorder (!%p8452_p11), %s8448_s21, 0 }
  0x47   : > { %194 = sbr.rel (%p8452_p11) target bundleno = 922 (0x39a), region = 36  ;;  %s6387_s29 = sshll.u32 (!%p8452_p11), %s196_s23, 6 }
  0x48   : > { %s197_s30 = scalar_lea.sflag (!%p8452_p11), [#allocation5], %s196_s23  ;;  %s6870_s24 = scalar_lea.vmem (!%p8452_p11), [#allocation4], %s6387_s29 }
  0x4e   : > { %6692 = dma.done.wait (%p8453_p13), %s197_s30, 1024  }
  0x4f   : > { %6694 = vsyncadd (%p8453_p13), %s197_s30, 4294966272  ;;  %p8454_p3 = scmp.eq.s32.totalorder %s6773_s3, 0 }
  0x51   : > { %6696 = dma.done.wait (%p8454_p3), [#allocation7], 288   ;;  %p8455_p7 = pmov %p8454_p3 }
  0x52   : > { %v255_v0 = vlaneseq  ;;  %v6721_v1 = vmov 1983009808   ;;  %v6722_v4 = vmov 0   ;;  %vm313_vm0 = vcmask 1041409   ;;  %v424_v7 = vld [vmem:[%s6870_s24 + $0x2] sm:$0x1] }
  0x53   : > { %6698 = vsyncadd (%p8455_p7), [#allocation7], 4294967008  ;;  %v253_v2 = vunpack.c.l.s4 %v6721_v1  ;;  %235 = vst [vmem:[#allocation2] sm:$0xff] %v6722_v4  ;;  %1908 = vmatprep.mubr.bf16.mxu0 %v6722_v4  ;;  %1949 = vmatprep.mubr.bf16.mxu1 %v6722_v4  ;;  %v425_v8 = vld [vmem:[%s6870_s24 + $0x12] sm:$0x1]  ;;  %vm316_vm1 = vcmask 1042434   ;;  %v428_v11 = vpack.c.bf16 %v424_v7, %v424_v7 }
  0x54   : > { %v256_v3 = vshrl.u32 %v255_v0, 7  ;;  %236 = vst [vmem:[#allocation2 + $0x8] sm:$0xff] %v6722_v4  ;;  %237 = vst [vmem:[#allocation2 + $0x10] sm:$0xff] %v6722_v4  ;;  %6604 = vset.pattern.permute.xlu0 %v6722_v4  ;;  %v426_v9 = vld [vmem:[%s6870_s24 + $0x22] sm:$0x1]  ;;  %v429_v12 = vpack.c.bf16 %v425_v8, %v425_v8  ;;  %vm319_vm2 = vcmask 1043459  }
  0x55   : > { %238 = vst [vmem:[#allocation2 + $0x18] sm:$0xff] %v6722_v4  ;;  %239 = vst [vmem:[#allocation2 + $0x20] sm:$0x3f] %v6722_v4  ;;  %v254_v5 = vunpack.c.0.s8 %v253_v2  ;;  %v427_v10 = vld [vmem:[%s6870_s24 + $0x32] sm:$0x1]  ;;  %v430_v13 = vpack.c.bf16 %v426_v9, %v426_v9  ;;  %s6723_s21 = smov 1  }
  0x56   : > { %v240_v14 = vld [vmem:[%s6870_s24] sm:$0x1]  ;;  %v241_v15 = vld [vmem:[%s6870_s24 + $0x10] sm:$0x1]  ;;  %v431_v16 = vpack.c.bf16 %v427_v10, %v427_v10  ;;  %v514_v37 = vld [vmem:[%s6870_s24 + $0x3] sm:$0x1] }
  0x57   : > { %v6888_v6 = vsub.s32 %v254_v5, %v256_v3  ;;  %v242_v17 = vld [vmem:[%s6870_s24 + $0x20] sm:$0x1]  ;;  %v243_v18 = vld [vmem:[%s6870_s24 + $0x30] sm:$0x1]  ;;  %v244_v19 = vpack.c.bf16 %v240_v14, %v240_v14  ;;  %v245_v20 = vpack.c.bf16 %v241_v15, %v241_v15  ;;  %v515_v42 = vld [vmem:[%s6870_s24 + $0x13] sm:$0x1]  ;;  %v518_v52 = vpack.c.bf16 %v514_v37, %v514_v37 }
  0x58   : > { %v246_v24 = vpack.c.bf16 %v242_v17, %v242_v17  ;;  %v247_v26 = vpack.c.bf16 %v243_v18, %v243_v18  ;;  %v516_v47 = vld [vmem:[%s6870_s24 + $0x23] sm:$0x1]  ;;  %v517_v48 = vld [vmem:[%s6870_s24 + $0x33] sm:$0x1]  ;;  %v519_v56 = vpack.c.bf16 %v515_v42, %v515_v42  ;;  %v334_v1 = vld [vmem:[%s6870_s24 + $0x1] sm:$0x1] }
  0x59   : > { %v442_v21 = vrot.slane %v428_v11, %v6888_v6  ;;  %v449_v22 = vrot.slane %v429_v12, %v6888_v6  ;;  %v456_v23 = vrot.slane %v430_v13, %v6888_v6  ;;  %v463_v25 = vrot.slane %v431_v16, %v6888_v6  ;;  %v335_v8 = vld [vmem:[%s6870_s24 + $0x11] sm:$0x1]  ;;  %v336_v13 = vld [vmem:[%s6870_s24 + $0x21] sm:$0x1]  ;;  %v697_v42 = vld [vmem:[%s6870_s24 + $0x35] sm:$0x1] }
  0x5a   : > { %v258_v27 = vrot.slane %v244_v19, %v6888_v6  ;;  %v265_v28 = vrot.slane %v245_v20, %v6888_v6  ;;  %v272_v32 = vrot.slane %v246_v24, %v6888_v6  ;;  %v279_v34 = vrot.slane %v247_v26, %v6888_v6  ;;  %v337_v17 = vld [vmem:[%s6870_s24 + $0x31] sm:$0x1]  ;;  %s6724_s22 = smov 127   ;;  %s6725_s5 = smov 126  }
  0x5b   : > { %v470_v29 = vrot.slane %v442_v21, %v6888_v6  ;;  %v477_v30 = vrot.slane %v449_v22, %v6888_v6  ;;  %v484_v31 = vrot.slane %v456_v23, %v6888_v6  ;;  %v491_v33 = vrot.slane %v463_v25, %v6888_v6  ;;  %v694_v23 = vld [vmem:[%s6870_s24 + $0x5] sm:$0x1]  ;;  %s6212_s20 = sld [smem:[#allocation3]]  ;;  %p229_p6 = scmp.lt.s32.totalorder %s6773_s3, 1 }
  0x5c   : > { %v286_v35 = vrot.slane %v258_v27, %v6888_v6  ;;  %v293_v36 = vrot.slane %v265_v28, %v6888_v6  ;;  %v300_v41 = vrot.slane %v272_v32, %v6888_v6  ;;  %v307_v44 = vrot.slane %v279_v34, %v6888_v6  ;;  %v695_v32 = vld [vmem:[%s6870_s24 + $0x15] sm:$0x1] }
  0x5d   : > { %v492_v38 = vunpack.c.l.b16 %v470_v29  ;;  %v493_v39 = vunpack.c.l.b16 %v477_v30  ;;  %v494_v40 = vunpack.c.l.b16 %v484_v31  ;;  %v495_v43 = vunpack.c.l.b16 %v491_v33  ;;  %v696_v33 = vld [vmem:[%s6870_s24 + $0x25] sm:$0x1]  ;;  %s8461_s3 = smov (!%p229_p6, %s6773_s3), 1 }
  0x5e   : > { %v308_v45 = vunpack.c.l.b16 %v286_v35  ;;  %v309_v46 = vunpack.c.l.b16 %v293_v36  ;;  %v310_v51 = vunpack.c.l.b16 %v300_v41  ;;  %v311_v54 = vunpack.c.l.b16 %v307_v44  ;;  %s6544_s28 = sshll.u32 %s8461_s3, 6 }
  0x5f   : > { %v496_v49 = vrot.slane %v493_v39, 7  ;;  %v498_v50 = vrot.slane %v494_v40, 6  ;;  %v500_v53 = vrot.slane %v495_v43, 5  ;;  %v520_v59 = vpack.c.bf16 %v516_v47, %v516_v47  ;;  %s8379_s8 = scalar_lea.vmem %s8444_s4, %s6544_s28 }
  0x60   : > { %v312_v55 = vrot.slane %v309_v46, 7  ;;  %v315_v58 = vrot.slane %v310_v51, 6  ;;  %v521_v60 = vpack.c.bf16 %v517_v48, %v517_v48  ;;  %v318_v63 = vrot.slane %v311_v54, 5 }
  0x61   : > { %v497_v57 = vsel %vm313_vm0, %v496_v49, %v492_v38  ;;  %v532_v0 = vrot.slane %v518_v52, %v6888_v6  ;;  %v539_v5 = vrot.slane %v519_v56, %v6888_v6  ;;  %v546_v7 = vrot.slane %v520_v59, %v6888_v6 }
  0x62   : > { %v499_v61 = vsel %vm316_vm1, %v498_v50, %v497_v57  ;;  %v314_v62 = vsel %vm313_vm0, %v312_v55, %v308_v45  ;;  %v553_v11 = vrot.slane %v521_v60, %v6888_v6  ;;  %v338_v18 = vpack.c.bf16 %v334_v1, %v334_v1 }
  0x63   : > { %v501_v2 = vsel %vm319_vm2, %v500_v53, %v499_v61  ;;  %v317_v3 = vsel %vm316_vm1, %v315_v58, %v314_v62  ;;  %v560_v12 = vrot.slane %v532_v0, %v6888_v6  ;;  %v567_v15 = vrot.slane %v539_v5, %v6888_v6  ;;  %v605_v0 = vld [vmem:[%s6870_s24 + $0x14] sm:$0x1] }
  0x64   : > { %v502_v9 = vpack.c.b16 %v501_v2, %v501_v2  ;;  %v320_v10 = vsel %vm319_vm2, %v318_v63, %v317_v3  ;;  %v574_v16 = vrot.slane %v546_v7, %v6888_v6  ;;  %v581_v20 = vrot.slane %v553_v11, %v6888_v6  ;;  %v604_v63 = vld [vmem:[%s6870_s24 + $0x4] sm:$0x1] }
  0x65   : > { %v321_v14 = vpack.c.b16 %v320_v10, %v320_v10  ;;  %v582_v21 = vunpack.c.l.b16 %v560_v12  ;;  %v339_v22 = vpack.c.bf16 %v335_v8, %v335_v8  ;;  %v583_v25 = vunpack.c.l.b16 %v567_v15  ;;  %v606_v7 = vld [vmem:[%s6870_s24 + $0x24] sm:$0x1]  ;;  %v607_v12 = vld [vmem:[%s6870_s24 + $0x34] sm:$0x1] }
  0x66   : > { %v509_v19 = vrot.slane %v502_v9, %v6888_v6  ;;  %v584_v26 = vunpack.c.l.b16 %v574_v16  ;;  %v340_v27 = vpack.c.bf16 %v336_v13, %v336_v13  ;;  %v585_v28 = vunpack.c.l.b16 %v581_v20 }
  0x67   : > { %v328_v24 = vrot.slane %v321_v14, %v6888_v6  ;;  %v341_v29 = vpack.c.bf16 %v337_v17, %v337_v17  ;;  %v352_v30 = vrot.slane %v338_v18, %v6888_v6  ;;  %v359_v31 = vrot.slane %v339_v22, %v6888_v6 }
  0x68   : > { %510 = vrot.lane.b32.xlu1 %v509_v19, %s6723_s21  ;;  %v586_v34 = vrot.slane %v583_v25, 7  ;;  %v588_v35 = vrot.slane %v584_v26, 6  ;;  %v366_v36 = vrot.slane %v340_v27, %v6888_v6  ;;  %v698_v37 = vpack.c.bf16 %v694_v23, %v694_v23  ;;  %v874_v25 = vld [vmem:[%s6870_s24 + $0x7] sm:$0x1]  ;;  %v875_v26 = vld [vmem:[%s6870_s24 + $0x17] sm:$0x1] }
  0x69   : > { %329 = vrot.lane.b32.xlu0 %v328_v24, %s6723_s21  ;;  %v590_v38 = vrot.slane %v585_v28, 5  ;;  %v373_v39 = vrot.slane %v341_v29, %v6888_v6  ;;  %v380_v40 = vrot.slane %v352_v30, %v6888_v6  ;;  %v387_v41 = vrot.slane %v359_v31, %v6888_v6 }
  0x6a   : > { %v587_v43 = vsel %vm313_vm0, %v586_v34, %v582_v21  ;;  %v394_v44 = vrot.slane %v366_v36, %v6888_v6  ;;  %v699_v45 = vpack.c.bf16 %v695_v32, %v695_v32  ;;  %v700_v46 = vpack.c.bf16 %v696_v33, %v696_v33  ;;  %v877_v36 = vld [vmem:[%s6870_s24 + $0x37] sm:$0x1] }
  0x6b   : > { %v589_v47 = vsel %vm316_vm1, %v588_v35, %v587_v43  ;;  %v401_v48 = vrot.slane %v373_v39, %v6888_v6  ;;  %v402_v49 = vunpack.c.l.b16 %v380_v40  ;;  %v403_v50 = vunpack.c.l.b16 %v387_v41  ;;  %v876_v35 = vld [vmem:[%s6870_s24 + $0x27] sm:$0x1] }
  0x6c   : > { %v591_v51 = vsel %vm319_vm2, %v590_v38, %v589_v47  ;;  %v404_v52 = vunpack.c.l.b16 %v394_v44  ;;  %v701_v53 = vpack.c.bf16 %v697_v42, %v697_v42  ;;  %v712_v54 = vrot.slane %v698_v37, %v6888_v6 }
  0x6d   : > { %v592_v55 = vpack.c.b16 %v591_v51, %v591_v51  ;;  %v405_v56 = vunpack.c.l.b16 %v401_v48  ;;  %v406_v57 = vrot.slane %v403_v50, 7  ;;  %v719_v58 = vrot.slane %v699_v45, %v6888_v6 }
  0x6e   : > { %v408_v59 = vrot.slane %v404_v52, 6  ;;  %v726_v60 = vrot.slane %v700_v46, %v6888_v6  ;;  %v733_v61 = vrot.slane %v701_v53, %v6888_v6  ;;  %v740_v62 = vrot.slane %v712_v54, %v6888_v6  ;;  %v784_v53 = vld [vmem:[%s6870_s24 + $0x6] sm:$0x1] }
  0x6f   : > { %v599_v1 = vrot.slane %v592_v55, %v6888_v6  ;;  %v407_v2 = vsel %vm313_vm0, %v406_v57, %v402_v49  ;;  %v410_v3 = vrot.slane %v405_v56, 5  ;;  %v747_v5 = vrot.slane %v719_v58, %v6888_v6  ;;  %v785_v58 = vld [vmem:[%s6870_s24 + $0x16] sm:$0x1] }
  0x70   : > { %v409_v8 = vsel %vm316_vm1, %v408_v59, %v407_v2  ;;  %v754_v9 = vrot.slane %v726_v60, %v6888_v6  ;;  %v761_v10 = vrot.slane %v733_v61, %v6888_v6  ;;  %v762_v11 = vunpack.c.l.b16 %v740_v62 }
  0x71   : > { %600 = vrot.lane.b32.xlu1 %v599_v1, %s6723_s21  ;;  %v411_v13 = vsel %vm319_vm2, %v410_v3, %v409_v8  ;;  %v763_v14 = vunpack.c.l.b16 %v747_v5  ;;  %v608_v15 = vpack.c.bf16 %v604_v63, %v604_v63  ;;  %v609_v16 = vpack.c.bf16 %v605_v0, %v605_v0  ;;  %v786_v63 = vld [vmem:[%s6870_s24 + $0x26] sm:$0x1]  ;;  %v787_v3 = vld [vmem:[%s6870_s24 + $0x36] sm:$0x1] }
  0x72   : > { %v412_v17 = vpack.c.b16 %v411_v13, %v411_v13  ;;  %v764_v18 = vunpack.c.l.b16 %v754_v9  ;;  %v765_v19 = vunpack.c.l.b16 %v761_v10  ;;  %v610_v20 = vpack.c.bf16 %v606_v7, %v606_v7 }
  0x73   : > { %v766_v21 = vrot.slane %v763_v14, 7  ;;  %v611_v22 = vpack.c.bf16 %v607_v12, %v607_v12  ;;  %v622_v23 = vrot.slane %v608_v15, %v6888_v6  ;;  %v629_v24 = vrot.slane %v609_v16, %v6888_v6 }
  0x74   : > { %v419_v27 = vrot.slane %v412_v17, %v6888_v6  ;;  %v768_v28 = vrot.slane %v764_v18, 6  ;;  %v770_v29 = vrot.slane %v765_v19, 5  ;;  %v636_v30 = vrot.slane %v610_v20, %v6888_v6  ;;  %v1054_v19 = vld [vmem:[%s6870_s24 + $0x9] sm:$0x1]  ;;  %v1055_v20 = vld [vmem:[%s6870_s24 + $0x19] sm:$0x1] }
  0x75   : > { %v767_v31 = vsel %vm313_vm0, %v766_v21, %v762_v11  ;;  %v643_v32 = vrot.slane %v611_v22, %v6888_v6  ;;  %v650_v33 = vrot.slane %v622_v23, %v6888_v6  ;;  %v657_v34 = vrot.slane %v629_v24, %v6888_v6 }
  0x76   : > { %420 = vrot.lane.b32.xlu0 %v419_v27, %s6723_s21  ;;  %v769_v37 = vsel %vm316_vm1, %v768_v28, %v767_v31  ;;  %v664_v38 = vrot.slane %v636_v30, %v6888_v6  ;;  %v878_v39 = vpack.c.bf16 %v874_v25, %v874_v25  ;;  %v879_v40 = vpack.c.bf16 %v875_v26, %v875_v26  ;;  %v1057_v30 = vld [vmem:[%s6870_s24 + $0x39] sm:$0x1] }
  0x77   : > { %v771_v41 = vsel %vm319_vm2, %v770_v29, %v769_v37  ;;  %v671_v42 = vrot.slane %v643_v32, %v6888_v6  ;;  %v672_v43 = vunpack.c.l.b16 %v650_v33  ;;  %v673_v44 = vunpack.c.l.b16 %v657_v34  ;;  %v1056_v29 = vld [vmem:[%s6870_s24 + $0x29] sm:$0x1] }
  0x78   : > { %v772_v45 = vpack.c.b16 %v771_v41, %v771_v41  ;;  %v674_v46 = vunpack.c.l.b16 %v664_v38  ;;  %v880_v47 = vpack.c.bf16 %v876_v35, %v876_v35  ;;  %v881_v48 = vpack.c.bf16 %v877_v36, %v877_v36 }
  0x79   : > { %v675_v49 = vunpack.c.l.b16 %v671_v42  ;;  %v676_v50 = vrot.slane %v673_v44, 7  ;;  %v892_v51 = vrot.slane %v878_v39, %v6888_v6  ;;  %v899_v52 = vrot.slane %v879_v40, %v6888_v6 }
  0x7a   : > { %v779_v54 = vrot.slane %v772_v45, %v6888_v6  ;;  %v678_v55 = vrot.slane %v674_v46, 6  ;;  %v906_v56 = vrot.slane %v880_v47, %v6888_v6  ;;  %v913_v57 = vrot.slane %v881_v48, %v6888_v6  ;;  %v964_v47 = vld [vmem:[%s6870_s24 + $0x8] sm:$0x1] }
  0x7b   : > { %v677_v59 = vsel %vm313_vm0, %v676_v50, %v672_v43  ;;  %v680_v60 = vrot.slane %v675_v49, 5  ;;  %v920_v61 = vrot.slane %v892_v51, %v6888_v6  ;;  %v927_v62 = vrot.slane %v899_v52, %v6888_v6  ;;  %v965_v52 = vld [vmem:[%s6870_s24 + $0x18] sm:$0x1] }
  0x7c   : > { %780 = vrot.lane.b32.xlu1 %v779_v54, %s6723_s21  ;;  %v679_v0 = vsel %vm316_vm1, %v678_v55, %v677_v59  ;;  %v934_v1 = vrot.slane %v906_v56, %v6888_v6  ;;  %v941_v2 = vrot.slane %v913_v57, %v6888_v6  ;;  %v788_v5 = vpack.c.bf16 %v784_v53, %v784_v53  ;;  %v966_v57 = vld [vmem:[%s6870_s24 + $0x28] sm:$0x1] }
  0x7d   : > { %v681_v7 = vsel %vm319_vm2, %v680_v60, %v679_v0  ;;  %v942_v8 = vunpack.c.l.b16 %v920_v61  ;;  %v943_v9 = vunpack.c.l.b16 %v927_v62  ;;  %v789_v10 = vpack.c.bf16 %v785_v58, %v785_v58  ;;  %v967_v61 = vld [vmem:[%s6870_s24 + $0x38] sm:$0x1] }
  0x7e   : > { %v682_v11 = vpack.c.b16 %v681_v7, %v681_v7  ;;  %v944_v12 = vunpack.c.l.b16 %v934_v1  ;;  %v945_v13 = vunpack.c.l.b16 %v941_v2  ;;  %v790_v14 = vpack.c.bf16 %v786_v63, %v786_v63 }
  0x7f   : > { %v946_v15 = vrot.slane %v943_v9, 7  ;;  %v791_v16 = vpack.c.bf16 %v787_v3, %v787_v3  ;;  %v802_v17 = vrot.slane %v788_v5, %v6888_v6  ;;  %v809_v18 = vrot.slane %v789_v10, %v6888_v6 }
  0x80   : > { %v689_v21 = vrot.slane %v682_v11, %v6888_v6  ;;  %v948_v22 = vrot.slane %v944_v12, 6  ;;  %v950_v23 = vrot.slane %v945_v13, 5  ;;  %v816_v24 = vrot.slane %v790_v14, %v6888_v6  ;;  %v1234_v13 = vld [vmem:[%s6870_s24 + $0xb] sm:$0x1]  ;;  %v1235_v14 = vld [vmem:[%s6870_s24 + $0x1b] sm:$0x1] }
  0x81   : > { %v947_v25 = vsel %vm313_vm0, %v946_v15, %v942_v8  ;;  %v823_v26 = vrot.slane %v791_v16, %v6888_v6  ;;  %v830_v27 = vrot.slane %v802_v17, %v6888_v6  ;;  %v837_v28 = vrot.slane %v809_v18, %v6888_v6 }
  0x82   : > { %690 = vrot.lane.b32.xlu0 %v689_v21, %s6723_s21  ;;  %v949_v31 = vsel %vm316_vm1, %v948_v22, %v947_v25  ;;  %v844_v32 = vrot.slane %v816_v24, %v6888_v6  ;;  %v1058_v33 = vpack.c.bf16 %v1054_v19, %v1054_v19  ;;  %v1059_v34 = vpack.c.bf16 %v1055_v20, %v1055_v20  ;;  %v1237_v24 = vld [vmem:[%s6870_s24 + $0x3b] sm:$0x1] }
  0x83   : > { %v951_v35 = vsel %vm319_vm2, %v950_v23, %v949_v31  ;;  %v851_v36 = vrot.slane %v823_v26, %v6888_v6  ;;  %v852_v37 = vunpack.c.l.b16 %v830_v27  ;;  %v853_v38 = vunpack.c.l.b16 %v837_v28  ;;  %v1236_v23 = vld [vmem:[%s6870_s24 + $0x2b] sm:$0x1] }
  0x84   : > { %v952_v39 = vpack.c.b16 %v951_v35, %v951_v35  ;;  %v854_v40 = vunpack.c.l.b16 %v844_v32  ;;  %v1060_v41 = vpack.c.bf16 %v1056_v29, %v1056_v29  ;;  %v1061_v42 = vpack.c.bf16 %v1057_v30, %v1057_v30 }
  0x85   : > { %v855_v43 = vunpack.c.l.b16 %v851_v36  ;;  %v856_v44 = vrot.slane %v853_v38, 7  ;;  %v1072_v45 = vrot.slane %v1058_v33, %v6888_v6  ;;  %v1079_v46 = vrot.slane %v1059_v34, %v6888_v6 }
  0x86   : > { %v959_v48 = vrot.slane %v952_v39, %v6888_v6  ;;  %v858_v49 = vrot.slane %v854_v40, 6  ;;  %v1086_v50 = vrot.slane %v1060_v41, %v6888_v6  ;;  %v1093_v51 = vrot.slane %v1061_v42, %v6888_v6  ;;  %v1144_v41 = vld [vmem:[%s6870_s24 + $0xa] sm:$0x1] }
  0x87   : > { %v857_v53 = vsel %vm313_vm0, %v856_v44, %v852_v37  ;;  %v860_v54 = vrot.slane %v855_v43, 5  ;;  %v1100_v55 = vrot.slane %v1072_v45, %v6888_v6  ;;  %v1107_v56 = vrot.slane %v1079_v46, %v6888_v6  ;;  %v1145_v46 = vld [vmem:[%s6870_s24 + $0x1a] sm:$0x1] }
  0x88   : > { %960 = vrot.lane.b32.xlu1 %v959_v48, %s6723_s21  ;;  %v859_v58 = vsel %vm316_vm1, %v858_v49, %v857_v53  ;;  %v1114_v59 = vrot.slane %v1086_v50, %v6888_v6  ;;  %v1121_v60 = vrot.slane %v1093_v51, %v6888_v6  ;;  %v968_v62 = vpack.c.bf16 %v964_v47, %v964_v47  ;;  %v1146_v51 = vld [vmem:[%s6870_s24 + $0x2a] sm:$0x1] }
  0x89   : > { %v861_v63 = vsel %vm319_vm2, %v860_v54, %v859_v58  ;;  %v1122_v0 = vunpack.c.l.b16 %v1100_v55  ;;  %v1123_v1 = vunpack.c.l.b16 %v1107_v56  ;;  %v969_v2 = vpack.c.bf16 %v965_v52, %v965_v52  ;;  %v1147_v55 = vld [vmem:[%s6870_s24 + $0x3a] sm:$0x1] }
  0x8a   : > { %v862_v3 = vpack.c.b16 %v861_v63, %v861_v63  ;;  %v1124_v5 = vunpack.c.l.b16 %v1114_v59  ;;  %v1125_v7 = vunpack.c.l.b16 %v1121_v60  ;;  %v970_v8 = vpack.c.bf16 %v966_v57, %v966_v57 }
  0x8b   : > { %v1126_v9 = vrot.slane %v1123_v1, 7  ;;  %v971_v10 = vpack.c.bf16 %v967_v61, %v967_v61  ;;  %v982_v11 = vrot.slane %v968_v62, %v6888_v6  ;;  %v989_v12 = vrot.slane %v969_v2, %v6888_v6 }
  0x8c   : > { %v869_v15 = vrot.slane %v862_v3, %v6888_v6  ;;  %v1128_v16 = vrot.slane %v1124_v5, 6  ;;  %v1130_v17 = vrot.slane %v1125_v7, 5  ;;  %v996_v18 = vrot.slane %v970_v8, %v6888_v6  ;;  %v1414_v7 = vld [vmem:[%s6870_s24 + $0xd] sm:$0x1]  ;;  %v1415_v8 = vld [vmem:[%s6870_s24 + $0x1d] sm:$0x1] }
  0x8d   : > { %v1127_v19 = vsel %vm313_vm0, %v1126_v9, %v1122_v0  ;;  %v1003_v20 = vrot.slane %v971_v10, %v6888_v6  ;;  %v1010_v21 = vrot.slane %v982_v11, %v6888_v6  ;;  %v1017_v22 = vrot.slane %v989_v12, %v6888_v6 }
  0x8e   : > { %870 = vrot.lane.b32.xlu0 %v869_v15, %s6723_s21  ;;  %v1129_v25 = vsel %vm316_vm1, %v1128_v16, %v1127_v19  ;;  %v1024_v26 = vrot.slane %v996_v18, %v6888_v6  ;;  %v1238_v27 = vpack.c.bf16 %v1234_v13, %v1234_v13  ;;  %v1239_v28 = vpack.c.bf16 %v1235_v14, %v1235_v14  ;;  %v1417_v18 = vld [vmem:[%s6870_s24 + $0x3d] sm:$0x1] }
  0x8f   : > { %v1131_v29 = vsel %vm319_vm2, %v1130_v17, %v1129_v25  ;;  %v1031_v30 = vrot.slane %v1003_v20, %v6888_v6  ;;  %v1032_v31 = vunpack.c.l.b16 %v1010_v21  ;;  %v1033_v32 = vunpack.c.l.b16 %v1017_v22  ;;  %v1416_v17 = vld [vmem:[%s6870_s24 + $0x2d] sm:$0x1] }
  0x90   : > { %v1132_v33 = vpack.c.b16 %v1131_v29, %v1131_v29  ;;  %v1034_v34 = vunpack.c.l.b16 %v1024_v26  ;;  %v1240_v35 = vpack.c.bf16 %v1236_v23, %v1236_v23  ;;  %v1241_v36 = vpack.c.bf16 %v1237_v24, %v1237_v24 }
  0x91   : > { %v1035_v37 = vunpack.c.l.b16 %v1031_v30  ;;  %v1036_v38 = vrot.slane %v1033_v32, 7  ;;  %v1252_v39 = vrot.slane %v1238_v27, %v6888_v6  ;;  %v1259_v40 = vrot.slane %v1239_v28, %v6888_v6 }
  0x92   : > { %v1139_v42 = vrot.slane %v1132_v33, %v6888_v6  ;;  %v1038_v43 = vrot.slane %v1034_v34, 6  ;;  %v1266_v44 = vrot.slane %v1240_v35, %v6888_v6  ;;  %v1273_v45 = vrot.slane %v1241_v36, %v6888_v6  ;;  %v1324_v35 = vld [vmem:[%s6870_s24 + $0xc] sm:$0x1] }
  0x93   : > { %v1037_v47 = vsel %vm313_vm0, %v1036_v38, %v1032_v31  ;;  %v1040_v48 = vrot.slane %v1035_v37, 5  ;;  %v1280_v49 = vrot.slane %v1252_v39, %v6888_v6  ;;  %v1287_v50 = vrot.slane %v1259_v40, %v6888_v6  ;;  %v1325_v40 = vld [vmem:[%s6870_s24 + $0x1c] sm:$0x1] }
  0x94   : > { %1140 = vrot.lane.b32.xlu1 %v1139_v42, %s6723_s21  ;;  %v1039_v52 = vsel %vm316_vm1, %v1038_v43, %v1037_v47  ;;  %v1294_v53 = vrot.slane %v1266_v44, %v6888_v6  ;;  %v1301_v54 = vrot.slane %v1273_v45, %v6888_v6  ;;  %v1148_v56 = vpack.c.bf16 %v1144_v41, %v1144_v41  ;;  %v1326_v45 = vld [vmem:[%s6870_s24 + $0x2c] sm:$0x1] }
  0x95   : > { %v1041_v57 = vsel %vm319_vm2, %v1040_v48, %v1039_v52  ;;  %v1302_v58 = vunpack.c.l.b16 %v1280_v49  ;;  %v1303_v59 = vunpack.c.l.b16 %v1287_v50  ;;  %v1149_v60 = vpack.c.bf16 %v1145_v46, %v1145_v46  ;;  %v1327_v49 = vld [vmem:[%s6870_s24 + $0x3c] sm:$0x1] }
  0x96   : > { %v1042_v61 = vpack.c.b16 %v1041_v57, %v1041_v57  ;;  %v1304_v62 = vunpack.c.l.b16 %v1294_v53  ;;  %v1305_v63 = vunpack.c.l.b16 %v1301_v54  ;;  %v1150_v0 = vpack.c.bf16 %v1146_v51, %v1146_v51 }
  0x97   : > { %v1306_v1 = vrot.slane %v1303_v59, 7  ;;  %v1151_v2 = vpack.c.bf16 %v1147_v55, %v1147_v55  ;;  %v1162_v3 = vrot.slane %v1148_v56, %v6888_v6  ;;  %v1169_v5 = vrot.slane %v1149_v60, %v6888_v6 }
  0x98   : > { %v1049_v9 = vrot.slane %v1042_v61, %v6888_v6  ;;  %v1308_v10 = vrot.slane %v1304_v62, 6  ;;  %v1310_v11 = vrot.slane %v1305_v63, 5  ;;  %v1176_v12 = vrot.slane %v1150_v0, %v6888_v6  ;;  %v1594_v63 = vld [vmem:[%s6870_s24 + $0xf] sm:$0x1]  ;;  %v1595_v0 = vld [vmem:[%s6870_s24 + $0x1f] sm:$0x1] }
  0x99   : > { %v1307_v13 = vsel %vm313_vm0, %v1306_v1, %v1302_v58  ;;  %v1183_v14 = vrot.slane %v1151_v2, %v6888_v6  ;;  %v1190_v15 = vrot.slane %v1162_v3, %v6888_v6  ;;  %v1197_v16 = vrot.slane %v1169_v5, %v6888_v6 }
  0x9a   : > { %1050 = vrot.lane.b32.xlu0 %v1049_v9, %s6723_s21  ;;  %v1309_v19 = vsel %vm316_vm1, %v1308_v10, %v1307_v13  ;;  %v1204_v20 = vrot.slane %v1176_v12, %v6888_v6  ;;  %v1418_v21 = vpack.c.bf16 %v1414_v7, %v1414_v7  ;;  %v1419_v22 = vpack.c.bf16 %v1415_v8, %v1415_v8  ;;  %v1597_v12 = vld [vmem:[%s6870_s24 + $0x3f] sm:$0x1] }
  0x9b   : > { %v1311_v23 = vsel %vm319_vm2, %v1310_v11, %v1309_v19  ;;  %v1211_v24 = vrot.slane %v1183_v14, %v6888_v6  ;;  %v1212_v25 = vunpack.c.l.b16 %v1190_v15  ;;  %v1213_v26 = vunpack.c.l.b16 %v1197_v16  ;;  %v1596_v11 = vld [vmem:[%s6870_s24 + $0x2f] sm:$0x1] }
  0x9c   : > { %v1312_v27 = vpack.c.b16 %v1311_v23, %v1311_v23  ;;  %v1214_v28 = vunpack.c.l.b16 %v1204_v20  ;;  %v1420_v29 = vpack.c.bf16 %v1416_v17, %v1416_v17  ;;  %v1421_v30 = vpack.c.bf16 %v1417_v18, %v1417_v18 }
  0x9d   : > { %v1215_v31 = vunpack.c.l.b16 %v1211_v24  ;;  %v1216_v32 = vrot.slane %v1213_v26, 7  ;;  %v1432_v33 = vrot.slane %v1418_v21, %v6888_v6  ;;  %v1439_v34 = vrot.slane %v1419_v22, %v6888_v6 }
  0x9e   : > { %v1319_v36 = vrot.slane %v1312_v27, %v6888_v6  ;;  %v1218_v37 = vrot.slane %v1214_v28, 6  ;;  %v1446_v38 = vrot.slane %v1420_v29, %v6888_v6  ;;  %v1453_v39 = vrot.slane %v1421_v30, %v6888_v6  ;;  %v1504_v29 = vld [vmem:[%s6870_s24 + $0xe] sm:$0x1] }
  0x9f   : > { %v1217_v41 = vsel %vm313_vm0, %v1216_v32, %v1212_v25  ;;  %v1220_v42 = vrot.slane %v1215_v31, 5  ;;  %v1460_v43 = vrot.slane %v1432_v33, %v6888_v6  ;;  %v1467_v44 = vrot.slane %v1439_v34, %v6888_v6  ;;  %v1505_v34 = vld [vmem:[%s6870_s24 + $0x1e] sm:$0x1] }
  0xa0   : > { %1320 = vrot.lane.b32.xlu1 %v1319_v36, %s6723_s21  ;;  %v1219_v46 = vsel %vm316_vm1, %v1218_v37, %v1217_v41  ;;  %v1474_v47 = vrot.slane %v1446_v38, %v6888_v6  ;;  %v1481_v48 = vrot.slane %v1453_v39, %v6888_v6  ;;  %v1328_v50 = vpack.c.bf16 %v1324_v35, %v1324_v35  ;;  %v1506_v39 = vld [vmem:[%s6870_s24 + $0x2e] sm:$0x1] }
  0xa1   : > { %v1221_v51 = vsel %vm319_vm2, %v1220_v42, %v1219_v46  ;;  %v1482_v52 = vunpack.c.l.b16 %v1460_v43  ;;  %v1483_v53 = vunpack.c.l.b16 %v1467_v44  ;;  %v1329_v54 = vpack.c.bf16 %v1325_v40, %v1325_v40  ;;  %v1507_v43 = vld [vmem:[%s6870_s24 + $0x3e] sm:$0x1] }
  0xa2   : > { %v1222_v55 = vpack.c.b16 %v1221_v51, %v1221_v51  ;;  %v1484_v56 = vunpack.c.l.b16 %v1474_v47  ;;  %v1485_v57 = vunpack.c.l.b16 %v1481_v48  ;;  %v1330_v58 = vpack.c.bf16 %v1326_v45, %v1326_v45 }
  0xa3   : > { %v1486_v59 = vrot.slane %v1483_v53, 7  ;;  %v1331_v60 = vpack.c.bf16 %v1327_v49, %v1327_v49  ;;  %v1342_v61 = vrot.slane %v1328_v50, %v6888_v6  ;;  %v1349_v62 = vrot.slane %v1329_v54, %v6888_v6 }
  0xa4   : > { %v1229_v1 = vrot.slane %v1222_v55, %v6888_v6  ;;  %v1488_v2 = vrot.slane %v1484_v56, 6  ;;  %v1490_v3 = vrot.slane %v1485_v57, 5  ;;  %v1356_v5 = vrot.slane %v1330_v58, %v6888_v6 }
  0xa5   : > { %v1487_v7 = vsel %vm313_vm0, %v1486_v59, %v1482_v52  ;;  %v1363_v8 = vrot.slane %v1331_v60, %v6888_v6  ;;  %v1370_v9 = vrot.slane %v1342_v61, %v6888_v6  ;;  %v1377_v10 = vrot.slane %v1349_v62, %v6888_v6 }
  0xa6   : > { %1230 = vrot.lane.b32.xlu0 %v1229_v1, %s6723_s21  ;;  %v1489_v13 = vsel %vm316_vm1, %v1488_v2, %v1487_v7  ;;  %v1384_v14 = vrot.slane %v1356_v5, %v6888_v6  ;;  %v1598_v15 = vpack.c.bf16 %v1594_v63, %v1594_v63  ;;  %v1599_v16 = vpack.c.bf16 %v1595_v0, %v1595_v0 }
  0xa7   : > { %v1491_v17 = vsel %vm319_vm2, %v1490_v3, %v1489_v13  ;;  %v1391_v18 = vrot.slane %v1363_v8, %v6888_v6  ;;  %v1392_v19 = vunpack.c.l.b16 %v1370_v9  ;;  %v1393_v20 = vunpack.c.l.b16 %v1377_v10 }
  0xa8   : > { %v1492_v21 = vpack.c.b16 %v1491_v17, %v1491_v17  ;;  %v1394_v22 = vunpack.c.l.b16 %v1384_v14  ;;  %v1600_v23 = vpack.c.bf16 %v1596_v11, %v1596_v11  ;;  %v1601_v24 = vpack.c.bf16 %v1597_v12, %v1597_v12 }
  0xa9   : > { %v1395_v25 = vunpack.c.l.b16 %v1391_v18  ;;  %v1396_v26 = vrot.slane %v1393_v20, 7  ;;  %v1612_v27 = vrot.slane %v1598_v15, %v6888_v6  ;;  %v1619_v28 = vrot.slane %v1599_v16, %v6888_v6 }
  0xaa   : > { %v1499_v30 = vrot.slane %v1492_v21, %v6888_v6  ;;  %v1398_v31 = vrot.slane %v1394_v22, 6  ;;  %v1626_v32 = vrot.slane %v1600_v23, %v6888_v6  ;;  %v1633_v33 = vrot.slane %v1601_v24, %v6888_v6 }
  0xab   : > { %v1397_v35 = vsel %vm313_vm0, %v1396_v26, %v1392_v19  ;;  %v1400_v36 = vrot.slane %v1395_v25, 5  ;;  %v1640_v37 = vrot.slane %v1612_v27, %v6888_v6  ;;  %v1647_v38 = vrot.slane %v1619_v28, %v6888_v6 }
  0xac   : > { %1500 = vrot.lane.b32.xlu1 %v1499_v30, %s6723_s21  ;;  %v1399_v40 = vsel %vm316_vm1, %v1398_v31, %v1397_v35  ;;  %v1654_v41 = vrot.slane %v1626_v32, %v6888_v6  ;;  %v1661_v42 = vrot.slane %v1633_v33, %v6888_v6  ;;  %v1508_v44 = vpack.c.bf16 %v1504_v29, %v1504_v29 }
  0xad   : > { %v1401_v45 = vsel %vm319_vm2, %v1400_v36, %v1399_v40  ;;  %v1662_v46 = vunpack.c.l.b16 %v1640_v37  ;;  %v1663_v47 = vunpack.c.l.b16 %v1647_v38  ;;  %v1509_v48 = vpack.c.bf16 %v1505_v34, %v1505_v34 }
  0xae   : > { %v1402_v49 = vpack.c.b16 %v1401_v45, %v1401_v45  ;;  %v1664_v50 = vunpack.c.l.b16 %v1654_v41  ;;  %v1665_v51 = vunpack.c.l.b16 %v1661_v42  ;;  %v1510_v52 = vpack.c.bf16 %v1506_v39, %v1506_v39 }
  0xaf   : > { %v1666_v53 = vrot.slane %v1663_v47, 7  ;;  %v1511_v54 = vpack.c.bf16 %v1507_v43, %v1507_v43  ;;  %v1522_v55 = vrot.slane %v1508_v44, %v6888_v6  ;;  %v1529_v56 = vrot.slane %v1509_v48, %v6888_v6 }
  0xb0   : > { %v1409_v57 = vrot.slane %v1402_v49, %v6888_v6  ;;  %v1668_v58 = vrot.slane %v1664_v50, 6  ;;  %v1670_v59 = vrot.slane %v1665_v51, 5  ;;  %v1536_v60 = vrot.slane %v1510_v52, %v6888_v6 }
  0xb1   : > { %v1667_v61 = vsel %vm313_vm0, %v1666_v53, %v1662_v46  ;;  %v1543_v62 = vrot.slane %v1511_v54, %v6888_v6  ;;  %v1550_v63 = vrot.slane %v1522_v55, %v6888_v6  ;;  %v1557_v0 = vrot.slane %v1529_v56, %v6888_v6 }
  0xb2   : > { %1410 = vrot.lane.b32.xlu0 %v1409_v57, %s6723_s21  ;;  %v1669_v1 = vsel %vm316_vm1, %v1668_v58, %v1667_v61  ;;  %v1564_v2 = vrot.slane %v1536_v60, %v6888_v6  ;;  %vm332_vm3 = vcmask 132104   ;;  %vm1806_vm4 = vcmask 1039360  }
  0xb3   : > { %v1671_v3 = vsel %vm319_vm2, %v1670_v59, %v1669_v1  ;;  %v1571_v5 = vrot.slane %v1543_v62, %v6888_v6  ;;  %v1572_v7 = vunpack.c.l.b16 %v1550_v63  ;;  %v1573_v8 = vunpack.c.l.b16 %v1557_v0 }
  0xb4   : > { %v1672_v9 = vpack.c.b16 %v1671_v3, %v1671_v3  ;;  %v1574_v10 = vunpack.c.l.b16 %v1564_v2  ;;  %vm1827_vm5 = vcmask 1041408   ;;  %vm1823_vm6 = vcmask 31744  }
  0xb5   : > { %v1575_v11 = vunpack.c.l.b16 %v1571_v5  ;;  %v1576_v12 = vrot.slane %v1573_v8, 7  ;;  %vm2704_vm7 = vcmask 1031168  }
  0xb6   : > { %v1679_v13 = vrot.slane %v1672_v9, %v6888_v6  ;;  %v1578_v14 = vrot.slane %v1574_v10, 6 }
  0xb7   : > { %v1577_v15 = vsel %vm313_vm0, %v1576_v12, %v1572_v7  ;;  %v1580_v16 = vrot.slane %v1575_v11, 5 }
  0xb8   : > { %1680 = vrot.lane.b32.xlu1 %v1679_v13, %s6723_s21  ;;  %v1579_v17 = vsel %vm316_vm1, %v1578_v14, %v1577_v15 }
  0xb9   : > { %v1581_v18 = vsel %vm319_vm2, %v1580_v16, %v1579_v17 }
  0xba   : > { %v1582_v19 = vpack.c.b16 %v1581_v18, %v1581_v18 }
  0xbc   : > { %v1589_v20 = vrot.slane %v1582_v19, %v6888_v6 }
  0xbe   : > { %1590 = vrot.lane.b32.xlu0 %v1589_v20, %s6723_s21 }
  0xda   : > { %v511_v21 = vpop.permute.xlu1 %510 }
  0xdb   : > { %513 = vst.msk [vmem:[#allocation2 + $0x6] sm:$0x3] %vm332_vm3, %v511_v21  ;;  %v330_v22 = vpop.permute.xlu0 %329 }
  0xdc   : > { %333 = vst.msk [vmem:[#allocation2 + $0x2] sm:$0x3] %vm332_vm3, %v330_v22 }
  0xe3   : > { %v601_v23 = vpop.permute.xlu1 %600 }
  0xe4   : > { %603 = vst.msk [vmem:[#allocation2 + $0x8] sm:$0x3] %vm332_vm3, %v601_v23 }
  0xe8   : > { %v421_v24 = vpop.permute.xlu0 %420 }
  0xe9   : > { %423 = vst.msk [vmem:[#allocation2 + $0x4] sm:$0x3] %vm332_vm3, %v421_v24 }
  0xee   : > { %v781_v25 = vpop.permute.xlu1 %780 }
  0xef   : > { %783 = vst.msk [vmem:[#allocation2 + $0xc] sm:$0x3] %vm332_vm3, %v781_v25 }
  0xf0   : > { %v1684_v26 = vld [vmem:[#allocation2] sm:$0xff] }
  0xf1   : > { %v7168_v27 = vrot.slane %v1684_v26, %v6888_v6  ;;  %v1697_v28 = vcombine.high %v1684_v26, %v1684_v26  ;;  %v3589_v62 = vld [vmem:[#allocation2 + $0x2] sm:$0xff] }
  0xf2   : > { %v7300_v63 = vrot.slane %v3589_v62, %v6888_v6  ;;  %v3601_v1 = vcombine.high %v3589_v62, %v3589_v62 }
  0xf3   : > { %1772 = vrot.lane.b32.xlu0 %v7168_v27, %s6724_s22  ;;  %v7173_v29 = vrot.slane %v1697_v28, %v6888_v6  ;;  %v7177_v30 = vcombine.high %v7168_v27, %v7168_v27 }
  0xf4   : > { %v691_v31 = vpop.permute.xlu0 %690  ;;  %v7305_v2 = vcombine.high %v7300_v63, %v7300_v63  ;;  %v7315_v5 = vrot.slane %v3601_v1, %v6888_v6 }
  0xf5   : > { %693 = vst.msk [vmem:[#allocation2 + $0xa] sm:$0x3] %vm332_vm3, %v691_v31  ;;  %1774 = vrot.lane.b32.xlu1 %v7177_v30, %s6724_s22  ;;  %v7184_v32 = vcombine.high %v7173_v29, %v7173_v29 }
  0xf6   : > { %v7327_v10 = vcombine.high %v7315_v5, %v7315_v5 }
  0xf9   : > { %1778 = vrot.lane.b32.xlu1 %v7184_v32, %s6724_s22 }
  0xfa   : > { %v961_v33 = vpop.permute.xlu1 %960 }
  0xfb   : > { %963 = vst.msk [vmem:[#allocation2 + $0x10] sm:$0x3] %vm332_vm3, %v961_v33 }
 0x100   : > { %v871_v34 = vpop.permute.xlu0 %870 }
 0x101   : > { %873 = vst.msk [vmem:[#allocation2 + $0xe] sm:$0x3] %vm332_vm3, %v871_v34 }
 0x106   : > { %v1141_v35 = vpop.permute.xlu1 %1140 }
 0x107   : > { %1143 = vst.msk [vmem:[#allocation2 + $0x14] sm:$0x3] %vm332_vm3, %v1141_v35 }
 0x108   : > { %v1685_v36 = vld [vmem:[#allocation2 + $0x8] sm:$0xff] }
 0x109   : > { %v1714_v37 = vcombine.high %v1685_v36, %v1685_v36  ;;  %v7192_v38 = vrot.slane %v1685_v36, %v6888_v6  ;;  %v3590_v0 = vld [vmem:[#allocation2 + $0xa] sm:$0xff] }
 0x10a   : > { %v7310_v3 = vrot.slane %v3590_v0, %v6888_v6  ;;  %v3618_v9 = vcombine.high %v3590_v0, %v3590_v0 }
 0x10b   : > { %v7195_v39 = vrot.slane %v1714_v37, %v6888_v6  ;;  %1780 = vrot.lane.b32.xlu0 %v7192_v38, %s6724_s22  ;;  %v7201_v40 = vcombine.high %v7192_v38, %v7192_v38  ;;  %v6457_v37 = vld.sshfl [vmem:[#allocation2 + $0x22] sm:$0x3 pattern:$0x76325410] }
 0x10c   : > { %v1051_v41 = vpop.permute.xlu0 %1050  ;;  %v7319_v7 = vcombine.high %v7310_v3, %v7310_v3  ;;  %v7337_v12 = vrot.slane %v3618_v9, %v6888_v6 }
 0x10d   : > { %1053 = vst.msk [vmem:[#allocation2 + $0x12] sm:$0x3] %vm332_vm3, %v1051_v41  ;;  %1782 = vrot.lane.b32.xlu1 %v7201_v40, %s6724_s22  ;;  %v7210_v42 = vcombine.high %v7195_v39, %v7195_v39 }
 0x10e   : > { %v7349_v17 = vcombine.high %v7337_v12, %v7337_v12 }
 0x10f   : > { %1776 = vrot.lane.b32.xlu0 %v7173_v29, %s6724_s22 }
 0x111   : > { %1786 = vrot.lane.b32.xlu1 %v7210_v42, %s6724_s22 }
 0x112   : > { %v1321_v43 = vpop.permute.xlu1 %1320 }
 0x113   : > { %1323 = vst.msk [vmem:[#allocation2 + $0x18] sm:$0x3] %vm332_vm3, %v1321_v43  ;;  %1784 = vrot.lane.b32.xlu0 %v7195_v39, %s6724_s22 }
 0x118   : > { %v1231_v44 = vpop.permute.xlu0 %1230 }
 0x119   : > { %1233 = vst.msk [vmem:[#allocation2 + $0x16] sm:$0x3] %vm332_vm3, %v1231_v44  ;;  %v7390_v44 = vld [vmem:[#allocation6 + $0x2] sm:$0x3] }
 0x11e   : > { %v1501_v45 = vpop.permute.xlu1 %1500 }
 0x11f   : > { %1503 = vst.msk [vmem:[#allocation2 + $0x1c] sm:$0x3] %vm332_vm3, %v1501_v45 }
 0x120   : > { %v1686_v46 = vld [vmem:[#allocation2 + $0x10] sm:$0xff] }
 0x121   : > { %v7220_v47 = vrot.slane %v1686_v46, %v6888_v6  ;;  %v1731_v48 = vcombine.high %v1686_v46, %v1686_v46  ;;  %v3591_v8 = vld [vmem:[#allocation2 + $0x12] sm:$0xff] }
 0x122   : > { %v7332_v11 = vrot.slane %v3591_v8, %v6888_v6  ;;  %v3635_v15 = vcombine.high %v3591_v8, %v3591_v8 }
 0x123   : > { %v7224_v49 = vcombine.high %v7220_v47, %v7220_v47  ;;  %1788 = vrot.lane.b32.xlu0 %v7220_v47, %s6724_s22  ;;  %v7229_v50 = vrot.slane %v1731_v48, %v6888_v6 }
 0x124   : > { %v1411_v51 = vpop.permute.xlu0 %1410  ;;  %v7341_v13 = vcombine.high %v7332_v11, %v7332_v11  ;;  %v7359_v19 = vrot.slane %v3635_v15, %v6888_v6  ;;  %v5126_v15 = vld [vmem:[#allocation2 + $0x4] sm:$0xff] }
 0x125   : > { %1413 = vst.msk [vmem:[#allocation2 + $0x1a] sm:$0x3] %vm332_vm3, %v1411_v51  ;;  %1790 = vrot.lane.b32.xlu1 %v7224_v49, %s6724_s22  ;;  %v7236_v52 = vcombine.high %v7229_v50, %v7229_v50 }
 0x126   : > { %v7372_v26 = vcombine.high %v7359_v19, %v7359_v19 }
 0x127   : > { %1792 = vrot.lane.b32.xlu0 %v7229_v50, %s6724_s22 }
 0x129   : > { %1794 = vrot.lane.b32.xlu1 %v7236_v52, %s6724_s22 }
 0x12a   : > { %v1681_v53 = vpop.permute.xlu1 %1680 }
 0x12b   : > { %1683 = vst.msk [vmem:[#allocation2 + $0x20] sm:$0x3] %vm332_vm3, %v1681_v53 }
 0x130   : > { %v1591_v54 = vpop.permute.xlu0 %1590 }
 0x131   : > { %1593 = vst.msk [vmem:[#allocation2 + $0x1e] sm:$0x3] %vm332_vm3, %v1591_v54 }
 0x132   : > { %v6391_v61 = vld.sshfl [vmem:[#allocation2 + $0x20] sm:$0x3 pattern:$0x76325410] }
 0x138   : > { %v1687_v55 = vld [vmem:[#allocation2 + $0x18] sm:$0xff] }
 0x139   : > { %v7245_v56 = vrot.slane %v1687_v55, %v6888_v6  ;;  %v1748_v57 = vcombine.high %v1687_v55, %v1687_v55  ;;  %v3592_v14 = vld [vmem:[#allocation2 + $0x1a] sm:$0xff] }
 0x13a   : > { %v7354_v18 = vrot.slane %v3592_v14, %v6888_v6  ;;  %v3652_v23 = vcombine.high %v3592_v14, %v3592_v14 }
 0x13b   : > { %v7249_v58 = vcombine.high %v7245_v56, %v7245_v56  ;;  %1796 = vrot.lane.b32.xlu0 %v7245_v56, %s6724_s22  ;;  %v7254_v59 = vrot.slane %v1748_v57, %v6888_v6 }
 0x13c   : > { %v7363_v21 = vcombine.high %v7354_v18, %v7354_v18  ;;  %v7381_v31 = vrot.slane %v3652_v23, %v6888_v6 }
 0x13d   : > { %1798 = vrot.lane.b32.xlu1 %v7249_v58, %s6724_s22  ;;  %v7260_v60 = vcombine.high %v7254_v59, %v7254_v59 }
 0x13e   : > { %v7398_v51 = vcombine.high %v7381_v31, %v7381_v31 }
 0x13f   : > { %1800 = vrot.lane.b32.xlu0 %v7254_v59, %s6724_s22 }
 0x141   : > { %1802 = vrot.lane.b32.xlu1 %v7260_v60, %s6724_s22 }
 0x143   : > { %1804 = vrot.lane.b32.xlu0 %v6391_v61, %s6724_s22 }
 0x145   : > { %2670 = vrot.lane.b32.xlu1 %v7168_v27, %s6725_s5 }
 0x147   : > { %2672 = vrot.lane.b32.xlu0 %v7177_v30, %s6725_s5 }
 0x149   : > { %2674 = vrot.lane.b32.xlu1 %v7173_v29, %s6725_s5 }
 0x14b   : > { %2676 = vrot.lane.b32.xlu0 %v7184_v32, %s6725_s5 }
 0x14d   : > { %2678 = vrot.lane.b32.xlu1 %v7192_v38, %s6725_s5 }
 0x14f   : > { %2680 = vrot.lane.b32.xlu0 %v7201_v40, %s6725_s5 }
 0x151   : > { %2682 = vrot.lane.b32.xlu1 %v7195_v39, %s6725_s5 }
 0x153   : > { %2684 = vrot.lane.b32.xlu0 %v7210_v42, %s6725_s5 }
 0x155   : > { %2686 = vrot.lane.b32.xlu1 %v7220_v47, %s6725_s5 }
 0x157   : > { %2688 = vrot.lane.b32.xlu0 %v7224_v49, %s6725_s5 }
 0x159   : > { %2690 = vrot.lane.b32.xlu1 %v7229_v50, %s6725_s5 }
 0x15b   : > { %2692 = vrot.lane.b32.xlu0 %v7236_v52, %s6725_s5 }
 0x15d   : > { %2694 = vrot.lane.b32.xlu1 %v7245_v56, %s6725_s5 }
 0x15f   : > { %2696 = vrot.lane.b32.xlu0 %v7249_v58, %s6725_s5 }
 0x161   : > { %2698 = vrot.lane.b32.xlu1 %v7254_v59, %s6725_s5 }
 0x163   : > { %2700 = vrot.lane.b32.xlu0 %v7260_v60, %s6725_s5 }
 0x165   : > { %2702 = vrot.lane.b32.xlu1 %v6391_v61, %s6725_s5  ;;  %v1773_v20 = vpop.permute.xlu0 %1772 }
 0x167   : > { %3676 = vrot.lane.b32.xlu0 %v7300_v63, %s6724_s22  ;;  %v1775_v16 = vpop.permute.xlu1 %1774 }
 0x168   : > { %v1807_v28 = vsel %vm1806_vm4, %v1773_v20, %v1775_v16  ;;  %v5138_v20 = vcombine.high %v5126_v15, %v5126_v15 }
 0x169   : > { %3678 = vrot.lane.b32.xlu1 %v7305_v2, %s6724_s22  ;;  %v1829_v41 = vsel %vm1827_vm5, %v1807_v28, 0  ;;  %v5127_v28 = vld [vmem:[#allocation2 + $0xc] sm:$0xff] }
 0x16b   : > { %3680 = vrot.lane.b32.xlu0 %v7315_v5, %s6724_s22  ;;  %v1779_v22 = vpop.permute.xlu1 %1778 }
 0x16d   : > { %3686 = vrot.lane.b32.xlu1 %v7319_v7, %s6724_s22 }
 0x16f   : > { %3684 = vrot.lane.b32.xlu0 %v7310_v3, %s6724_s22 }
 0x171   : > { %3682 = vrot.lane.b32.xlu1 %v7327_v10, %s6724_s22 }
 0x173   : > { %3688 = vrot.lane.b32.xlu0 %v7337_v12, %s6724_s22 }
 0x175   : > { %3694 = vrot.lane.b32.xlu1 %v7341_v13, %s6724_s22 }
 0x177   : > { %3692 = vrot.lane.b32.xlu0 %v7332_v11, %s6724_s22 }
 0x179   : > { %3690 = vrot.lane.b32.xlu1 %v7349_v17, %s6724_s22 }
 0x17b   : > { %3696 = vrot.lane.b32.xlu0 %v7359_v19, %s6724_s22 }
 0x17d   : > { %3702 = vrot.lane.b32.xlu1 %v7363_v21, %s6724_s22  ;;  %v1781_v24 = vpop.permute.xlu0 %1780 }
 0x17e   : > { %v1810_v25 = vsel %vm1806_vm4, %v1779_v22, %v1781_v24 }
 0x17f   : > { %3700 = vrot.lane.b32.xlu0 %v7354_v18, %s6724_s22  ;;  %6394 = vmatprep.subr.msk.bf16.mxu1 %vm1827_vm5, %v1810_v25  ;;  %v1783_v34 = vpop.permute.xlu1 %1782 }
 0x180   : > { %v1811_v45 = vsel %vm1806_vm4, %v1781_v24, %v1783_v34  ;;  %v7469_v24 = vrot.slane %v5138_v20, %v6888_v6 }
 0x181   : > { %3698 = vrot.lane.b32.xlu1 %v7372_v26, %s6724_s22  ;;  %v1777_v33 = vpop.permute.xlu0 %1776  ;;  %v1841_v53 = vsel %vm1827_vm5, %v1811_v45, 0 }
 0x182   : > { %v1808_v35 = vsel %vm1806_vm4, %v1775_v16, %v1777_v33  ;;  %v1809_v36 = vsel %vm1806_vm4, %v1777_v33, %v1779_v22  ;;  %v7459_v16 = vrot.slane %v5126_v15, %v6888_v6 }
 0x183   : > { %3704 = vrot.lane.b32.xlu0 %v7381_v31, %s6724_s22  ;;  %6392 = vmatprep.subr.msk.bf16.mxu0 %vm1827_vm5, %v1808_v35  ;;  %v1835_v43 = vsel %vm1827_vm5, %v1809_v36, 0  ;;  %v1787_v54 = vpop.permute.xlu1 %1786 }
 0x184   : > { %1877 = vmatpush1.bf16.msra.mxu0 %v1829_v41  ;;  %1918 = vmatpush1.bf16.msra.mxu1 %v1835_v43  ;;  %v7464_v23 = vcombine.high %v7459_v16, %v7459_v16  ;;  %v7484_v41 = vrot.slane %v5127_v28, %v6888_v6  ;;  %v5155_v43 = vcombine.high %v5127_v28, %v5127_v28 }
 0x185   : > { %4208 = vrot.lane.b32.xlu1 %v7300_v63, %s6725_s5  ;;  %v1785_v46 = vpop.permute.xlu0 %1784 }
 0x186   : > { %v1812_v48 = vsel %vm1806_vm4, %v1783_v34, %v1785_v46  ;;  %v1813_v55 = vsel %vm1806_vm4, %v1785_v46, %v1787_v54 }
 0x187   : > { %3708 = vrot.lane.b32.xlu0 %v6457_v37, %s6724_s22  ;;  %6393 = vmatmul.mubr.msk.bf16.vlgmr.msra.gmra.mrb[0].mxu0 %vm1823_vm6, %v7390_v44  ;;  %v1847_v62 = vsel %vm1827_vm5, %v1813_v55, 0  ;;  %v7499_v55 = vrot.slane %v5155_v43, %v6888_v6 }
 0x188   : > { %6395 = vmatmul.mubr.msk.bf16.vlgmr.msra.gmra.mrb[0].mxu1 %vm1823_vm6, %v7390_v44  ;;  %6396 = vmatprep.subr.msk.bf16.mxu0 %vm1827_vm5, %v1812_v48 }
 0x189   : > { %3706 = vrot.lane.b32.xlu1 %v7398_v51, %s6724_s22  ;;  %1959 = vmatpush1.bf16.msra.mxu0 %v1841_v53 }
 0x18a   : > { %1990 = vmatprep.mubr.bf16.mxu0 %v6722_v4  ;;  %2031 = vmatprep.mubr.bf16.mxu1 %v6722_v4 }
 0x18b   : > { %4210 = vrot.lane.b32.xlu0 %v7305_v2, %s6725_s5 }
 0x18d   : > { %4212 = vrot.lane.b32.xlu1 %v7315_v5, %s6725_s5 }
 0x18f   : > { %4214 = vrot.lane.b32.xlu0 %v7327_v10, %s6725_s5  ;;  %6397 = vmatmul.mubr.msk.bf16.vlgmr.msra.gmra.mrb[4].mxu0 %vm1823_vm6, %v7390_v44 }
 0x190   : > { %2072 = vmatprep.mubr.bf16.mxu0 %v6722_v4 }
 0x191   : > { %4216 = vrot.lane.b32.xlu1 %v7310_v3, %s6725_s5 }
 0x193   : > { %4218 = vrot.lane.b32.xlu0 %v7319_v7, %s6725_s5 }
 0x195   : > { %4220 = vrot.lane.b32.xlu1 %v7337_v12, %s6725_s5  ;;  %v1789_v57 = vpop.permute.xlu0 %1788 }
 0x196   : > { %v1814_v61 = vsel %vm1806_vm4, %v1787_v54, %v1789_v57  ;;  %v7492_v54 = vcombine.high %v7484_v41, %v7484_v41 }
 0x197   : > { %4222 = vrot.lane.b32.xlu0 %v7349_v17, %s6725_s5  ;;  %6398 = vmatprep.subr.msk.bf16.mxu1 %vm1827_vm5, %v1814_v61  ;;  %v1791_v0 = vpop.permute.xlu1 %1790 }
 0x198   : > { %2000 = vmatpush1.bf16.msra.mxu1 %v1847_v62  ;;  %v1815_v1 = vsel %vm1806_vm4, %v1789_v57, %v1791_v0  ;;  %v5128_v62 = vld [vmem:[#allocation2 + $0x14] sm:$0xff] }
 0x199   : > { %4224 = vrot.lane.b32.xlu1 %v7332_v11, %s6725_s5  ;;  %v1793_v8 = vpop.permute.xlu0 %1792  ;;  %v1853_v14 = vsel %vm1827_vm5, %v1815_v1, 0  ;;  %v7521_v15 = vrot.slane %v5128_v62, %v6888_v6  ;;  %v5172_v20 = vcombine.high %v5128_v62, %v5128_v62 }
 0x19a   : > { %v1816_v9 = vsel %vm1806_vm4, %v1791_v0, %v1793_v8 }
 0x19b   : > { %4226 = vrot.lane.b32.xlu0 %v7341_v13, %s6725_s5  ;;  %6399 = vmatmul.mubr.msk.bf16.vlgmr.msra.gmra.mrb[4].mxu1 %vm1823_vm6, %v7390_v44  ;;  %v1795_v22 = vpop.permute.xlu1 %1794  ;;  %v7538_v28 = vcombine.high %v7521_v15, %v7521_v15 }
 0x19c   : > { %6400 = vmatprep.subr.msk.bf16.mxu0 %vm1827_vm5, %v1816_v9  ;;  %2113 = vmatprep.mubr.bf16.mxu1 %v6722_v4  ;;  %v1817_v25 = vsel %vm1806_vm4, %v1793_v8, %v1795_v22 }
 0x19d   : > { %4228 = vrot.lane.b32.xlu1 %v7359_v19, %s6725_s5  ;;  %2041 = vmatpush1.bf16.msra.mxu0 %v1853_v14  ;;  %v1859_v35 = vsel %vm1827_vm5, %v1817_v25, 0  ;;  %v7515_v14 = vcombine.high %v7499_v55, %v7499_v55 }
 0x19f   : > { %4230 = vrot.lane.b32.xlu0 %v7372_v26, %s6725_s5 }
 0x1a0   : > { %6401 = vmatmul.mubr.msk.bf16.vlgmr.msra.gmra.mrb[8].mxu0 %vm1823_vm6, %v7390_v44 }
 0x1a1   : > { %4232 = vrot.lane.b32.xlu1 %v7354_v18, %s6725_s5  ;;  %2154 = vmatprep.mubr.bf16.mxu0 %v6722_v4 }
 0x1a3   : > { %4234 = vrot.lane.b32.xlu0 %v7363_v21, %s6725_s5 }
 0x1a5   : > { %4236 = vrot.lane.b32.xlu1 %v7381_v31, %s6725_s5 }
 0x1a7   : > { %4238 = vrot.lane.b32.xlu0 %v7398_v51, %s6725_s5 }
 0x1a9   : > { %4240 = vrot.lane.b32.xlu1 %v6457_v37, %s6725_s5  ;;  %v7478_v37 = vcombine.high %v7469_v24, %v7469_v24 }
 0x1ab   : > { %5213 = vrot.lane.b32.xlu0 %v7459_v16, %s6724_s22 }
 0x1ad   : > { %5215 = vrot.lane.b32.xlu1 %v7464_v23, %s6724_s22  ;;  %v1797_v33 = vpop.permute.xlu0 %1796 }
 0x1ae   : > { %v1818_v34 = vsel %vm1806_vm4, %v1795_v22, %v1797_v33  ;;  %v2208_v22 = vsel %vm1827_vm5, %v7168_v27, 0  ;;  %v7547_v27 = vrot.slane %v5172_v20, %v6888_v6 }
 0x1af   : > { %v1799_v36 = vpop.permute.xlu1 %1798  ;;  %5217 = vrot.lane.b32.xlu0 %v7469_v24, %s6724_s22  ;;  %6402 = vmatprep.subr.msk.bf16.mxu1 %vm1827_vm5, %v1818_v34 }
 0x1b0   : > { %2082 = vmatpush1.bf16.msra.mxu1 %v1859_v35  ;;  %v1819_v45 = vsel %vm1806_vm4, %v1797_v33, %v1799_v36  ;;  %v5129_v33 = vld [vmem:[#allocation2 + $0x1c] sm:$0xff]  ;;  %v7564_v35 = vcombine.high %v7547_v27, %v7547_v27 }
 0x1b1   : > { %5219 = vrot.lane.b32.xlu1 %v7478_v37, %s6724_s22  ;;  %v1801_v46 = vpop.permute.xlu0 %1800  ;;  %v1865_v57 = vsel %vm1827_vm5, %v1819_v45, 0 }
 0x1b2   : > { %v1820_v48 = vsel %vm1806_vm4, %v1799_v36, %v1801_v46  ;;  %v7569_v36 = vrot.slane %v5129_v33, %v6888_v6 }
 0x1b3   : > { %v1803_v53 = vpop.permute.xlu1 %1802  ;;  %5221 = vrot.lane.b32.xlu0 %v7484_v41, %s6724_s22  ;;  %6403 = vmatmul.mubr.msk.bf16.vlgmr.msra.gmra.mrb[8].mxu1 %vm1823_vm6, %v7390_v44 }
 0x1b4   : > { %v1821_v61 = vsel %vm1806_vm4, %v1801_v46, %v1803_v53  ;;  %6404 = vmatprep.subr.msk.bf16.mxu0 %vm1827_vm5, %v1820_v48  ;;  %2195 = vmatprep.mubr.bf16.mxu1 %v6722_v4  ;;  %v7586_v46 = vcombine.high %v7569_v36, %v7569_v36 }
 0x1b5   : > { %5223 = vrot.lane.b32.xlu1 %v7492_v54, %s6724_s22  ;;  %2123 = vmatpush1.bf16.msra.mxu0 %v1865_v57  ;;  %v1805_v0 = vpop.permute.xlu0 %1804  ;;  %v1871_v8 = vsel %vm1827_vm5, %v1821_v61, 0 }
 0x1b6   : > { %v1822_v1 = vsel %vm1806_vm4, %v1803_v53, %v1805_v0  ;;  %6408 = vmatprep.subr.msk.bf16.mxu0 %vm1827_vm5, %v7177_v30 }
 0x1b7   : > { %v7511_v9 = vpop.permute.xlu1 %2670  ;;  %5225 = vrot.lane.b32.xlu0 %v7499_v55, %s6724_s22  ;;  %6406 = vmatprep.subr.msk.bf16.mxu1 %vm1827_vm5, %v1822_v1 }
 0x1b8   : > { %2164 = vmatpush1.bf16.msra.mxu1 %v1871_v8  ;;  %6405 = vmatmul.mubr.msk.bf16.vlgmr.msra.gmra.mrb[12].mxu0 %vm1823_vm6, %v7390_v44 }
 0x1b9   : > { %5227 = vrot.lane.b32.xlu1 %v7515_v14, %s6724_s22  ;;  %v7527_v30 = vpop.permute.xlu0 %2672  ;;  %6410 = vmatprep.subr.msk.bf16.mxu1 %vm1827_vm5, %v7184_v32  ;;  %v2214_v32 = vsel %vm1827_vm5, %v7173_v29, 0 }
 0x1ba   : > { %2256 = vmatpush1.bf16.msra.mxu0 %v2208_v22  ;;  %2287 = vmatprep.mubr.bf16.mxu0 %v6722_v4  ;;  %v2705_v1 = vsel %vm2704_vm7, %v7511_v9, %v7527_v30 }
 0x1bb   : > { %v7534_v25 = vpop.permute.xlu1 %2674  ;;  %5229 = vrot.lane.b32.xlu0 %v7521_v15, %s6724_s22  ;;  %6407 = vmatmul.mubr.msk.bf16.vlgmr.msra.gmra.mrb[12].mxu1 %vm1823_vm6, %v7390_v44  ;;  %v7557_v44 = vld [vmem:[#allocation6] sm:$0x3] }
 0x1bc   : > { %2297 = vmatpush1.bf16.msra.mxu1 %v2214_v32  ;;  %6412 = vmatprep.subr.msk.bf16.mxu0 %vm1827_vm5, %v7201_v40  ;;  %v5189_v40 = vcombine.high %v5129_v33, %v5129_v33  ;;  %v2706_v62 = vsel %vm2704_vm7, %v7527_v30, %v7534_v25 }
 0x1bd   : > { %5231 = vrot.lane.b32.xlu1 %v7538_v28, %s6724_s22  ;;  %v7553_v34 = vpop.permute.xlu0 %2676  ;;  %6414 = vmatprep.subr.msk.bf16.mxu1 %vm1827_vm5, %v7210_v42  ;;  %v2220_v42 = vsel %vm1827_vm5, %v7192_v38, 0  ;;  %v2226_v38 = vsel %vm1827_vm5, %v7195_v39, 0  ;;  %v2232_v39 = vsel %vm1827_vm5, %v7220_v47, 0  ;;  %v2238_v47 = vsel %vm1827_vm5, %v7229_v50, 0 }
 0x1be   : > { %2328 = vmatprep.mubr.bf16.mxu1 %v6722_v4  ;;  %v7595_v48 = vrot.slane %v5189_v40, %v6888_v6  ;;  %v7612_v6 = vld.sshfl [vmem:[#allocation2 + $0x24] sm:$0x3 pattern:$0x76325410]  ;;  %v2244_v50 = vsel %vm1827_vm5, %v7245_v56, 0  ;;  %v2250_v56 = vsel %vm1827_vm5, %v7254_v59, 0  ;;  %v2707_v20 = vsel %vm2704_vm7, %v7534_v25, %v7553_v34 }
 0x1bf   : > { %v7560_v29 = vpop.permute.xlu1 %2678  ;;  %5233 = vrot.lane.b32.xlu0 %v7547_v27, %s6724_s22  ;;  %v2725_v59 = vsel %vm1827_vm5, %v2705_v1, 0  ;;  %v2731_v22 = vsel %vm1827_vm5, %v2707_v20, 0 }
 0x1c0   : > { %6409 = vmatmul.mubr.msk.bf16.vlgmr.msra.gmra.mrb[16].mxu0 %vm1823_vm6, %v7557_v44  ;;  %v7608_v57 = vcombine.high %v7595_v48, %v7595_v48  ;;  %v2708_v0 = vsel %vm2704_vm7, %v7553_v34, %v7560_v29  ;;  %v7703_v34 = vld [vmem:[#allocation6 + $0x4] sm:$0x3] }
 0x1c1   : > { %5235 = vrot.lane.b32.xlu1 %v7564_v35, %s6724_s22  ;;  %v7577_v43 = vpop.permute.xlu0 %2680  ;;  %2338 = vmatpush1.bf16.msra.mxu0 %v2220_v42 }
 0x1c2   : > { %6416 = vmatprep.subr.msk.bf16.mxu0 %vm1827_vm5, %v7224_v49  ;;  %2369 = vmatprep.mubr.bf16.mxu0 %v6722_v4  ;;  %v2709_v33 = vsel %vm2704_vm7, %v7560_v29, %v7577_v43 }
 0x1c3   : > { %v7582_v45 = vpop.permute.xlu1 %2682  ;;  %5237 = vrot.lane.b32.xlu0 %v7569_v36, %s6724_s22  ;;  %6411 = vmatmul.mubr.msk.bf16.vlgmr.msra.gmra.mrb[16].mxu1 %vm1823_vm6, %v7557_v44 }
 0x1c4   : > { %2379 = vmatpush1.bf16.msra.mxu1 %v2226_v38  ;;  %2410 = vmatprep.mubr.bf16.mxu1 %v6722_v4  ;;  %v2710_v9 = vsel %vm2704_vm7, %v7577_v43, %v7582_v45 }
 0x1c5   : > { %5239 = vrot.lane.b32.xlu1 %v7586_v46, %s6724_s22  ;;  %6418 = vmatprep.subr.msk.bf16.mxu1 %vm1827_vm5, %v7236_v52  ;;  %v7602_v49 = vpop.permute.xlu0 %2684 }
 0x1c6   : > { %v2711_v42 = vsel %vm2704_vm7, %v7582_v45, %v7602_v49 }
 0x1c7   : > { %v7604_v53 = vpop.permute.xlu1 %2686  ;;  %5241 = vrot.lane.b32.xlu0 %v7595_v48, %s6724_s22  ;;  %v2743_v38 = vsel %vm1827_vm5, %v2711_v42, 0 }
 0x1c8   : > { %6413 = vmatmul.mubr.msk.bf16.vlgmr.msra.gmra.mrb[20].mxu0 %vm1823_vm6, %v7557_v44  ;;  %v2712_v25 = vsel %vm2704_vm7, %v7602_v49, %v7604_v53 }
 0x1c9   : > { %5243 = vrot.lane.b32.xlu1 %v7608_v57, %s6724_s22  ;;  %v7620_v52 = vpop.permute.xlu0 %2688  ;;  %2420 = vmatpush1.bf16.msra.mxu0 %v2232_v39 }
 0x1ca   : > { %6420 = vmatprep.subr.msk.bf16.mxu0 %vm1827_vm5, %v7249_v58  ;;  %2451 = vmatprep.mubr.bf16.mxu0 %v6722_v4  ;;  %v2713_v49 = vsel %vm2704_vm7, %v7604_v53, %v7620_v52 }
 0x1cb   : > { %5245 = vrot.lane.b32.xlu0 %v7612_v6, %s6724_s22  ;;  %6415 = vmatmul.mubr.msk.bf16.vlgmr.msra.gmra.mrb[20].mxu1 %vm1823_vm6, %v7557_v44  ;;  %v7632_v61 = vpop.permute.xlu1 %2690 }
 0x1cc   : > { %2461 = vmatpush1.bf16.msra.mxu1 %v2238_v47  ;;  %2492 = vmatprep.mubr.bf16.mxu1 %v6722_v4  ;;  %v2714_v29 = vsel %vm2704_vm7, %v7620_v52, %v7632_v61 }
 0x1cd   : > { %5745 = vrot.lane.b32.xlu1 %v7459_v16, %s6725_s5  ;;  %6422 = vmatprep.subr.msk.bf16.mxu1 %vm1827_vm5, %v7260_v60  ;;  %v7638_v58 = vpop.permute.xlu0 %2692 }
 0x1cf   : > { %5747 = vrot.lane.b32.xlu0 %v7464_v23, %s6725_s5  ;;  %v7653_v60 = vpop.permute.xlu1 %2694 }
 0x1d0   : > { %6417 = vmatmul.mubr.msk.bf16.vlgmr.msra.gmra.mrb[24].mxu0 %vm1823_vm6, %v7557_v44  ;;  %v2716_v45 = vsel %vm2704_vm7, %v7638_v58, %v7653_v60 }
 0x1d1   : > { %5749 = vrot.lane.b32.xlu1 %v7469_v24, %s6725_s5  ;;  %2502 = vmatpush1.bf16.msra.mxu0 %v2244_v50  ;;  %v7668_v8 = vpop.permute.xlu0 %2696  ;;  %v2749_v50 = vsel %vm1827_vm5, %v2713_v49, 0 }
 0x1d2   : > { %6425 = vmatprep.subr.msk.bf16.mxu0 %vm1827_vm5, %v2706_v62  ;;  %2533 = vmatprep.mubr.bf16.mxu0 %v6722_v4  ;;  %v2715_v62 = vsel %vm2704_vm7, %v7632_v61, %v7638_v58  ;;  %v2717_v58 = vsel %vm2704_vm7, %v7653_v60, %v7668_v8 }
 0x1d3   : > { %5751 = vrot.lane.b32.xlu0 %v7478_v37, %s6725_s5  ;;  %6419 = vmatmul.mubr.msk.bf16.vlgmr.msra.gmra.mrb[24].mxu1 %vm1823_vm6, %v7557_v44  ;;  %v2699_v30 = vpop.permute.xlu1 %2698  ;;  %v2755_v52 = vsel %vm1827_vm5, %v2715_v62, 0  ;;  %v2761_v1 = vsel %vm1827_vm5, %v2717_v58, 0 }
 0x1d4   : > { %2543 = vmatpush1.bf16.msra.mxu1 %v2250_v56  ;;  %2574 = vmatprep.mubr.bf16.mxu1 %v6722_v4  ;;  %v2718_v53 = vsel %vm2704_vm7, %v7668_v8, %v2699_v30 }
 0x1d5   : > { %5753 = vrot.lane.b32.xlu1 %v7484_v41, %s6725_s5  ;;  %6427 = vmatprep.subr.msk.bf16.mxu1 %vm1827_vm5, %v2708_v0  ;;  %v2701_v32 = vpop.permute.xlu0 %2700 }
 0x1d7   : > { %5755 = vrot.lane.b32.xlu0 %v7492_v54, %s6725_s5  ;;  %v2703_v40 = vpop.permute.xlu1 %2702 }
 0x1d8   : > { %6421 = vmatmul.mubr.msk.bf16.vlgmr.msra.gmra.mrb[28].mxu0 %vm1823_vm6, %v7557_v44  ;;  %v2720_v61 = vsel %vm2704_vm7, %v2701_v32, %v2703_v40 }
 0x1d9   : > { %5757 = vrot.lane.b32.xlu1 %v7499_v55, %s6725_s5  ;;  %2773 = vmatpush1.bf16.msra.mxu0 %v2725_v59  ;;  %v7716_v43 = vpop.permute.xlu0 %3676  ;;  %v2719_v59 = vsel %vm2704_vm7, %v2699_v30, %v2701_v32 }
 0x1da   : > { %6429 = vmatprep.subr.msk.bf16.mxu0 %vm1827_vm5, %v2710_v9  ;;  %2804 = vmatprep.mubr.bf16.mxu0 %v6722_v4  ;;  %v2767_v60 = vsel %vm1827_vm5, %v2719_v59, 0 }
 0x1db   : > { %5759 = vrot.lane.b32.xlu0 %v7515_v14, %s6725_s5  ;;  %6423 = vmatmul.mubr.msk.bf16.vlgmr.msra.gmra.mrb[28].mxu1 %vm1823_vm6, %v7557_v44  ;;  %v2737_v44 = vsel %vm1827_vm5, %v2709_v33, 0  ;;  %v7734_v39 = vpop.permute.xlu1 %3678 }
 0x1dc   : > { %2814 = vmatpush1.bf16.msra.mxu1 %v2731_v22  ;;  %2845 = vmatprep.mubr.bf16.mxu1 %v6722_v4 }
 0x1dd   : > { %5761 = vrot.lane.b32.xlu1 %v7521_v15, %s6725_s5  ;;  %6431 = vmatprep.subr.msk.bf16.mxu1 %vm1827_vm5, %v2712_v25  ;;  %v7739_v47 = vpop.permute.xlu0 %3680 }
 0x1de   : > { %v3711_v25 = vsel %vm1806_vm4, %v7734_v39, %v7739_v47 }
 0x1df   : > { %5763 = vrot.lane.b32.xlu0 %v7538_v28, %s6725_s5  ;;  %v7756_v56 = vpop.permute.xlu1 %3686 }
 0x1e0   : > { %6426 = vmatmul.mubr.msk.bf16.vlgmr.msra.gmra.mrb[32].mxu0 %vm1823_vm6, %v7703_v34 }
 0x1e1   : > { %5765 = vrot.lane.b32.xlu1 %v7547_v27, %s6725_s5  ;;  %2855 = vmatpush1.bf16.msra.mxu0 %v2737_v44  ;;  %v7767_v0 = vpop.permute.xlu0 %3684 }
 0x1e2   : > { %6433 = vmatprep.subr.msk.bf16.mxu0 %vm1827_vm5, %v2714_v29  ;;  %2886 = vmatprep.mubr.bf16.mxu0 %v6722_v4 }
 0x1e3   : > { %5767 = vrot.lane.b32.xlu0 %v7564_v35, %s6725_s5  ;;  %6428 = vmatmul.mubr.msk.bf16.vlgmr.msra.gmra.mrb[32].mxu1 %vm1823_vm6, %v7703_v34  ;;  %v7776_v20 = vpop.permute.xlu1 %3682 }
 0x1e4   : > { %2896 = vmatpush1.bf16.msra.mxu1 %v2743_v38  ;;  %2927 = vmatprep.mubr.bf16.mxu1 %v6722_v4 }
 0x1e5   : > { %5769 = vrot.lane.b32.xlu1 %v7569_v36, %s6725_s5  ;;  %6435 = vmatprep.subr.msk.bf16.mxu1 %vm1827_vm5, %v2716_v45  ;;  %v3714_v45 = vsel %vm1806_vm4, %v7767_v0, %v7756_v56 }
 0x1e7   : > { %5771 = vrot.lane.b32.xlu0 %v7586_v46, %s6725_s5  ;;  %v7789_v8 = vpop.permute.xlu1 %3694 }
 0x1e8   : > { %6430 = vmatmul.mubr.msk.bf16.vlgmr.msra.gmra.mrb[36].mxu0 %vm1823_vm6, %v7703_v34 }
 0x1e9   : > { %5773 = vrot.lane.b32.xlu1 %v7595_v48, %s6725_s5  ;;  %2937 = vmatpush1.bf16.msra.mxu0 %v2749_v50 }
 0x1ea   : > { %6437 = vmatprep.subr.msk.bf16.mxu0 %vm1827_vm5, %v2718_v53  ;;  %2968 = vmatprep.mubr.bf16.mxu0 %v6722_v4 }
 0x1eb   : > { %5775 = vrot.lane.b32.xlu0 %v7608_v57, %s6725_s5  ;;  %6432 = vmatmul.mubr.msk.bf16.vlgmr.msra.gmra.mrb[36].mxu1 %vm1823_vm6, %v7703_v34  ;;  %v7805_v30 = vpop.permute.xlu1 %3690 }
 0x1ec   : > { %2978 = vmatpush1.bf16.msra.mxu1 %v2755_v52  ;;  %3009 = vmatprep.mubr.bf16.mxu1 %v6722_v4 }
 0x1ed   : > { %5777 = vrot.lane.b32.xlu1 %v7612_v6, %s6725_s5  ;;  %6439 = vmatprep.subr.msk.bf16.mxu1 %vm1827_vm5, %v2720_v61  ;;  %v7782_v6 = vpop.permute.xlu0 %3688 }
 0x1ee   : > { %v3715_v42 = vsel %vm1806_vm4, %v7756_v56, %v7782_v6  ;;  %v3716_v50 = vsel %vm1806_vm4, %v7782_v6, %v7805_v30 }
 0x1ef   : > { %v3748_v52 = vsel %vm1827_vm5, %v3716_v50, 0 }
 0x1f0   : > { %6434 = vmatmul.mubr.msk.bf16.vlgmr.msra.gmra.mrb[40].mxu0 %vm1823_vm6, %v7703_v34 }
 0x1f1   : > { %3019 = vmatpush1.bf16.msra.mxu0 %v2761_v1  ;;  %3050 = vmatprep.mubr.bf16.mxu0 %v6722_v4  ;;  %v7795_v9 = vpop.permute.xlu0 %3692 }
 0x1f2   : > { %6441 = vmatprep.subr.msk.bf16.mxu0 %vm1827_vm5, %v7305_v2  ;;  %v3198_v2 = vsel %vm1827_vm5, %v7300_v63, 0  ;;  %v3121_v63 = vld [vmem:[#allocation6 + $0x6] sm:$0x3]  ;;  %v3717_v38 = vsel %vm1806_vm4, %v7805_v30, %v7795_v9  ;;  %v3718_v58 = vsel %vm1806_vm4, %v7795_v9, %v7789_v8 }
 0x1f3   : > { %6436 = vmatmul.mubr.msk.bf16.vlgmr.msra.gmra.mrb[40].mxu1 %vm1823_vm6, %v7703_v34  ;;  %v3754_v1 = vsel %vm1827_vm5, %v3718_v58, 0 }
 0x1f4   : > { %3060 = vmatpush1.bf16.msra.mxu1 %v2767_v60  ;;  %3091 = vmatprep.mubr.bf16.mxu1 %v6722_v4 }
 0x1f5   : > { %6443 = vmatprep.subr.msk.bf16.mxu1 %vm1827_vm5, %v7327_v10  ;;  %v3204_v10 = vsel %vm1827_vm5, %v7315_v5, 0  ;;  %v7809_v22 = vpop.permute.xlu0 %3696  ;;  %v7817_v5 = vpop.permute.xlu1 %3702 }
 0x1f6   : > { %v3719_v62 = vsel %vm1806_vm4, %v7789_v8, %v7809_v22 }
 0x1f8   : > { %6438 = vmatmul.mubr.msk.bf16.vlgmr.msra.gmra.mrb[44].mxu0 %vm1823_vm6, %v7703_v34 }
 0x1f9   : > { %3246 = vmatpush1.bf16.msra.mxu0 %v3198_v2  ;;  %3277 = vmatprep.mubr.bf16.mxu0 %v6722_v4  ;;  %v7823_v32 = vpop.permute.xlu0 %3700 }
 0x1fa   : > { %6445 = vmatprep.subr.msk.bf16.mxu0 %vm1827_vm5, %v7319_v7  ;;  %v3210_v7 = vsel %vm1827_vm5, %v7310_v3, 0  ;;  %v3222_v3 = vsel %vm1827_vm5, %v7332_v11, 0  ;;  %v3722_v2 = vsel %vm1806_vm4, %v7823_v32, %v7817_v5 }
 0x1fb   : > { %6440 = vmatmul.mubr.msk.bf16.vlgmr.msra.gmra.mrb[44].mxu1 %vm1823_vm6, %v7703_v34  ;;  %v3766_v30 = vsel %vm1827_vm5, %v3722_v2, 0 }
 0x1fc   : > { %3287 = vmatpush1.bf16.msra.mxu1 %v3204_v10  ;;  %3318 = vmatprep.mubr.bf16.mxu1 %v6722_v4 }
 0x1fd   : > { %6447 = vmatprep.subr.msk.bf16.mxu1 %vm1827_vm5, %v7349_v17  ;;  %v3216_v17 = vsel %vm1827_vm5, %v7337_v12, 0  ;;  %v7835_v12 = vpop.permute.xlu0 %3704 }
 0x200   : > { %6442 = vmatmul.mubr.msk.bf16.vlgmr.msra.gmra.mrb[48].mxu0 %vm1823_vm6, %v3121_v63 }
 0x201   : > { %3328 = vmatpush1.bf16.msra.mxu0 %v3210_v7  ;;  %3359 = vmatprep.mubr.bf16.mxu0 %v6722_v4  ;;  %v3709_v33 = vpop.permute.xlu0 %3708 }
 0x202   : > { %6449 = vmatprep.subr.msk.bf16.mxu0 %vm1827_vm5, %v7341_v13  ;;  %v7830_v13 = vpop.permute.xlu1 %3698 }
 0x203   : > { %6444 = vmatmul.mubr.msk.bf16.vlgmr.msra.gmra.mrb[48].mxu1 %vm1823_vm6, %v3121_v63  ;;  %v3721_v61 = vsel %vm1806_vm4, %v7830_v13, %v7823_v32  ;;  %v3720_v59 = vsel %vm1806_vm4, %v7809_v22, %v7830_v13 }
 0x204   : > { %3369 = vmatpush1.bf16.msra.mxu1 %v3216_v17  ;;  %3400 = vmatprep.mubr.bf16.mxu1 %v6722_v4  ;;  %v3760_v6 = vsel %vm1827_vm5, %v3720_v59, 0 }
 0x205   : > { %6451 = vmatprep.subr.msk.bf16.mxu1 %vm1827_vm5, %v7372_v26  ;;  %v3228_v26 = vsel %vm1827_vm5, %v7359_v19, 0  ;;  %v3240_v19 = vsel %vm1827_vm5, %v7381_v31, 0  ;;  %v7864_v40 = vpop.permute.xlu0 %4210  ;;  %v3712_v31 = vsel %vm1806_vm4, %v7739_v47, %v7776_v20  ;;  %v3742_v47 = vsel %vm1827_vm5, %v3714_v45, 0 }
 0x206   : > { %v7843_v11 = vpop.permute.xlu1 %4208  ;;  %v3736_v29 = vsel %vm1827_vm5, %v3712_v31, 0 }
 0x207   : > { %v4242_v32 = vsel %vm2704_vm7, %v7843_v11, %v7864_v40 }
 0x208   : > { %6446 = vmatmul.mubr.msk.bf16.vlgmr.msra.gmra.mrb[52].mxu0 %vm1823_vm6, %v3121_v63  ;;  %v4262_v13 = vsel %vm1827_vm5, %v4242_v32, 0 }
 0x209   : > { %3410 = vmatpush1.bf16.msra.mxu0 %v3222_v3  ;;  %3441 = vmatprep.mubr.bf16.mxu0 %v6722_v4  ;;  %v4215_v49 = vpop.permute.xlu0 %4214 }
 0x20a   : > { %6453 = vmatprep.subr.msk.bf16.mxu0 %vm1827_vm5, %v7363_v21  ;;  %v3234_v21 = vsel %vm1827_vm5, %v7354_v18, 0  ;;  %v3710_v18 = vsel %vm1806_vm4, %v7716_v43, %v7734_v39  ;;  %v3707_v34 = vpop.permute.xlu1 %3706  ;;  %v3595_v39 = vld [vmem:[#allocation6 + $0x8] sm:$0x3] }
 0x20b   : > { %6448 = vmatmul.mubr.msk.bf16.vlgmr.msra.gmra.mrb[52].mxu1 %vm1823_vm6, %v3121_v63  ;;  %v3730_v44 = vsel %vm1827_vm5, %v3710_v18, 0  ;;  %v3725_v8 = vsel %vm1806_vm4, %v3707_v34, %v3709_v33 }
 0x20c   : > { %3451 = vmatpush1.bf16.msra.mxu1 %v3228_v26  ;;  %3482 = vmatprep.mubr.bf16.mxu1 %v6722_v4 }
 0x20d   : > { %6455 = vmatprep.subr.msk.bf16.mxu1 %vm1827_vm5, %v7398_v51  ;;  %v3713_v51 = vsel %vm1806_vm4, %v7776_v20, %v7767_v0  ;;  %v4219_v56 = vpop.permute.xlu0 %4218  ;;  %v3723_v20 = vsel %vm1806_vm4, %v7817_v5, %v7835_v12 }
 0x20e   : > { %v4213_v43 = vpop.permute.xlu1 %4212 }
 0x20f   : > { %v4243_v22 = vsel %vm2704_vm7, %v7864_v40, %v4213_v43 }
 0x210   : > { %6450 = vmatmul.mubr.msk.bf16.vlgmr.msra.gmra.mrb[56].mxu0 %vm1823_vm6, %v3121_v63 }
 0x211   : > { %3492 = vmatpush1.bf16.msra.mxu0 %v3234_v21  ;;  %3523 = vmatprep.mubr.bf16.mxu0 %v6722_v4  ;;  %v4223_v60 = vpop.permute.xlu0 %4222 }
 0x212   : > { %6458 = vmatprep.subr.msk.bf16.mxu0 %vm1827_vm5, %v3711_v25  ;;  %v4217_v53 = vpop.permute.xlu1 %4216 }
 0x213   : > { %6452 = vmatmul.mubr.msk.bf16.vlgmr.msra.gmra.mrb[56].mxu1 %vm1823_vm6, %v3121_v63  ;;  %v4245_v17 = vsel %vm2704_vm7, %v4215_v49, %v4217_v53 }
 0x214   : > { %3533 = vmatpush1.bf16.msra.mxu1 %v3240_v19  ;;  %3564 = vmatprep.mubr.bf16.mxu1 %v6722_v4  ;;  %v4246_v19 = vsel %vm2704_vm7, %v4217_v53, %v4219_v56 }
 0x215   : > { %6460 = vmatprep.subr.msk.bf16.mxu1 %vm1827_vm5, %v3713_v51  ;;  %v4227_v10 = vpop.permute.xlu0 %4226  ;;  %v4127_v51 = vld [vmem:[#allocation6 + $0xa] sm:$0x3] }
 0x216   : > { %v4221_v0 = vpop.permute.xlu1 %4220 }
 0x217   : > { %v4247_v26 = vsel %vm2704_vm7, %v4219_v56, %v4221_v0  ;;  %v4248_v40 = vsel %vm2704_vm7, %v4221_v0, %v4223_v60 }
 0x218   : > { %6454 = vmatmul.mubr.msk.bf16.vlgmr.msra.gmra.mrb[60].mxu0 %vm1823_vm6, %v3121_v63 }
 0x219   : > { %3778 = vmatpush1.bf16.msra.mxu0 %v3730_v44  ;;  %3809 = vmatprep.mubr.bf16.mxu0 %v6722_v4  ;;  %v4231_v3 = vpop.permute.xlu0 %4230 }
 0x21a   : > { %6462 = vmatprep.subr.msk.bf16.mxu0 %vm1827_vm5, %v3715_v42  ;;  %v4225_v9 = vpop.permute.xlu1 %4224  ;;  %v4280_v42 = vsel %vm1827_vm5, %v4248_v40, 0 }
 0x21b   : > { %6456 = vmatmul.mubr.msk.bf16.vlgmr.msra.gmra.mrb[60].mxu1 %vm1823_vm6, %v3121_v63  ;;  %v3724_v63 = vsel %vm1806_vm4, %v7835_v12, %v3707_v34  ;;  %v4244_v12 = vsel %vm2704_vm7, %v4213_v43, %v4215_v49  ;;  %v4249_v33 = vsel %vm2704_vm7, %v4223_v60, %v4225_v9  ;;  %v4274_v34 = vsel %vm1827_vm5, %v4246_v19, 0 }
 0x21c   : > { %3819 = vmatpush1.bf16.msra.mxu1 %v3736_v29  ;;  %3850 = vmatprep.mubr.bf16.mxu1 %v6722_v4  ;;  %v3772_v7 = vsel %vm1827_vm5, %v3724_v63, 0  ;;  %v4268_v25 = vsel %vm1827_vm5, %v4244_v12, 0  ;;  %v4250_v43 = vsel %vm2704_vm7, %v4225_v9, %v4227_v10  ;;  %v4735_v60 = vsel %vm1827_vm5, %v7459_v16, 0 }
 0x21d   : > { %6464 = vmatprep.subr.msk.bf16.mxu1 %vm1827_vm5, %v3717_v38  ;;  %v4235_v11 = vpop.permute.xlu0 %4234  ;;  %v4286_v49 = vsel %vm1827_vm5, %v4250_v43, 0 }
 0x21e   : > { %v4229_v5 = vpop.permute.xlu1 %4228 }
 0x21f   : > { %v4251_v44 = vsel %vm2704_vm7, %v4227_v10, %v4229_v5 }
 0x220   : > { %6459 = vmatmul.mubr.msk.bf16.vlgmr.msra.gmra.mrb[64].mxu0 %vm1823_vm6, %v3595_v39 }
 0x221   : > { %3860 = vmatpush1.bf16.msra.mxu0 %v3742_v47  ;;  %3891 = vmatprep.mubr.bf16.mxu0 %v6722_v4  ;;  %v4239_v31 = vpop.permute.xlu0 %4238 }
 0x222   : > { %6466 = vmatprep.subr.msk.bf16.mxu0 %vm1827_vm5, %v3719_v62  ;;  %v4233_v21 = vpop.permute.xlu1 %4232 }
 0x223   : > { %6461 = vmatmul.mubr.msk.bf16.vlgmr.msra.gmra.mrb[64].mxu1 %vm1823_vm6, %v3595_v39  ;;  %v4253_v29 = vsel %vm2704_vm7, %v4231_v3, %v4233_v21 }
 0x224   : > { %3901 = vmatpush1.bf16.msra.mxu1 %v3748_v52  ;;  %3932 = vmatprep.mubr.bf16.mxu1 %v6722_v4  ;;  %v4254_v52 = vsel %vm2704_vm7, %v4233_v21, %v4235_v11 }
 0x225   : > { %6468 = vmatprep.subr.msk.bf16.mxu1 %vm1827_vm5, %v3721_v61  ;;  %v7964_v45 = vpop.permute.xlu0 %5213  ;;  %v4298_v61 = vsel %vm1827_vm5, %v4254_v52, 0 }
 0x226   : > { %v4237_v18 = vpop.permute.xlu1 %4236 }
 0x227   : > { %v4255_v47 = vsel %vm2704_vm7, %v4235_v11, %v4237_v18  ;;  %v4256_v58 = vsel %vm2704_vm7, %v4237_v18, %v4239_v31 }
 0x228   : > { %6463 = vmatmul.mubr.msk.bf16.vlgmr.msra.gmra.mrb[68].mxu0 %vm1823_vm6, %v3595_v39 }
 0x229   : > { %3942 = vmatpush1.bf16.msra.mxu0 %v3754_v1  ;;  %3973 = vmatprep.mubr.bf16.mxu0 %v6722_v4  ;;  %v7979_v56 = vpop.permute.xlu0 %5217  ;;  %v4304_v1 = vsel %vm1827_vm5, %v4256_v58, 0 }
 0x22a   : > { %6470 = vmatprep.subr.msk.bf16.mxu0 %vm1827_vm5, %v3723_v20  ;;  %v4241_v38 = vpop.permute.xlu1 %4240 }
 0x22b   : > { %6465 = vmatmul.mubr.msk.bf16.vlgmr.msra.gmra.mrb[68].mxu1 %vm1823_vm6, %v3595_v39  ;;  %v4257_v53 = vsel %vm2704_vm7, %v4239_v31, %v4241_v38 }
 0x22c   : > { %3983 = vmatpush1.bf16.msra.mxu1 %v3760_v6  ;;  %4014 = vmatprep.mubr.bf16.mxu1 %v6722_v4 }
 0x22d   : > { %6472 = vmatprep.subr.msk.bf16.mxu1 %vm1827_vm5, %v3725_v8  ;;  %v7991_v59 = vpop.permute.xlu0 %5221 }
 0x22e   : > { %v7973_v62 = vpop.permute.xlu1 %5215 }
 0x22f   : > { %v5247_v18 = vsel %vm1806_vm4, %v7964_v45, %v7973_v62 }
 0x230   : > { %6467 = vmatmul.mubr.msk.bf16.vlgmr.msra.gmra.mrb[72].mxu0 %vm1823_vm6, %v3595_v39  ;;  %v5267_v31 = vsel %vm1827_vm5, %v5247_v18, 0 }
 0x231   : > { %4024 = vmatpush1.bf16.msra.mxu0 %v3766_v30  ;;  %4055 = vmatprep.mubr.bf16.mxu0 %v6722_v4 }
 0x232   : > { %6475 = vmatprep.subr.msk.bf16.mxu0 %vm1827_vm5, %v4243_v22  ;;  %v7985_v0 = vpop.permute.xlu1 %5219 }
 0x233   : > { %6469 = vmatmul.mubr.msk.bf16.vlgmr.msra.gmra.mrb[72].mxu1 %vm1823_vm6, %v3595_v39  ;;  %v5250_v19 = vsel %vm1806_vm4, %v7985_v0, %v7991_v59 }
 0x234   : > { %4065 = vmatpush1.bf16.msra.mxu1 %v3772_v7  ;;  %4096 = vmatprep.mubr.bf16.mxu1 %v6722_v4  ;;  %v4747_v7 = vsel %vm1827_vm5, %v7484_v41, 0 }
 0x235   : > { %6477 = vmatprep.subr.msk.bf16.mxu1 %vm1827_vm5, %v4245_v17  ;;  %v4753_v17 = vsel %vm1827_vm5, %v7499_v55, 0 }
 0x236   : > { %v7997_v20 = vpop.permute.xlu1 %5223 }
 0x238   : > { %6471 = vmatmul.mubr.msk.bf16.vlgmr.msra.gmra.mrb[76].mxu0 %vm1823_vm6, %v3595_v39 }
 0x239   : > { %4310 = vmatpush1.bf16.msra.mxu0 %v4262_v13  ;;  %4341 = vmatprep.mubr.bf16.mxu0 %v6722_v4  ;;  %v4759_v13 = vsel %vm1827_vm5, %v7521_v15, 0 }
 0x23a   : > { %6479 = vmatprep.subr.msk.bf16.mxu0 %vm1827_vm5, %v4247_v26  ;;  %v8019_v9 = vpop.permute.xlu1 %5227 }
 0x23b   : > { %6473 = vmatmul.mubr.msk.bf16.vlgmr.msra.gmra.mrb[76].mxu1 %vm1823_vm6, %v3595_v39  ;;  %v4252_v39 = vsel %vm2704_vm7, %v4229_v5, %v4231_v3 }
 0x23c   : > { %4351 = vmatpush1.bf16.msra.mxu1 %v4268_v25  ;;  %4382 = vmatprep.mubr.bf16.mxu1 %v6722_v4  ;;  %v4292_v50 = vsel %vm1827_vm5, %v4252_v39, 0  ;;  %v5251_v39 = vsel %vm1806_vm4, %v7991_v59, %v7997_v20 }
 0x23d   : > { %6481 = vmatprep.subr.msk.bf16.mxu1 %vm1827_vm5, %v4249_v33  ;;  %v4777_v33 = vsel %vm1827_vm5, %v7595_v48, 0 }
 0x23e   : > { %v8036_v5 = vpop.permute.xlu1 %5231 }
 0x240   : > { %6476 = vmatmul.mubr.msk.bf16.vlgmr.msra.gmra.mrb[80].mxu0 %vm1823_vm6, %v4127_v51 }
 0x241   : > { %4392 = vmatpush1.bf16.msra.mxu0 %v4274_v34  ;;  %4423 = vmatprep.mubr.bf16.mxu0 %v6722_v4 }
 0x242   : > { %6483 = vmatprep.subr.msk.bf16.mxu0 %vm1827_vm5, %v4251_v44  ;;  %v8053_v12 = vpop.permute.xlu1 %5235 }
 0x243   : > { %6478 = vmatmul.mubr.msk.bf16.vlgmr.msra.gmra.mrb[80].mxu1 %vm1823_vm6, %v4127_v51 }
 0x244   : > { %4433 = vmatpush1.bf16.msra.mxu1 %v4280_v42  ;;  %4464 = vmatprep.mubr.bf16.mxu1 %v6722_v4  ;;  %v5249_v42 = vsel %vm1806_vm4, %v7979_v56, %v7985_v0 }
 0x245   : > { %6485 = vmatprep.subr.msk.bf16.mxu1 %vm1827_vm5, %v4253_v29  ;;  %v6190_v29 = vld [vmem:[%s8442_s2] sm:$0xf]  ;;  %v5273_v38 = vsel %vm1827_vm5, %v5249_v42, 0 }
 0x246   : > { %v8069_v26 = vpop.permute.xlu1 %5239  ;;  %6193 = vperm.xlu0 %6604, %v6190_v29  }
 0x248   : > { %6480 = vmatmul.mubr.msk.bf16.vlgmr.msra.gmra.mrb[84].mxu0 %vm1823_vm6, %v4127_v51 }
 0x249   : > { %4474 = vmatpush1.bf16.msra.mxu0 %v4286_v49  ;;  %4505 = vmatprep.mubr.bf16.mxu0 %v6722_v4 }
 0x24a   : > { %6487 = vmatprep.subr.msk.bf16.mxu0 %vm1827_vm5, %v4255_v47  ;;  %v8099_v34 = vpop.permute.xlu1 %5243 }
 0x24b   : > { %6482 = vmatmul.mubr.msk.bf16.vlgmr.msra.gmra.mrb[84].mxu1 %vm1823_vm6, %v4127_v51 }
 0x24c   : > { %4515 = vmatpush1.bf16.msra.mxu1 %v4292_v50  ;;  %4546 = vmatprep.mubr.bf16.mxu1 %v6722_v4  ;;  %v8131_v50 = vld [vmem:[#allocation6 + $0xe] sm:$0x3] }
 0x24d   : > { %6489 = vmatprep.subr.msk.bf16.mxu1 %vm1827_vm5, %v4257_v53 }
 0x24e   : > { %v8117_v45 = vpop.permute.xlu1 %5745 }
 0x250   : > { %6484 = vmatmul.mubr.msk.bf16.vlgmr.msra.gmra.mrb[88].mxu0 %vm1823_vm6, %v4127_v51 }
 0x251   : > { %4556 = vmatpush1.bf16.msra.mxu0 %v4298_v61  ;;  %4587 = vmatprep.mubr.bf16.mxu0 %v6722_v4 }
 0x252   : > { %6491 = vmatprep.subr.msk.bf16.mxu0 %vm1827_vm5, %v7464_v23  ;;  %v8002_v23 = vpop.permute.xlu0 %5225 }
 0x253   : > { %6486 = vmatmul.mubr.msk.bf16.vlgmr.msra.gmra.mrb[88].mxu1 %vm1823_vm6, %v4127_v51  ;;  %v5252_v43 = vsel %vm1806_vm4, %v7997_v20, %v8002_v23  ;;  %v5253_v53 = vsel %vm1806_vm4, %v8002_v23, %v8019_v9 }
 0x254   : > { %4597 = vmatpush1.bf16.msra.mxu1 %v4304_v1  ;;  %4628 = vmatprep.mubr.bf16.mxu1 %v6722_v4  ;;  %v5285_v61 = vsel %vm1827_vm5, %v5253_v53, 0 }
 0x255   : > { %6493 = vmatprep.subr.msk.bf16.mxu1 %vm1827_vm5, %v7478_v37  ;;  %v4741_v37 = vsel %vm1827_vm5, %v7469_v24, 0 }
 0x256   : > { %v8025_v24 = vpop.permute.xlu0 %5229 }
 0x257   : > { %v5254_v49 = vsel %vm1806_vm4, %v8019_v9, %v8025_v24  ;;  %v5255_v1 = vsel %vm1806_vm4, %v8025_v24, %v8036_v5 }
 0x258   : > { %6488 = vmatmul.mubr.msk.bf16.vlgmr.msra.gmra.mrb[92].mxu0 %vm1823_vm6, %v4127_v51  ;;  %v5291_v23 = vsel %vm1827_vm5, %v5255_v1, 0 }
 0x259   : > { %4783 = vmatpush1.bf16.msra.mxu0 %v4735_v60  ;;  %4814 = vmatprep.mubr.bf16.mxu0 %v6722_v4 }
 0x25a   : > { %6495 = vmatprep.subr.msk.bf16.mxu0 %vm1827_vm5, %v7492_v54  ;;  %v8007_v6 = vpop.f32.mrb[0].mxu0  ;;  %v8023_v54 = vld [vmem:[#allocation6 + $0xc] sm:$0x3]  ;;  %v8045_v3 = vpop.permute.xlu0 %5233 }
 0x25b   : > { %6490 = vmatmul.mubr.msk.bf16.vlgmr.msra.gmra.mrb[92].mxu1 %vm1823_vm6, %v4127_v51  ;;  %v8012_v8 = vpop.f32.mrb[0].mxu1  ;;  %v8015_v16 = vpop.f32.mrb[1].mxu0  ;;  %v5256_v52 = vsel %vm1806_vm4, %v8036_v5, %v8045_v3 }
 0x25c   : > { %4824 = vmatpush1.bf16.msra.mxu1 %v4741_v37  ;;  %4855 = vmatprep.mubr.bf16.mxu1 %v6722_v4  ;;  %v8017_v2 = vpop.f32.mrb[1].mxu1  ;;  %v1914_v10 = vpop.f32.mrb[2].mxu0  ;;  %v5257_v37 = vsel %vm1806_vm4, %v8045_v3, %v8053_v12 }
 0x25d   : > { %6497 = vmatprep.subr.msk.bf16.mxu1 %vm1827_vm5, %v7515_v14  ;;  %v1955_v30 = vpop.f32.mrb[2].mxu1  ;;  %v1915_v63 = vpop.f32.mrb[3].mxu0 }
 0x25e   : > { %v1956_v22 = vpop.f32.mrb[3].mxu1  ;;  %v8058_v55 = vpop.permute.xlu0 %5237  ;;  %v5297_v63 = vsel %vm1827_vm5, %v5257_v37, 0 }
 0x25f   : > { %v5258_v0 = vsel %vm1806_vm4, %v8053_v12, %v8058_v55  ;;  %v5259_v5 = vsel %vm1806_vm4, %v8058_v55, %v8069_v26 }
 0x260   : > { %6492 = vmatmul.mubr.msk.bf16.vlgmr.msra.gmra.mrb[96].mxu0 %vm1823_vm6, %v8023_v54 }
 0x261   : > { %4865 = vmatpush1.bf16.msra.mxu0 %v4747_v7  ;;  %4896 = vmatprep.mubr.bf16.mxu0 %v6722_v4 }
 0x262   : > { %6499 = vmatprep.subr.msk.bf16.mxu0 %vm1827_vm5, %v7538_v28  ;;  %v8034_v14 = vpop.f32.mrb[4].mxu0  ;;  %v8080_v11 = vpop.permute.xlu0 %5241 }
 0x263   : > { %6494 = vmatmul.mubr.msk.bf16.vlgmr.msra.gmra.mrb[96].mxu1 %vm1823_vm6, %v8023_v54  ;;  %v8042_v32 = vpop.f32.mrb[5].mxu0 }
 0x264   : > { %4906 = vmatpush1.bf16.msra.mxu1 %v4753_v17  ;;  %4937 = vmatprep.mubr.bf16.mxu1 %v6722_v4  ;;  %v1996_v41 = vpop.f32.mrb[6].mxu0 }
 0x265   : > { %6501 = vmatprep.subr.msk.bf16.mxu1 %vm1827_vm5, %v7564_v35  ;;  %v1997_v28 = vpop.f32.mrb[7].mxu0  ;;  %v4765_v35 = vsel %vm1827_vm5, %v7547_v27, 0  ;;  %v5248_v27 = vsel %vm1806_vm4, %v7973_v62, %v7979_v56  ;;  %v5279_v62 = vsel %vm1827_vm5, %v5251_v39, 0  ;;  %v8142_v56 = vpop.permute.xlu1 %5749 }
 0x266   : > { %v5246_v44 = vpop.permute.xlu0 %5245 }
 0x267   : > { %v5262_v22 = vsel %vm1806_vm4, %v8099_v34, %v5246_v44 }
 0x268   : > { %6496 = vmatmul.mubr.msk.bf16.vlgmr.msra.gmra.mrb[100].mxu0 %vm1823_vm6, %v8023_v54 }
 0x269   : > { %4947 = vmatpush1.bf16.msra.mxu0 %v4759_v13  ;;  %4978 = vmatprep.mubr.bf16.mxu0 %v6722_v4  ;;  %v8161_v20 = vpop.permute.xlu1 %5753 }
 0x26a   : > { %6503 = vmatprep.subr.msk.bf16.mxu0 %vm1827_vm5, %v7586_v46  ;;  %v4771_v46 = vsel %vm1827_vm5, %v7569_v36, 0  ;;  %v8128_v47 = vpop.permute.xlu0 %5747 }
 0x26b   : > { %6498 = vmatmul.mubr.msk.bf16.vlgmr.msra.gmra.mrb[100].mxu1 %vm1823_vm6, %v8023_v54  ;;  %v5780_v55 = vsel %vm2704_vm7, %v8128_v47, %v8142_v56 }
 0x26c   : > { %4988 = vmatpush1.bf16.msra.mxu1 %v4765_v35  ;;  %5019 = vmatprep.mubr.bf16.mxu1 %v6722_v4  ;;  %v5303_v35 = vsel %vm1827_vm5, %v5259_v5, 0 }
 0x26d   : > { %6505 = vmatprep.subr.msk.bf16.mxu1 %vm1827_vm5, %v7608_v57  ;;  %v8191_v17 = vpop.permute.xlu1 %5757 }
 0x26e   : > { %v8067_v15 = vpop.f32.mrb[4].mxu1  ;;  %v8147_v58 = vpop.permute.xlu0 %5751 }
 0x26f   : > { %v8071_v21 = vpop.f32.mrb[5].mxu1 }
 0x270   : > { %6500 = vmatmul.mubr.msk.bf16.vlgmr.msra.gmra.mrb[104].mxu0 %vm1823_vm6, %v8023_v54  ;;  %v2037_v25 = vpop.f32.mrb[6].mxu1 }
 0x271   : > { %5029 = vmatpush1.bf16.msra.mxu0 %v4771_v46  ;;  %5060 = vmatprep.mubr.bf16.mxu0 %v6722_v4  ;;  %v2038_v57 = vpop.f32.mrb[7].mxu1  ;;  %v5261_v46 = vsel %vm1806_vm4, %v8080_v11, %v8099_v34  ;;  %v5779_v34 = vsel %vm2704_vm7, %v8117_v45, %v8128_v47 }
 0x272   : > { %6508 = vmatprep.subr.msk.bf16.mxu0 %vm1827_vm5, %v5248_v27  ;;  %v8174_v10 = vpop.permute.xlu0 %5755  ;;  %v5309_v27 = vsel %vm1827_vm5, %v5261_v46, 0  ;;  %v8210_v57 = vpop.permute.xlu1 %5761 }
 0x273   : > { %6502 = vmatmul.mubr.msk.bf16.vlgmr.msra.gmra.mrb[104].mxu1 %vm1823_vm6, %v8023_v54  ;;  %v8088_v36 = vpop.f32.mrb[8].mxu0 }
 0x274   : > { %5070 = vmatpush1.bf16.msra.mxu1 %v4777_v33  ;;  %5101 = vmatprep.mubr.bf16.mxu1 %v6722_v4  ;;  %v8094_v51 = vpop.f32.mrb[9].mxu0  ;;  %v5782_v33 = vsel %vm2704_vm7, %v8147_v58, %v8161_v20 }
 0x275   : > { %6510 = vmatprep.subr.msk.bf16.mxu1 %vm1827_vm5, %v5250_v19  ;;  %v2078_v48 = vpop.f32.mrb[10].mxu0 }
 0x276   : > { %v2079_v40 = vpop.f32.mrb[11].mxu0  ;;  %v5760_v13 = vpop.permute.xlu0 %5759 }
 0x278   : > { %6504 = vmatmul.mubr.msk.bf16.vlgmr.msra.gmra.mrb[108].mxu0 %vm1823_vm6, %v8023_v54 }
 0x279   : > { %5315 = vmatpush1.bf16.msra.mxu0 %v5267_v31  ;;  %5346 = vmatprep.mubr.bf16.mxu0 %v6722_v4 }
 0x27a   : > { %6512 = vmatprep.subr.msk.bf16.mxu0 %vm1827_vm5, %v5252_v43  ;;  %v5764_v48 = vpop.permute.xlu0 %5763  ;;  %v5799_v43 = vsel %vm1827_vm5, %v5779_v34, 0 }
 0x27b   : > { %6506 = vmatmul.mubr.msk.bf16.vlgmr.msra.gmra.mrb[108].mxu1 %vm1823_vm6, %v8023_v54  ;;  %v5260_v54 = vsel %vm1806_vm4, %v8069_v26, %v8080_v11 }
 0x27c   : > { %5356 = vmatpush1.bf16.msra.mxu1 %v5273_v38  ;;  %5387 = vmatprep.mubr.bf16.mxu1 %v6722_v4  ;;  %v5781_v38 = vsel %vm2704_vm7, %v8142_v56, %v8147_v58 }
 0x27d   : > { %6514 = vmatprep.subr.msk.bf16.mxu1 %vm1827_vm5, %v5254_v49  ;;  %v5805_v47 = vsel %vm1827_vm5, %v5781_v38, 0 }
 0x27e   : > { %v5768_v53 = vpop.permute.xlu0 %5767 }
 0x280   : > { %6509 = vmatmul.mubr.msk.bf16.vlgmr.msra.gmra.mrb[112].mxu0 %vm1823_vm6, %v8131_v50 }
 0x281   : > { %5397 = vmatpush1.bf16.msra.mxu0 %v5279_v62  ;;  %5428 = vmatprep.mubr.bf16.mxu0 %v6722_v4  ;;  %v5786_v62 = vsel %vm2704_vm7, %v5760_v13, %v8210_v57 }
 0x282   : > { %6516 = vmatprep.subr.msk.bf16.mxu0 %vm1827_vm5, %v5256_v52 }
 0x283   : > { %6511 = vmatmul.mubr.msk.bf16.vlgmr.msra.gmra.mrb[112].mxu1 %vm1823_vm6, %v8131_v50 }
 0x284   : > { %5438 = vmatpush1.bf16.msra.mxu1 %v5285_v61  ;;  %5469 = vmatprep.mubr.bf16.mxu1 %v6722_v4  ;;  %v5783_v61 = vsel %vm2704_vm7, %v8161_v20, %v8174_v10  ;;  %v5785_v20 = vsel %vm2704_vm7, %v8191_v17, %v5760_v13 }
 0x285   : > { %6518 = vmatprep.subr.msk.bf16.mxu1 %vm1827_vm5, %v5258_v0  ;;  %v8261_v0 = vld [vmem:[#allocation6 + $0x10] sm:$0x3] }
 0x286   : > { %v8159_v59 = vpop.f32.mrb[8].mxu1 }
 0x287   : > { %v8163_v60 = vpop.f32.mrb[9].mxu1 }
 0x288   : > { %v2119_v9 = vpop.f32.mrb[10].mxu1  ;;  %6513 = vmatmul.mubr.msk.bf16.vlgmr.msra.gmra.mrb[116].mxu0 %vm1823_vm6, %v8131_v50 }
 0x289   : > { %v2120_v30 = vpop.f32.mrb[11].mxu1  ;;  %5479 = vmatpush1.bf16.msra.mxu0 %v5291_v23  ;;  %5510 = vmatprep.mubr.bf16.mxu0 %v6722_v4 }
 0x28a   : > { %6520 = vmatprep.subr.msk.bf16.mxu0 %vm1827_vm5, %v5260_v54  ;;  %v5811_v54 = vsel %vm1827_vm5, %v5783_v61, 0 }
 0x28b   : > { %6515 = vmatmul.mubr.msk.bf16.vlgmr.msra.gmra.mrb[116].mxu1 %vm1823_vm6, %v8131_v50  ;;  %v8181_v24 = vpop.f32.mrb[12].mxu0 }
 0x28c   : > { %5520 = vmatpush1.bf16.msra.mxu1 %v5297_v63  ;;  %v8185_v7 = vpop.f32.mrb[13].mxu0  ;;  %5551 = vmatprep.mubr.bf16.mxu1 %v6722_v4 }
 0x28d   : > { %6522 = vmatprep.subr.msk.bf16.mxu1 %vm1827_vm5, %v5262_v22  ;;  %v2160_v41 = vpop.f32.mrb[14].mxu0  ;;  %v5817_v22 = vsel %vm1827_vm5, %v5785_v20, 0 }
 0x28e   : > { %v8194_v3 = vpop.f32.mrb[12].mxu1  ;;  %v2161_v28 = vpop.f32.mrb[15].mxu0 }
 0x28f   : > { %v8196_v12 = vpop.f32.mrb[13].mxu1  ;;  %v5787_v28 = vsel %vm2704_vm7, %v8210_v57, %v5764_v48 }
 0x290   : > { %v2201_v25 = vpop.f32.mrb[14].mxu1  ;;  %6517 = vmatmul.mubr.msk.bf16.vlgmr.msra.gmra.mrb[120].mxu0 %vm1823_vm6, %v8131_v50 }
 0x291   : > { %v2202_v26 = vpop.f32.mrb[15].mxu1  ;;  %5561 = vmatpush1.bf16.msra.mxu0 %v5303_v35  ;;  %5592 = vmatprep.mubr.bf16.mxu0 %v6722_v4 }
 0x292   : > { %6525 = vmatprep.subr.msk.bf16.mxu0 %vm1827_vm5, %v5780_v55 }
 0x293   : > { %6519 = vmatmul.mubr.msk.bf16.vlgmr.msra.gmra.mrb[120].mxu1 %vm1823_vm6, %v8131_v50  ;;  %v2289_v11 = vpop.f32.mrb[16].mxu0 }
 0x294   : > { %5602 = vmatpush1.bf16.msra.mxu1 %v5309_v27  ;;  %v8218_v19 = vadd.f32 %v2289_v11, %v8007_v6  ;;  %v2291_v18 = vpop.f32.mrb[17].mxu0  ;;  %5633 = vmatprep.mubr.bf16.mxu1 %v6722_v4  ;;  %v5823_v27 = vsel %vm1827_vm5, %v5787_v28, 0 }
 0x295   : > { %6527 = vmatprep.subr.msk.bf16.mxu1 %vm1827_vm5, %v5782_v33  ;;  %v8226_v40 = vadd.f32 %v2291_v18, %v8015_v16  ;;  %v2293_v44 = vpop.f32.mrb[18].mxu0  ;;  %v5784_v16 = vsel %vm2704_vm7, %v8174_v10, %v8191_v17 }
 0x296   : > { %v2330_v31 = vpop.f32.mrb[16].mxu1  ;;  %v2294_v42 = vpop.f32.mrb[19].mxu0 }
 0x297   : > { %v8229_v29 = vadd.f32 %v2330_v31, %v8012_v8  ;;  %v2332_v6 = vpop.f32.mrb[17].mxu1  ;;  %v5766_v8 = vpop.permute.xlu1 %5765 }
 0x298   : > { %v8236_v45 = vadd.f32 %v2332_v6, %v8017_v2  ;;  %v2334_v49 = vpop.f32.mrb[18].mxu1  ;;  %6521 = vmatmul.mubr.msk.bf16.vlgmr.msra.gmra.mrb[124].mxu0 %vm1823_vm6, %v8131_v50  ;;  %v5788_v30 = vsel %vm2704_vm7, %v5764_v48, %v5766_v8  ;;  %v5789_v11 = vsel %vm2704_vm7, %v5766_v8, %v5768_v53 }
 0x299   : > { %v2335_v39 = vpop.f32.mrb[19].mxu1  ;;  %5847 = vmatpush1.bf16.msra.mxu0 %v5799_v43  ;;  %5878 = vmatprep.mubr.bf16.mxu0 %v6722_v4 }
 0x29a   : > { %6529 = vmatprep.subr.msk.bf16.mxu0 %vm1827_vm5, %v5784_v16 }
 0x29b   : > { %6523 = vmatmul.mubr.msk.bf16.vlgmr.msra.gmra.mrb[124].mxu1 %vm1823_vm6, %v8131_v50  ;;  %v2371_v2 = vpop.f32.mrb[20].mxu0  ;;  %v5770_v37 = vpop.permute.xlu1 %5769 }
 0x29c   : > { %5888 = vmatpush1.bf16.msra.mxu1 %v5805_v47  ;;  %v8251_v52 = vadd.f32 %v2371_v2, %v8034_v14  ;;  %v2373_v56 = vpop.f32.mrb[21].mxu0  ;;  %5919 = vmatprep.mubr.bf16.mxu1 %v6722_v4  ;;  %v5790_v5 = vsel %vm2704_vm7, %v5768_v53, %v5770_v37 }
 0x29d   : > { %6531 = vmatprep.subr.msk.bf16.mxu1 %vm1827_vm5, %v5786_v62  ;;  %v8259_v50 = vadd.f32 %v2373_v56, %v8042_v32  ;;  %v2375_v58 = vpop.f32.mrb[22].mxu0 }
 0x29e   : > { %v2412_v1 = vpop.f32.mrb[20].mxu1  ;;  %v2376_v23 = vpop.f32.mrb[23].mxu0 }
 0x29f   : > { %v8264_v14 = vadd.f32 %v2412_v1, %v8067_v15  ;;  %v2414_v9 = vpop.f32.mrb[21].mxu1  ;;  %v5772_v15 = vpop.permute.xlu0 %5771 }
 0x2a0   : > { %v8270_v10 = vadd.f32 %v2414_v9, %v8071_v21  ;;  %v2416_v32 = vpop.f32.mrb[22].mxu1  ;;  %6526 = vmatmul.mubr.msk.bf16.vlgmr.msra.gmra.mrb[128].mxu0 %vm1823_vm6, %v8261_v0  ;;  %v5774_v13 = vpop.permute.xlu1 %5773  ;;  %v5791_v6 = vsel %vm2704_vm7, %v5770_v37, %v5772_v15 }
 0x2a1   : > { %v2417_v63 = vpop.f32.mrb[23].mxu1  ;;  %5929 = vmatpush1.bf16.msra.mxu0 %v5811_v54  ;;  %5960 = vmatprep.mubr.bf16.mxu0 %v6722_v4  ;;  %v5835_v47 = vsel %vm1827_vm5, %v5791_v6, 0 }
 0x2a2   : > { %6533 = vmatprep.subr.msk.bf16.mxu0 %vm1827_vm5, %v5788_v30 }
 0x2a3   : > { %6528 = vmatmul.mubr.msk.bf16.vlgmr.msra.gmra.mrb[128].mxu1 %vm1823_vm6, %v8261_v0  ;;  %v2453_v21 = vpop.f32.mrb[24].mxu0  ;;  %v5776_v33 = vpop.permute.xlu0 %5775 }
 0x2a4   : > { %5970 = vmatpush1.bf16.msra.mxu1 %v5817_v22  ;;  %v8282_v17 = vadd.f32 %v2453_v21, %v8088_v36  ;;  %v2455_v41 = vpop.f32.mrb[25].mxu0  ;;  %6001 = vmatprep.mubr.bf16.mxu1 %v6722_v4  ;;  %v5778_v34 = vpop.permute.xlu1 %5777  ;;  %v5793_v2 = vsel %vm2704_vm7, %v5774_v13, %v5776_v33 }
 0x2a5   : > { %6535 = vmatprep.subr.msk.bf16.mxu1 %vm1827_vm5, %v5790_v5  ;;  %v8289_v35 = vadd.f32 %v2455_v41, %v8094_v51  ;;  %v2457_v46 = vpop.f32.mrb[26].mxu0  ;;  %v5792_v51 = vsel %vm2704_vm7, %v5772_v15, %v5774_v13  ;;  %v5794_v44 = vsel %vm2704_vm7, %v5776_v33, %v5778_v34 }
 0x2a6   : > { %v2494_v25 = vpop.f32.mrb[24].mxu1  ;;  %v2458_v55 = vpop.f32.mrb[27].mxu0 }
 0x2a7   : > { %v8292_v26 = vadd.f32 %v2494_v25, %v8159_v59  ;;  %v2496_v36 = vpop.f32.mrb[25].mxu1  ;;  %v5829_v59 = vsel %vm1827_vm5, %v5789_v11, 0 }
 0x2a8   : > { %v8297_v57 = vadd.f32 %v2496_v36, %v8163_v60  ;;  %v2498_v18 = vpop.f32.mrb[26].mxu1  ;;  %6530 = vmatmul.mubr.msk.bf16.vlgmr.msra.gmra.mrb[132].mxu0 %vm1823_vm6, %v8261_v0 }
 0x2a9   : > { %v2499_v48 = vpop.f32.mrb[27].mxu1  ;;  %6011 = vmatpush1.bf16.msra.mxu0 %v5823_v27  ;;  %6042 = vmatprep.mubr.bf16.mxu0 %v6722_v4 }
 0x2aa   : > { %6537 = vmatprep.subr.msk.bf16.mxu0 %vm1827_vm5, %v5792_v51 }
 0x2ab   : > { %6532 = vmatmul.mubr.msk.bf16.vlgmr.msra.gmra.mrb[132].mxu1 %vm1823_vm6, %v8261_v0  ;;  %v2535_v60 = vpop.f32.mrb[28].mxu0 }
 0x2ac   : > { %6052 = vmatpush1.bf16.msra.mxu1 %v5829_v59  ;;  %v2536_v31 = vadd.f32 %v2535_v60, %v8181_v24  ;;  %v2537_v42 = vpop.f32.mrb[29].mxu0  ;;  %6083 = vmatprep.mubr.bf16.mxu1 %v6722_v4 }
 0x2ad   : > { %6539 = vmatprep.subr.msk.bf16.mxu1 %vm1827_vm5, %v5794_v44  ;;  %v2538_v43 = vadd.f32 %v2537_v42, %v8185_v7  ;;  %v2539_v38 = vpop.f32.mrb[30].mxu0  ;;  %v5841_v7 = vsel %vm1827_vm5, %v5793_v2, 0 }
 0x2ae   : > { %v2576_v49 = vpop.f32.mrb[28].mxu1  ;;  %v2540_v16 = vpop.f32.mrb[31].mxu0 }
 0x2af   : > { %v2577_v8 = vadd.f32 %v2576_v49, %v8194_v3  ;;  %v2578_v39 = vpop.f32.mrb[29].mxu1 }
 0x2b0   : > { %v2579_v24 = vadd.f32 %v2578_v39, %v8196_v12  ;;  %v2580_v62 = vpop.f32.mrb[30].mxu1  ;;  %6534 = vmatmul.mubr.msk.bf16.vlgmr.msra.gmra.mrb[136].mxu0 %vm1823_vm6, %v8261_v0 }
 0x2b1   : > { %v2581_v53 = vpop.f32.mrb[31].mxu1  ;;  %6093 = vmatpush1.bf16.msra.mxu0 %v5835_v47  ;;  %6124 = vmatprep.mubr.bf16.mxu0 %v6722_v4 }
 0x2b3   : > { %6536 = vmatmul.mubr.msk.bf16.vlgmr.msra.gmra.mrb[136].mxu1 %vm1823_vm6, %v8261_v0  ;;  %v2806_v3 = vpop.f32.mrb[32].mxu0 }
 0x2b4   : > { %6134 = vmatpush1.bf16.msra.mxu1 %v5841_v7  ;;  %v3100_v56 = vadd.f32 %v2806_v3, %v8218_v19  ;;  %v2808_v61 = vpop.f32.mrb[33].mxu0  ;;  %6165 = vmatprep.mubr.bf16.mxu1 %v6722_v4 }
 0x2b5   : > { %v3101_v12 = vadd.f32 %v2808_v61, %v8226_v40  ;;  %v2810_v58 = vpop.f32.mrb[34].mxu0 }
 0x2b6   : > { %v2847_v1 = vpop.f32.mrb[32].mxu1  ;;  %v2811_v23 = vpop.f32.mrb[35].mxu0 }
 0x2b7   : > { %v3102_v37 = vadd.f32 %v2847_v1, %v8229_v29  ;;  %v2849_v9 = vpop.f32.mrb[33].mxu1 }
 0x2b8   : > { %v3103_v54 = vadd.f32 %v2849_v9, %v8236_v45  ;;  %v2851_v20 = vpop.f32.mrb[34].mxu1  ;;  %6538 = vmatmul.mubr.msk.bf16.vlgmr.msra.gmra.mrb[140].mxu0 %vm1823_vm6, %v8261_v0 }
 0x2b9   : > { %v2852_v32 = vpop.f32.mrb[35].mxu1 }
 0x2bb   : > { %6540 = vmatmul.mubr.msk.bf16.vlgmr.msra.gmra.mrb[140].mxu1 %vm1823_vm6, %v8261_v0  ;;  %v2888_v19 = vpop.f32.mrb[36].mxu0 }
 0x2bc   : > { %v3104_v4 = vadd.f32 %v2888_v19, %v8251_v52  ;;  %v2890_v40 = vpop.f32.mrb[37].mxu0 }
 0x2bd   : > { %v3105_v30 = vadd.f32 %v2890_v40, %v8259_v50  ;;  %v2892_v63 = vpop.f32.mrb[38].mxu0 }
 0x2be   : > { %v2929_v15 = vpop.f32.mrb[36].mxu1  ;;  %v2893_v29 = vpop.f32.mrb[39].mxu0 }
 0x2bf   : > { %v3106_v22 = vadd.f32 %v2929_v15, %v8264_v14  ;;  %v2931_v45 = vpop.f32.mrb[37].mxu1 }
 0x2c0   : > { %v3107_v21 = vadd.f32 %v2931_v45, %v8270_v10  ;;  %v2933_v5 = vpop.f32.mrb[38].mxu1 }
 0x2c1   : > { %v2934_v41 = vpop.f32.mrb[39].mxu1 }
 0x2c3   : > { %v2970_v28 = vpop.f32.mrb[40].mxu0 }
 0x2c4   : > { %v3108_v13 = vadd.f32 %v2970_v28, %v8282_v17  ;;  %v2972_v0 = vpop.f32.mrb[41].mxu0 }
 0x2c5   : > { %v3109_v46 = vadd.f32 %v2972_v0, %v8289_v35  ;;  %v2974_v52 = vpop.f32.mrb[42].mxu0 }
 0x2c6   : > { %v3011_v25 = vpop.f32.mrb[40].mxu1  ;;  %v2975_v55 = vpop.f32.mrb[43].mxu0 }
 0x2c7   : > { %v3110_v50 = vadd.f32 %v3011_v25, %v8292_v26  ;;  %v3013_v36 = vpop.f32.mrb[41].mxu1 }
 0x2c8   : > { %v3111_v27 = vadd.f32 %v3013_v36, %v8297_v57  ;;  %v3015_v14 = vpop.f32.mrb[42].mxu1 }
 0x2c9   : > { %v3016_v11 = vpop.f32.mrb[43].mxu1 }
 0x2cb   : > { %v3052_v33 = vpop.f32.mrb[44].mxu0 }
 0x2cc   : > { %v3112_v10 = vadd.f32 %v3052_v33, %v2536_v31  ;;  %v3054_v18 = vpop.f32.mrb[45].mxu0 }
 0x2cd   : > { %v3113_v51 = vadd.f32 %v3054_v18, %v2538_v43  ;;  %v3056_v34 = vpop.f32.mrb[46].mxu0 }
 0x2ce   : > { %v3093_v48 = vpop.f32.mrb[44].mxu1  ;;  %v3057_v17 = vpop.f32.mrb[47].mxu0 }
 0x2cf   : > { %v3114_v59 = vadd.f32 %v3093_v48, %v2577_v8  ;;  %v3095_v60 = vpop.f32.mrb[45].mxu1 }
 0x2d0   : > { %v3115_v35 = vadd.f32 %v3095_v60, %v2579_v24  ;;  %v3097_v44 = vpop.f32.mrb[46].mxu1 }
 0x2d1   : > { %v3098_v42 = vpop.f32.mrb[47].mxu1 }
 0x2d3   : > { %v3279_v6 = vpop.f32.mrb[48].mxu0 }
 0x2d4   : > { %v3573_v38 = vadd.f32 %v3279_v6, %v3100_v56  ;;  %v3281_v26 = vpop.f32.mrb[49].mxu0 }
 0x2d5   : > { %v3574_v49 = vadd.f32 %v3281_v26, %v3101_v12  ;;  %v3283_v16 = vpop.f32.mrb[50].mxu0 }
 0x2d6   : > { %v3320_v57 = vpop.f32.mrb[48].mxu1  ;;  %v3284_v39 = vpop.f32.mrb[51].mxu0 }
 0x2d7   : > { %v3575_v47 = vadd.f32 %v3320_v57, %v3102_v37  ;;  %v3322_v2 = vpop.f32.mrb[49].mxu1 }
 0x2d8   : > { %v3576_v31 = vadd.f32 %v3322_v2, %v3103_v54  ;;  %v3324_v62 = vpop.f32.mrb[50].mxu1 }
 0x2d9   : > { %v3325_v43 = vpop.f32.mrb[51].mxu1 }
 0x2db   : > { %v3361_v53 = vpop.f32.mrb[52].mxu0 }
 0x2dc   : > { %v3577_v7 = vadd.f32 %v3361_v53, %v3104_v4  ;;  %v3363_v3 = vpop.f32.mrb[53].mxu0 }
 0x2dd   : > { %v3578_v8 = vadd.f32 %v3363_v3, %v3105_v30  ;;  %v3365_v61 = vpop.f32.mrb[54].mxu0 }
 0x2de   : > { %v3402_v24 = vpop.f32.mrb[52].mxu1  ;;  %v3366_v58 = vpop.f32.mrb[55].mxu0 }
 0x2df   : > { %v3579_v1 = vadd.f32 %v3402_v24, %v3106_v22  ;;  %v3404_v23 = vpop.f32.mrb[53].mxu1 }
 0x2e0   : > { %v3580_v56 = vadd.f32 %v3404_v23, %v3107_v21  ;;  %v3406_v9 = vpop.f32.mrb[54].mxu1 }
 0x2e1   : > { %v3407_v12 = vpop.f32.mrb[55].mxu1 }
 0x2e3   : > { %v3443_v20 = vpop.f32.mrb[56].mxu0 }
 0x2e4   : > { %v3581_v32 = vadd.f32 %v3443_v20, %v3108_v13  ;;  %v3445_v19 = vpop.f32.mrb[57].mxu0 }
 0x2e5   : > { %v3582_v37 = vadd.f32 %v3445_v19, %v3109_v46  ;;  %v3447_v40 = vpop.f32.mrb[58].mxu0 }
 0x2e6   : > { %v3484_v54 = vpop.f32.mrb[56].mxu1  ;;  %v3448_v63 = vpop.f32.mrb[59].mxu0 }
 0x2e7   : > { %v3583_v15 = vadd.f32 %v3484_v54, %v3110_v50  ;;  %v3486_v29 = vpop.f32.mrb[57].mxu1 }
 0x2e8   : > { %v3584_v4 = vadd.f32 %v3486_v29, %v3111_v27  ;;  %v3488_v45 = vpop.f32.mrb[58].mxu1 }
 0x2e9   : > { %v3489_v30 = vpop.f32.mrb[59].mxu1 }
 0x2eb   : > { %v3525_v5 = vpop.f32.mrb[60].mxu0 }
 0x2ec   : > { %v3585_v41 = vadd.f32 %v3525_v5, %v3112_v10  ;;  %v3527_v28 = vpop.f32.mrb[61].mxu0 }
 0x2ed   : > { %v3586_v22 = vadd.f32 %v3527_v28, %v3113_v51  ;;  %v3529_v0 = vpop.f32.mrb[62].mxu0 }
 0x2ee   : > { %v3566_v21 = vpop.f32.mrb[60].mxu1  ;;  %v3530_v52 = vpop.f32.mrb[63].mxu0 }
 0x2ef   : > { %v3587_v25 = vadd.f32 %v3566_v21, %v3114_v59  ;;  %v3568_v55 = vpop.f32.mrb[61].mxu1 }
 0x2f0   : > { %v3588_v13 = vadd.f32 %v3568_v55, %v3115_v35  ;;  %v3570_v36 = vpop.f32.mrb[62].mxu1 }
 0x2f1   : > { %v3571_v46 = vpop.f32.mrb[63].mxu1 }
 0x2f3   : > { %v3811_v14 = vpop.f32.mrb[64].mxu0 }
 0x2f4   : > { %v4105_v11 = vadd.f32 %v3811_v14, %v3573_v38  ;;  %v3813_v33 = vpop.f32.mrb[65].mxu0 }
 0x2f5   : > { %v4106_v50 = vadd.f32 %v3813_v33, %v3574_v49  ;;  %v3815_v18 = vpop.f32.mrb[66].mxu0 }
 0x2f6   : > { %v3852_v27 = vpop.f32.mrb[64].mxu1  ;;  %v3816_v34 = vpop.f32.mrb[67].mxu0 }
 0x2f7   : > { %v4107_v48 = vadd.f32 %v3852_v27, %v3575_v47  ;;  %v3854_v17 = vpop.f32.mrb[65].mxu1 }
 0x2f8   : > { %v4108_v10 = vadd.f32 %v3854_v17, %v3576_v31  ;;  %v3856_v60 = vpop.f32.mrb[66].mxu1 }
 0x2f9   : > { %v3857_v51 = vpop.f32.mrb[67].mxu1 }
 0x2fb   : > { %v3893_v44 = vpop.f32.mrb[68].mxu0 }
 0x2fc   : > { %v4109_v42 = vadd.f32 %v3893_v44, %v3577_v7  ;;  %v3895_v6 = vpop.f32.mrb[69].mxu0 }
 0x2fd   : > { %v4110_v59 = vadd.f32 %v3895_v6, %v3578_v8  ;;  %v3897_v26 = vpop.f32.mrb[70].mxu0 }
 0x2fe   : > { %v3934_v35 = vpop.f32.mrb[68].mxu1  ;;  %v3898_v16 = vpop.f32.mrb[71].mxu0 }
 0x2ff   : > { %v4111_v57 = vadd.f32 %v3934_v35, %v3579_v1  ;;  %v3936_v39 = vpop.f32.mrb[69].mxu1 }
 0x300   : > { %v4112_v38 = vadd.f32 %v3936_v39, %v3580_v56  ;;  %v3938_v2 = vpop.f32.mrb[70].mxu1 }
 0x301   : > { %v3939_v49 = vpop.f32.mrb[71].mxu1 }
 0x303   : > { %v3975_v62 = vpop.f32.mrb[72].mxu0 }
 0x304   : > { %v4113_v43 = vadd.f32 %v3975_v62, %v3581_v32  ;;  %v3977_v53 = vpop.f32.mrb[73].mxu0 }
 0x305   : > { %v4114_v47 = vadd.f32 %v3977_v53, %v3582_v37  ;;  %v3979_v3 = vpop.f32.mrb[74].mxu0 }
 0x306   : > { %v4016_v31 = vpop.f32.mrb[72].mxu1  ;;  %v3980_v61 = vpop.f32.mrb[75].mxu0 }
 0x307   : > { %v4115_v24 = vadd.f32 %v4016_v31, %v3583_v15  ;;  %v4018_v58 = vpop.f32.mrb[73].mxu1 }
 0x308   : > { %v4116_v7 = vadd.f32 %v4018_v58, %v3584_v4  ;;  %v4020_v23 = vpop.f32.mrb[74].mxu1 }
 0x309   : > { %v4021_v8 = vpop.f32.mrb[75].mxu1 }
 0x30b   : > { %v4057_v9 = vpop.f32.mrb[76].mxu0 }
 0x30c   : > { %v4117_v12 = vadd.f32 %v4057_v9, %v3585_v41  ;;  %v4059_v20 = vpop.f32.mrb[77].mxu0 }
 0x30d   : > { %v4118_v1 = vadd.f32 %v4059_v20, %v3586_v22  ;;  %v4061_v19 = vpop.f32.mrb[78].mxu0 }
 0x30e   : > { %v4098_v56 = vpop.f32.mrb[76].mxu1  ;;  %v4062_v40 = vpop.f32.mrb[79].mxu0 }
 0x30f   : > { %v4119_v54 = vadd.f32 %v4098_v56, %v3587_v25  ;;  %v4100_v63 = vpop.f32.mrb[77].mxu1 }
 0x310   : > { %v4120_v32 = vadd.f32 %v4100_v63, %v3588_v13  ;;  %v4102_v29 = vpop.f32.mrb[78].mxu1 }
 0x311   : > { %v4103_v37 = vpop.f32.mrb[79].mxu1 }
 0x313   : > { %v4343_v45 = vpop.f32.mrb[80].mxu0 }
 0x314   : > { %v4637_v30 = vadd.f32 %v4343_v45, %v4105_v11  ;;  %v4345_v5 = vpop.f32.mrb[81].mxu0 }
 0x315   : > { %v4638_v15 = vadd.f32 %v4345_v5, %v4106_v50  ;;  %v4347_v28 = vpop.f32.mrb[82].mxu0 }
 0x316   : > { %v4384_v4 = vpop.f32.mrb[80].mxu1  ;;  %v4348_v0 = vpop.f32.mrb[83].mxu0 }
 0x317   : > { %v4639_v21 = vadd.f32 %v4384_v4, %v4107_v48  ;;  %v4386_v52 = vpop.f32.mrb[81].mxu1 }
 0x318   : > { %v4640_v41 = vadd.f32 %v4386_v52, %v4108_v10  ;;  %v4388_v55 = vpop.f32.mrb[82].mxu1 }
 0x319   : > { %v4389_v22 = vpop.f32.mrb[83].mxu1 }
 0x31b   : > { %v4425_v36 = vpop.f32.mrb[84].mxu0 }
 0x31c   : > { %v4641_v46 = vadd.f32 %v4425_v36, %v4109_v42  ;;  %v4427_v14 = vpop.f32.mrb[85].mxu0 }
 0x31d   : > { %v4642_v25 = vadd.f32 %v4427_v14, %v4110_v59  ;;  %v4429_v33 = vpop.f32.mrb[86].mxu0 }
 0x31e   : > { %v4466_v13 = vpop.f32.mrb[84].mxu1  ;;  %v4430_v18 = vpop.f32.mrb[87].mxu0 }
 0x31f   : > { %v4643_v27 = vadd.f32 %v4466_v13, %v4111_v57  ;;  %v4468_v34 = vpop.f32.mrb[85].mxu1 }
 0x320   : > { %v4644_v11 = vadd.f32 %v4468_v34, %v4112_v38  ;;  %v4470_v17 = vpop.f32.mrb[86].mxu1 }
 0x321   : > { %v4471_v50 = vpop.f32.mrb[87].mxu1 }
 0x323   : > { %v4507_v60 = vpop.f32.mrb[88].mxu0 }
 0x324   : > { %v4645_v51 = vadd.f32 %v4507_v60, %v4113_v43  ;;  %v4509_v44 = vpop.f32.mrb[89].mxu0 }
 0x325   : > { %v4646_v48 = vadd.f32 %v4509_v44, %v4114_v47  ;;  %v4511_v6 = vpop.f32.mrb[90].mxu0 }
 0x326   : > { %v4548_v10 = vpop.f32.mrb[88].mxu1  ;;  %v4512_v26 = vpop.f32.mrb[91].mxu0 }
 0x327   : > { %v4647_v35 = vadd.f32 %v4548_v10, %v4115_v24  ;;  %v4550_v16 = vpop.f32.mrb[89].mxu1 }
 0x328   : > { %v4648_v42 = vadd.f32 %v4550_v16, %v4116_v7  ;;  %v4552_v39 = vpop.f32.mrb[90].mxu1 }
 0x329   : > { %v4553_v59 = vpop.f32.mrb[91].mxu1 }
 0x32b   : > { %v4589_v2 = vpop.f32.mrb[92].mxu0 }
 0x32c   : > { %v4649_v49 = vadd.f32 %v4589_v2, %v4117_v12  ;;  %v4591_v62 = vpop.f32.mrb[93].mxu0 }
 0x32d   : > { %v4650_v57 = vadd.f32 %v4591_v62, %v4118_v1  ;;  %v4593_v53 = vpop.f32.mrb[94].mxu0 }
 0x32e   : > { %v4630_v38 = vpop.f32.mrb[92].mxu1  ;;  %v4594_v3 = vpop.f32.mrb[95].mxu0 }
 0x32f   : > { %v4651_v31 = vadd.f32 %v4630_v38, %v4119_v54  ;;  %v4632_v61 = vpop.f32.mrb[93].mxu1 }
 0x330   : > { %v4652_v43 = vadd.f32 %v4632_v61, %v4120_v32  ;;  %v4634_v58 = vpop.f32.mrb[94].mxu1 }
 0x331   : > { %v4635_v47 = vpop.f32.mrb[95].mxu1 }
 0x333   : > { %v4816_v23 = vpop.f32.mrb[96].mxu0 }
 0x334   : > { %v5110_v8 = vadd.f32 %v4816_v23, %v4637_v30  ;;  %v4818_v9 = vpop.f32.mrb[97].mxu0 }
 0x335   : > { %v5111_v24 = vadd.f32 %v4818_v9, %v4638_v15  ;;  %v4820_v20 = vpop.f32.mrb[98].mxu0 }
 0x336   : > { %v4857_v7 = vpop.f32.mrb[96].mxu1  ;;  %v4821_v19 = vpop.f32.mrb[99].mxu0 }
 0x337   : > { %v5112_v56 = vadd.f32 %v4857_v7, %v4639_v21  ;;  %v4859_v40 = vpop.f32.mrb[97].mxu1 }
 0x338   : > { %v5113_v12 = vadd.f32 %v4859_v40, %v4640_v41  ;;  %v4861_v63 = vpop.f32.mrb[98].mxu1 }
 0x339   : > { %v4862_v1 = vpop.f32.mrb[99].mxu1 }
 0x33b   : > { %v4898_v29 = vpop.f32.mrb[100].mxu0 }
 0x33c   : > { %v5114_v37 = vadd.f32 %v4898_v29, %v4641_v46  ;;  %v4900_v45 = vpop.f32.mrb[101].mxu0 }
 0x33d   : > { %v5115_v54 = vadd.f32 %v4900_v45, %v4642_v25  ;;  %v4902_v5 = vpop.f32.mrb[102].mxu0 }
 0x33e   : > { %v4939_v32 = vpop.f32.mrb[100].mxu1  ;;  %v4903_v28 = vpop.f32.mrb[103].mxu0 }
 0x33f   : > { %v5116_v4 = vadd.f32 %v4939_v32, %v4643_v27  ;;  %v4941_v0 = vpop.f32.mrb[101].mxu1 }
 0x340   : > { %v5117_v30 = vadd.f32 %v4941_v0, %v4644_v11  ;;  %v4943_v52 = vpop.f32.mrb[102].mxu1 }
 0x341   : > { %v4944_v15 = vpop.f32.mrb[103].mxu1 }
 0x343   : > { %v4980_v55 = vpop.f32.mrb[104].mxu0 }
 0x344   : > { %v5118_v22 = vadd.f32 %v4980_v55, %v4645_v51  ;;  %v4982_v36 = vpop.f32.mrb[105].mxu0 }
 0x345   : > { %v5119_v21 = vadd.f32 %v4982_v36, %v4646_v48  ;;  %v4984_v14 = vpop.f32.mrb[106].mxu0 }
 0x346   : > { %v5021_v41 = vpop.f32.mrb[104].mxu1  ;;  %v4985_v33 = vpop.f32.mrb[107].mxu0 }
 0x347   : > { %v5120_v13 = vadd.f32 %v5021_v41, %v4647_v35  ;;  %v5023_v18 = vpop.f32.mrb[105].mxu1 }
 0x348   : > { %v5121_v46 = vadd.f32 %v5023_v18, %v4648_v42  ;;  %v5025_v34 = vpop.f32.mrb[106].mxu1 }
 0x349   : > { %v5026_v25 = vpop.f32.mrb[107].mxu1 }
 0x34b   : > { %v5062_v17 = vpop.f32.mrb[108].mxu0 }
 0x34c   : > { %v5122_v50 = vadd.f32 %v5062_v17, %v4649_v49  ;;  %v5064_v60 = vpop.f32.mrb[109].mxu0 }
 0x34d   : > { %v5123_v27 = vadd.f32 %v5064_v60, %v4650_v57  ;;  %v5066_v44 = vpop.f32.mrb[110].mxu0  ;;  %v8368_v60 = vstv %s6212_s20 }
 0x34e   : > { %v5103_v11 = vpop.f32.mrb[108].mxu1  ;;  %v5067_v6 = vpop.f32.mrb[111].mxu0 }
 0x34f   : > { %v5124_v10 = vadd.f32 %v5103_v11, %v4651_v31  ;;  %v5105_v26 = vpop.f32.mrb[109].mxu1 }
 0x350   : > { %v5125_v51 = vadd.f32 %v5105_v26, %v4652_v43  ;;  %v5107_v16 = vpop.f32.mrb[110].mxu1 }
 0x351   : > { %v5108_v48 = vpop.f32.mrb[111].mxu1 }
 0x353   : > { %v5348_v39 = vpop.f32.mrb[112].mxu0 }
 0x354   : > { %v5642_v59 = vadd.f32 %v5348_v39, %v5110_v8  ;;  %v5350_v2 = vpop.f32.mrb[113].mxu0 }
 0x355   : > { %v5643_v35 = vadd.f32 %v5350_v2, %v5111_v24  ;;  %v5352_v62 = vpop.f32.mrb[114].mxu0 }
 0x356   : > { %v5389_v42 = vpop.f32.mrb[112].mxu1  ;;  %v5353_v53 = vpop.f32.mrb[115].mxu0 }
 0x357   : > { %v5644_v38 = vadd.f32 %v5389_v42, %v5112_v56  ;;  %v5391_v3 = vpop.f32.mrb[113].mxu1 }
 0x358   : > { %v5645_v49 = vadd.f32 %v5391_v3, %v5113_v12  ;;  %v5393_v61 = vpop.f32.mrb[114].mxu1 }
 0x359   : > { %v5394_v57 = vpop.f32.mrb[115].mxu1 }
 0x35b   : > { %v5430_v58 = vpop.f32.mrb[116].mxu0 }
 0x35c   : > { %v8340_v47 = vadd.f32 %v5430_v58, %v5114_v37  ;;  %v5432_v31 = vpop.f32.mrb[117].mxu0 }
 0x35d   : > { %v8342_v23 = vadd.f32 %v5432_v31, %v5115_v54  ;;  %v5434_v43 = vpop.f32.mrb[118].mxu0 }
 0x35e   : > { %v5471_v9 = vpop.f32.mrb[116].mxu1  ;;  %v5435_v20 = vpop.f32.mrb[119].mxu0 }
 0x35f   : > { %v8344_v8 = vadd.f32 %v5471_v9, %v5116_v4  ;;  %v5473_v24 = vpop.f32.mrb[117].mxu1 }
 0x360   : > { %v8346_v7 = vadd.f32 %v5473_v24, %v5117_v30  ;;  %v5475_v19 = vpop.f32.mrb[118].mxu1 }
 0x361   : > { %v5476_v56 = vpop.f32.mrb[119].mxu1 }
 0x363   : > { %v5512_v40 = vpop.f32.mrb[120].mxu0 }
 0x364   : > { %v8348_v12 = vadd.f32 %v5512_v40, %v5118_v22  ;;  %v5514_v63 = vpop.f32.mrb[121].mxu0 }
 0x365   : > { %v8350_v1 = vadd.f32 %v5514_v63, %v5119_v21  ;;  %v5516_v29 = vpop.f32.mrb[122].mxu0 }
 0x366   : > { %v5553_v37 = vpop.f32.mrb[120].mxu1  ;;  %v5517_v45 = vpop.f32.mrb[123].mxu0 }
 0x367   : > { %v8352_v54 = vadd.f32 %v5553_v37, %v5120_v13  ;;  %v5555_v5 = vpop.f32.mrb[121].mxu1 }
 0x368   : > { %v8354_v32 = vadd.f32 %v5555_v5, %v5121_v46  ;;  %v5557_v28 = vpop.f32.mrb[122].mxu1  ;;  %v8365_v46 = vpop.permute.xlu0 %6193 }
 0x369   : > { %v5558_v4 = vpop.f32.mrb[123].mxu1 }
 0x36b   : > { %v5594_v0 = vpop.f32.mrb[124].mxu0 }
 0x36c   : > { %v8356_v30 = vadd.f32 %v5594_v0, %v5122_v50  ;;  %v5596_v52 = vpop.f32.mrb[125].mxu0 }
 0x36d   : > { %v8358_v15 = vadd.f32 %v5596_v52, %v5123_v27  ;;  %v5598_v55 = vpop.f32.mrb[126].mxu0 }
 0x36e   : > { %v5635_v22 = vpop.f32.mrb[124].mxu1  ;;  %v5599_v36 = vpop.f32.mrb[127].mxu0 }
 0x36f   : > { %v8360_v21 = vadd.f32 %v5635_v22, %v5124_v10  ;;  %v5637_v14 = vpop.f32.mrb[125].mxu1 }
 0x370   : > { %v8362_v41 = vadd.f32 %v5637_v14, %v5125_v51  ;;  %v5639_v33 = vpop.f32.mrb[126].mxu1 }
 0x371   : > { %v5640_v13 = vpop.f32.mrb[127].mxu1 }
 0x373   : > { %v5880_v18 = vpop.f32.mrb[128].mxu0 }
 0x374   : > { %v6174_v34 = vadd.f32 %v5880_v18, %v5642_v59  ;;  %v5882_v25 = vpop.f32.mrb[129].mxu0 }
 0x375   : > { %v6175_v17 = vadd.f32 %v5882_v25, %v5643_v35  ;;  %v5884_v50 = vpop.f32.mrb[130].mxu0 }
 0x376   : > { %v5921_v27 = vpop.f32.mrb[128].mxu1  ;;  %v5885_v44 = vpop.f32.mrb[131].mxu0  ;;  %v6196_v11 = vadd.f32 %v8365_v46, %v6174_v34 }
 0x377   : > { %v6176_v6 = vadd.f32 %v5921_v27, %v5644_v38  ;;  %v5923_v10 = vpop.f32.mrb[129].mxu1  ;;  %v6197_v26 = vadd.f32 %v8365_v46, %v6175_v17 }
 0x378   : > { %v6177_v51 = vadd.f32 %v5923_v10, %v5645_v49  ;;  %v5925_v16 = vpop.f32.mrb[130].mxu1  ;;  %vm6213_vm8 = vcmp.ge.f32.partialorder %v6196_v11, 0.0  ;;  %v6230_v48 = vmul.f32 %v8368_v60, %v6196_v11 }
 0x379   : > { %v5926_v39 = vpop.f32.mrb[131].mxu1  ;;  %v6198_v59 = vadd.f32 %v8365_v46, %v6176_v6  ;;  %vm6214_vm9 = vcmp.ge.f32.partialorder %v6197_v26, 0.0  ;;  %v6231_v2 = vmul.f32 %v8368_v60, %v6197_v26 }
 0x37a   : > { %v6199_v35 = vadd.f32 %v8365_v46, %v6177_v51  ;;  %v6246_v62 = vsel %vm6213_vm8, %v6196_v11, %v6230_v48 }
 0x37b   : > { %v5962_v42 = vpop.f32.mrb[132].mxu0  ;;  %vm6215_vm10 = vcmp.ge.f32.partialorder %v6198_v59, 0.0  ;;  %v6232_v53 = vmul.f32 %v8368_v60, %v6198_v59  ;;  %v6247_v38 = vsel %vm6214_vm9, %v6197_v26, %v6231_v2 }
 0x37c   : > { %v6178_v3 = vadd.f32 %v5962_v42, %v8340_v47  ;;  %v5964_v49 = vpop.f32.mrb[133].mxu0  ;;  %vm6216_vm11 = vcmp.ge.f32.partialorder %v6199_v35, 0.0  ;;  %v6233_v61 = vmul.f32 %v8368_v60, %v6199_v35  ;;  %v6278_v57 = vcombine.low %v6246_v62, %v6247_v38 }
 0x37d   : > { %v6179_v58 = vadd.f32 %v5964_v49, %v8342_v23  ;;  %v6248_v31 = vsel %vm6215_vm10, %v6198_v59, %v6232_v53  ;;  %v5966_v43 = vpop.f32.mrb[134].mxu0 }
 0x37e   : > { %v6200_v9 = vadd.f32 %v8365_v46, %v6178_v3  ;;  %v6003_v20 = vpop.f32.mrb[132].mxu1  ;;  %v6249_v24 = vsel %vm6216_vm11, %v6199_v35, %v6233_v61  ;;  %6294 = vst [vmem:[%s8379_s8] sm:$0xff] %v6278_v57  ;;  %v5967_v19 = vpop.f32.mrb[135].mxu0 }
 0x37f   : > { %v6180_v56 = vadd.f32 %v6003_v20, %v8344_v8  ;;  %v6201_v47 = vadd.f32 %v8365_v46, %v6179_v58  ;;  %v6279_v40 = vcombine.low %v6248_v31, %v6249_v24  ;;  %v6005_v63 = vpop.f32.mrb[133].mxu1 }
 0x380   : > { %vm6217_vm12 = vcmp.ge.f32.partialorder %v6200_v9, 0.0  ;;  %v6234_v29 = vmul.f32 %v8368_v60, %v6200_v9  ;;  %v6181_v23 = vadd.f32 %v6005_v63, %v8346_v7  ;;  %v6007_v37 = vpop.f32.mrb[134].mxu1 }
 0x381   : > { %v6202_v45 = vadd.f32 %v8365_v46, %v6180_v56  ;;  %vm6218_vm13 = vcmp.ge.f32.partialorder %v6201_v47, 0.0  ;;  %v6235_v5 = vmul.f32 %v8368_v60, %v6201_v47  ;;  %6295 = vst [vmem:[%s8379_s8 + $0x8] sm:$0xff] %v6279_v40  ;;  %v6008_v28 = vpop.f32.mrb[135].mxu1 }
 0x382   : > { %v6250_v4 = vsel %vm6217_vm12, %v6200_v9, %v6234_v29  ;;  %v6203_v8 = vadd.f32 %v8365_v46, %v6181_v23 }
 0x383   : > { %vm6219_vm14 = vcmp.ge.f32.partialorder %v6202_v45, 0.0  ;;  %v6236_v0 = vmul.f32 %v8368_v60, %v6202_v45  ;;  %v6251_v52 = vsel %vm6218_vm13, %v6201_v47, %v6235_v5  ;;  %v6044_v55 = vpop.f32.mrb[136].mxu0 }
 0x384   : > { %v6280_v22 = vcombine.low %v6250_v4, %v6251_v52  ;;  %vm6220_vm15 = vcmp.ge.f32.partialorder %v6203_v8, 0.0  ;;  %v6237_v7 = vmul.f32 %v8368_v60, %v6203_v8  ;;  %v6182_v36 = vadd.f32 %v6044_v55, %v8348_v12  ;;  %v6046_v14 = vpop.f32.mrb[137].mxu0 }
 0x385   : > { %v6252_v33 = vsel %vm6219_vm14, %v6202_v45, %v6236_v0  ;;  %v6183_v13 = vadd.f32 %v6046_v14, %v8350_v1  ;;  %v6048_v18 = vpop.f32.mrb[138].mxu0 }
 0x386   : > { %6296 = vst [vmem:[%s8379_s8 + $0x10] sm:$0xff] %v6280_v22  ;;  %v6253_v34 = vsel %vm6220_vm15, %v6203_v8, %v6237_v7  ;;  %v6204_v25 = vadd.f32 %v8365_v46, %v6182_v36  ;;  %v6085_v17 = vpop.f32.mrb[136].mxu1  ;;  %v6049_v50 = vpop.f32.mrb[139].mxu0 }
 0x387   : > { %v6281_v27 = vcombine.low %v6252_v33, %v6253_v34  ;;  %v6184_v44 = vadd.f32 %v6085_v17, %v8352_v54  ;;  %v6205_v11 = vadd.f32 %v8365_v46, %v6183_v13  ;;  %v6087_v6 = vpop.f32.mrb[137].mxu1 }
 0x388   : > { %vm6221_vm0 = vcmp.ge.f32.partialorder %v6204_v25, 0.0  ;;  %v6238_v12 = vmul.f32 %v8368_v60, %v6204_v25  ;;  %v6185_v10 = vadd.f32 %v6087_v6, %v8354_v32  ;;  %v6089_v26 = vpop.f32.mrb[138].mxu1 }
 0x389   : > { %6297 = vst [vmem:[%s8379_s8 + $0x18] sm:$0xff] %v6281_v27  ;;  %v6206_v1 = vadd.f32 %v8365_v46, %v6184_v44  ;;  %vm6222_vm1 = vcmp.ge.f32.partialorder %v6205_v11, 0.0  ;;  %v6239_v51 = vmul.f32 %v8368_v60, %v6205_v11  ;;  %v6090_v16 = vpop.f32.mrb[139].mxu1 }
 0x38a   : > { %v6254_v48 = vsel %vm6221_vm0, %v6204_v25, %v6238_v12  ;;  %v6207_v54 = vadd.f32 %v8365_v46, %v6185_v10 }
 0x38b   : > { %vm6223_vm2 = vcmp.ge.f32.partialorder %v6206_v1, 0.0  ;;  %v6240_v39 = vmul.f32 %v8368_v60, %v6206_v1  ;;  %v6255_v59 = vsel %vm6222_vm1, %v6205_v11, %v6239_v51  ;;  %v6126_v2 = vpop.f32.mrb[140].mxu0 }
 0x38c   : > { %v6282_v35 = vcombine.low %v6254_v48, %v6255_v59  ;;  %vm6224_vm3 = vcmp.ge.f32.partialorder %v6207_v54, 0.0  ;;  %v6241_v32 = vmul.f32 %v8368_v60, %v6207_v54  ;;  %v6186_v62 = vadd.f32 %v6126_v2, %v8356_v30  ;;  %v6128_v42 = vpop.f32.mrb[141].mxu0 }
 0x38d   : > { %v6256_v53 = vsel %vm6223_vm2, %v6206_v1, %v6240_v39  ;;  %v6187_v38 = vadd.f32 %v6128_v42, %v8358_v15  ;;  %v6130_v3 = vpop.f32.mrb[142].mxu0 }
 0x38e   : > { %6298 = vst [vmem:[%s8379_s8 + $0x20] sm:$0xff] %v6282_v35  ;;  %v6257_v49 = vsel %vm6224_vm3, %v6207_v54, %v6241_v32  ;;  %v6208_v61 = vadd.f32 %v8365_v46, %v6186_v62  ;;  %v6167_v57 = vpop.f32.mrb[140].mxu1  ;;  %v6131_v58 = vpop.f32.mrb[143].mxu0 }
 0x38f   : > { %v6283_v31 = vcombine.low %v6256_v53, %v6257_v49  ;;  %v6188_v43 = vadd.f32 %v6167_v57, %v8360_v21  ;;  %v6209_v9 = vadd.f32 %v8365_v46, %v6187_v38  ;;  %v6169_v20 = vpop.f32.mrb[141].mxu1 }
 0x390   : > { %vm6225_vm4 = vcmp.ge.f32.partialorder %v6208_v61, 0.0  ;;  %v6242_v30 = vmul.f32 %v8368_v60, %v6208_v61  ;;  %v6189_v24 = vadd.f32 %v6169_v20, %v8362_v41  ;;  %v6171_v15 = vpop.f32.mrb[142].mxu1 }
 0x391   : > { %6299 = vst [vmem:[%s8379_s8 + $0x28] sm:$0xff] %v6283_v31  ;;  %v6210_v19 = vadd.f32 %v8365_v46, %v6188_v43  ;;  %vm6226_vm5 = vcmp.ge.f32.partialorder %v6209_v9, 0.0  ;;  %v6243_v56 = vmul.f32 %v8368_v60, %v6209_v9  ;;  %v6172_v47 = vpop.f32.mrb[143].mxu1 }
 0x392   : > { %v6258_v40 = vsel %vm6225_vm4, %v6208_v61, %v6242_v30  ;;  %v6211_v21 = vadd.f32 %v8365_v46, %v6189_v24 }
 0x393   : > { %vm6227_vm6 = vcmp.ge.f32.partialorder %v6210_v19, 0.0  ;;  %v6244_v63 = vmul.f32 %v8368_v60, %v6210_v19  ;;  %v6259_v29 = vsel %vm6226_vm5, %v6209_v9, %v6243_v56 }
 0x394   : > { %v6284_v23 = vcombine.low %v6258_v40, %v6259_v29  ;;  %vm6228_vm7 = vcmp.ge.f32.partialorder %v6211_v21, 0.0  ;;  %v6245_v41 = vmul.f32 %v8368_v60, %v6211_v21 }
 0x395   : > { %v6260_v37 = vsel %vm6227_vm6, %v6210_v19, %v6244_v63 }
 0x396   : > { %6300 = vst [vmem:[%s8379_s8 + $0x30] sm:$0xff] %v6284_v23  ;;  %v6261_v45 = vsel %vm6228_vm7, %v6211_v21, %v6245_v41 }
 0x397   : > { %v6285_v5 = vcombine.low %v6260_v37, %v6261_v45 }
 0x399   : > { %6301 = vst [vmem:[%s8379_s8 + $0x38] sm:$0xff] %v6285_v5 }
 0x39a PF: > { %p16_p8 = scmp.ge.s32.totalorder %s6798_s26, 4   ;;  %s8456_s17 = smov %s6705_s18 }
 0x39b   : > { %s8457_s18 = smov %s6709_s19  ;;  %s8458_s19 = smov %s6824_s15 }
 0x39c   : > { %s8459_s20 = smov %s6798_s26  ;;  %18 = sbr.rel (!%p16_p8) target bundleno = 6 (0x6), region = 88 }
 0x3a3   :  { %6323 = vsyncpa [#allocation5], 1 }
 0x3a4   :  { %6325 = vsyncpa [#allocation5 + $0x1], 1 }
 0x3a5   :  { %6326 = vsyncpa [#allocation7], 1 }

</bundles_post_ra>
